<compile_context>
chip_gen: v7x
topology: tpu7x:2x2x1
jax: 0.10.0
libtpu: 0.0.40
codegen_flags: <defaults>
</compile_context>

<pallas_src>
import functools

import numpy as np
import jax
import jax.numpy as jnp
from jax.experimental import pallas as pl
from jax.experimental.pallas import tpu as pltpu

BN_EPS = 1e-5


# ----------------------------------------------------------------------------
# Host-side constant matrices: 3x3 tap selection and average pooling as 0/1
# matmuls (zero rows encode zero padding exactly).
# ----------------------------------------------------------------------------

def _shift_taps_matrix(h, w):
    """(9*h*w, h*w): rows [t*hw:(t+1)*hw] pick the tap-t (3x3, pad=1) input
    pixel for each output pixel; out-of-range taps are all-zero rows."""
    hw = h * w
    s = np.zeros((9 * hw, hw), np.float32)
    for di in range(3):
        for dj in range(3):
            t = di * 3 + dj
            for r in range(h):
                for c in range(w):
                    ri, ci = r + di - 1, c + dj - 1
                    if 0 <= ri < h and 0 <= ci < w:
                        s[t * hw + r * w + c, ri * w + ci] = 1.0
    return s


def _avg_pool_matrix(h, w, k, stride, pad):
    """(ho*wo, h*w) 0/1 window-membership matrix for nn.AvgPool2d
    (count_include_pad=True => scale by 1/k^2 inside the kernel)."""
    ho = (h + 2 * pad - k) // stride + 1
    wo = (w + 2 * pad - k) // stride + 1
    p = np.zeros((ho * wo, h * w), np.float32)
    for r in range(ho):
        for c in range(wo):
            for i in range(k):
                for j in range(k):
                    ri, ci = r * stride + i - pad, c * stride + j - pad
                    if 0 <= ri < h and 0 <= ci < w:
                        p[r * wo + c, ri * w + ci] = 1.0
    return p, ho, wo


# ----------------------------------------------------------------------------
# Pallas kernels
# ----------------------------------------------------------------------------

def _stem_kernel(p_ref, w_ref, sc_ref, sh_ref, pool_ref, o_ref, *, pool_inv):
    """conv0 (as matmul over patches) -> norm0 -> relu0 -> pool0 (matmul)."""
    f32 = jnp.float32
    y = jnp.dot(p_ref[...], w_ref[...], preferred_element_type=f32)
    y = jnp.maximum(y * sc_ref[...] + sh_ref[...], 0.0).astype(jnp.bfloat16)
    pooled = jnp.dot(pool_ref[...], y, preferred_element_type=f32) * pool_inv
    o_ref[...] = pooled.astype(o_ref.dtype)


def _dense_block_kernel(x_ref, eye_ref, w1_ref, sc1_ref, sh1_ref,
                        sc2_ref, sh2_ref, w2_ref, taps_ref,
                        ep_sc_ref, ep_sh_ref, ep_pool_ref, ep_w_ref, ep_b_ref,
                        o_ref, *, num_layers, c_in, c_mid, growth, c_total,
                        hw, head, pool_inv):
    """One DenseBlock (+ Transition or classifier head), fully VMEM-resident."""
    f32, bf16 = jnp.float32, jnp.bfloat16

    # Block-resident feature slab (hw, c_total); channels beyond c_in start at
    # zero and layer outputs are deposited via 0/1 identity-row matmuls
    # (exactly torch.cat along channels, but never touching HBM).
    feat = jnp.dot(x_ref[...], eye_ref[pl.ds(0, c_in), :],
                   preferred_element_type=f32)
    shift = taps_ref[...]                                     # (9*hw, hw) bf16

    for l in range(num_layers):
        # norm1 -> relu1 -> conv1 (1x1 bottleneck).  K is padded to c_total
        # with zero weight rows, so not-yet-grown channels contribute nothing.
        a = jnp.maximum(feat * sc1_ref[pl.ds(l, 1), :]
                        + sh1_ref[pl.ds(l, 1), :], 0.0)
        y1 = jnp.dot(a.astype(bf16),
                     w1_ref[pl.ds(l * c_total, c_total), :],
                     preferred_element_type=f32)              # (hw, c_mid)

        # norm2 -> relu2 -> conv2 (3x3, pad=1): ReLU first, then the spatial
        # taps / zero padding via a single 0/1 shift matmul.
        b = jnp.maximum(y1 * sc2_ref[pl.ds(l, 1), :]
                        + sh2_ref[pl.ds(l, 1), :], 0.0)
        tap_rows = jnp.dot(shift, b.astype(bf16),
                           preferred_element_type=f32).astype(bf16)  # (9*hw, c_mid)
        new = jnp.zeros((hw, growth), f32)
        for t in range(9):
            w2_t = w2_ref[pl.ds((l * 9 + t) * c_mid, c_mid), :]
            new = new + jnp.dot(tap_rows[t * hw:(t + 1) * hw, :], w2_t,
                                preferred_element_type=f32)

        # torch.cat([*features, new_features], dim=1)
        feat = feat + jnp.dot(new.astype(bf16),
                              eye_ref[pl.ds(c_in + l * growth, growth), :],
                              preferred_element_type=f32)

    # Epilogue: Transition (norm->relu->1x1 conv->2x2 avgpool) or the head
    # (norm5->relu5->global avgpool->fc).  Avg-pooling is linear and commutes
    # with the channel matmul, so the (0/1 matrix) pool runs first.
    z = jnp.maximum(feat * ep_sc_ref[...] + ep_sh_ref[...], 0.0)
    pooled = jnp.dot(ep_pool_ref[...], z.astype(bf16),
                     preferred_element_type=f32) * pool_inv
    if head:
        out = jnp.dot(pooled, ep_w_ref[...], preferred_element_type=f32)
    else:
        out = jnp.dot(pooled.astype(bf16), ep_w_ref[...],
                      preferred_element_type=f32)
    o_ref[...] = (out + ep_b_ref[...]).astype(o_ref.dtype)


# ----------------------------------------------------------------------------
# pallas_call wrappers
# ----------------------------------------------------------------------------

def _full_spec(shape):
    return pl.BlockSpec(shape, lambda i, _s=len(shape): (0,) * _s)


def _stem_call(stem, patches):
    n, hw_conv, kpad = patches.shape
    hw_out = stem['pool'].shape[0]
    c0 = stem['w'].shape[1]
    return pl.pallas_call(
        functools.partial(_stem_kernel, pool_inv=1.0 / 9.0),  # pool0 is 3x3
        out_shape=jax.ShapeDtypeStruct((n, hw_out, c0), jnp.bfloat16),
        grid=(n,),
        in_specs=[
            pl.BlockSpec((None, hw_conv, kpad), lambda i: (i, 0, 0)),
            _full_spec(stem['w'].shape),
            _full_spec(stem['scale'].shape),
            _full_spec(stem['shift'].shape),
            _full_spec(stem['pool'].shape),
        ],
        out_specs=pl.BlockSpec((None, hw_out, c0), lambda i: (i, 0, 0)),
        compiler_params=pltpu.CompilerParams(
            dimension_semantics=("parallel",)),
    )(patches, stem['w'], stem['scale'], stem['shift'], stem['pool'])


def _dense_block_call(blk, x):
    n, hw, c_in = x.shape
    c_total = blk['eye'].shape[0]
    num_layers, c_mid = blk['sc2'].shape
    growth = blk['w2'].shape[1]
    head = 'fc_w' in blk                                  # static (pytree keys)

    if head:
        ep_w, ep_b = blk['fc_w'], blk['fc_b']
        ncls = ep_w.shape[1]
        pool_inv = 1.0 / float(hw)
        out_shape = jax.ShapeDtypeStruct((n, 1, ncls), jnp.float32)
        out_spec = pl.BlockSpec((None, 1, ncls), lambda i: (i, 0, 0))
    else:
        ep_w, ep_b = blk['tr_w'], blk['tr_b']
        hw_out = blk['ep_pool'].shape[0]
        c_out = ep_w.shape[1]
        pool_inv = 0.25                                   # 2x2 avg pool
        out_shape = jax.ShapeDtypeStruct((n, hw_out, c_out), jnp.bfloat16)
        out_spec = pl.BlockSpec((None, hw_out, c_out), lambda i: (i, 0, 0))

    kernel = functools.partial(
        _dense_block_kernel, num_layers=num_layers, c_in=c_in, c_mid=c_mid,
        growth=growth, c_total=c_total, hw=hw, head=head, pool_inv=pool_inv)

    out = pl.pallas_call(
        kernel,
        out_shape=out_shape,
        grid=(n,),
        in_specs=[
            pl.BlockSpec((None, hw, c_in), lambda i: (i, 0, 0)),
            _full_spec(blk['eye'].shape),
            _full_spec(blk['w1'].shape),
            _full_spec(blk['sc1'].shape),
            _full_spec(blk['sh1'].shape),
            _full_spec(blk['sc2'].shape),
            _full_spec(blk['sh2'].shape),
            _full_spec(blk['w2'].shape),
            _full_spec(blk['shift'].shape),
            _full_spec(blk['ep_scale'].shape),
            _full_spec(blk['ep_shift'].shape),
            _full_spec(blk['ep_pool'].shape),
            _full_spec(ep_w.shape),
            _full_spec(ep_b.shape),
        ],
        out_specs=out_spec,
        compiler_params=pltpu.CompilerParams(
            dimension_semantics=("parallel",)),
    )(x, blk['eye'], blk['w1'], blk['sc1'], blk['sh1'], blk['sc2'], blk['sh2'],
      blk['w2'], blk['shift'], blk['ep_scale'], blk['ep_shift'],
      blk['ep_pool'], ep_w, ep_b)

    if head:
        return out.reshape(n, out.shape[-1])
    return out


def _stem_patches(x_nhwc, kpad):
    """im2col for conv0 (7x7, stride 2, pad 3); K zero-padded to `kpad`."""
    n, h, w, c = x_nhwc.shape
    ho, wo = (h + 6 - 7) // 2 + 1, (w + 6 - 7) // 2 + 1
    xp = jnp.pad(x_nhwc, ((0, 0), (3, 3), (3, 3), (0, 0)))
    slabs = [xp[:, i:i + 2 * ho:2, j:j + 2 * wo:2, :]
             for i in range(7) for j in range(7)]
    p = jnp.concatenate(slabs, axis=-1).reshape(n, ho * wo, 49 * c)
    p = jnp.pad(p, ((0, 0), (0, 0), (0, kpad - 49 * c)))
    return p.astype(jnp.bfloat16)


# ----------------------------------------------------------------------------
# Parameters (PyTorch-equivalent init), one-time kernel-ready prep, forward
# ----------------------------------------------------------------------------

def bn_params(c):
    # Folded inference-mode BN: gamma=1, beta=0, mean=0, var=1 (PyTorch init).
    scale = jnp.full((c,), 1.0 / jnp.sqrt(1.0 + BN_EPS), jnp.float32)
    shift = jnp.zeros((c,), jnp.float32)
    return scale, shift


def kaiming_normal(key, shape):
    cout, cin, kh, kw = shape
    return jax.random.normal(key, shape, jnp.float32) * jnp.sqrt(2.0 / (cin * kh * kw))


def init_densenet_params(key, growth_rate, block_config, num_init_features,
                         bn_size, num_classes):
    keys = iter(jax.random.split(key, 256))
    params = {'conv0': kaiming_normal(next(keys), (num_init_features, 3, 7, 7)),
              'norm0': bn_params(num_init_features)}
    num_features = num_init_features
    blocks = []
    for i, num_layers in enumerate(block_config):
        layers = []
        for l in range(num_layers):
            cin = num_features + l * growth_rate
            layers.append({
                'norm1': bn_params(cin),
                'conv1': kaiming_normal(next(keys),
                                        (bn_size * growth_rate, cin, 1, 1)),
                'norm2': bn_params(bn_size * growth_rate),
                'conv2': kaiming_normal(next(keys),
                                        (growth_rate, bn_size * growth_rate, 3, 3)),
            })
        num_features += num_layers * growth_rate
        block = {'layers': layers}
        if i != len(block_config) - 1:
            block['trans_norm'] = bn_params(num_features)
            block['trans_conv'] = kaiming_normal(
                next(keys), (num_features // 2, num_features, 1, 1))
            num_features //= 2
        blocks.append(block)
    params['blocks'] = blocks
    params['norm5'] = bn_params(num_features)
    params['fc_w'] = (jax.random.normal(next(keys),
                                        (num_classes, num_features), jnp.float32)
                      * (1.0 / num_features) ** 0.5)
    params['fc_b'] = jnp.zeros((num_classes,), jnp.float32)
    return params


def prepare_params(params, image_size):
    """One-time transform into MXU-ready (K, Cout) bf16 weights, padded BN
    params and the constant 0/1 shift / pool / identity matrices (hoisted out
    of the jitted forward, per the performance review)."""
    hin, win = image_size
    bf16 = jnp.bfloat16

    # ---- stem ----
    c0 = params['conv0'].shape[0]
    w0 = jnp.transpose(params['conv0'], (2, 3, 1, 0)).reshape(-1, c0)   # (147, c0)
    kpad = ((w0.shape[0] + 127) // 128) * 128
    w0 = jnp.pad(w0, ((0, kpad - w0.shape[0]), (0, 0))).astype(bf16)
    s0, b0 = params['norm0']
    hc, wc = hin // 2, win // 2                       # conv0 output spatial
    p0, h, w = _avg_pool_matrix(hc, wc, 3, 2, 1)      # pool0
    stem = {'w': w0, 'scale': s0.reshape(1, -1), 'shift': b0.reshape(1, -1),
            'pool': jnp.asarray(p0, bf16)}

    # ---- dense blocks ----
    blocks = []
    for block in params['blocks']:
        layers = block['layers']
        n_layers = len(layers)
        growth = layers[0]['conv2'].shape[0]
        c_mid = layers[0]['conv2'].shape[1]
        c_in = layers[0]['conv1'].shape[1]
        c_total = c_in + n_layers * growth
        hw = h * w
        w1s, sc1s, sh1s, sc2s, sh2s, w2s = [], [], [], [], [], []
        for l, lay in enumerate(layers):
            k = c_in + l * growth
            w1 = lay['conv1'].reshape(lay['conv1'].shape[0], k).T        # (k, c_mid)
            w1s.append(jnp.pad(w1, ((0, c_total - k), (0, 0))))          # zero rows
            s1, b1 = lay['norm1']
            sc1s.append(jnp.pad(s1, (0, c_total - k), constant_values=1.0))
            sh1s.append(jnp.pad(b1, (0, c_total - k)))
            s2, b2 = lay['norm2']
            sc2s.append(s2)
            sh2s.append(b2)
            w2s.append(jnp.transpose(lay['conv2'], (2, 3, 1, 0))
                       .reshape(9 * c_mid, growth))
        blk = {
            'eye': jnp.eye(c_total, dtype=bf16),
            'w1': jnp.concatenate(w1s, 0).astype(bf16),    # (L*c_total, c_mid)
            'sc1': jnp.stack(sc1s), 'sh1': jnp.stack(sh1s),
            'sc2': jnp.stack(sc2s), 'sh2': jnp.stack(sh2s),
            'w2': jnp.concatenate(w2s, 0).astype(bf16),    # (L*9*c_mid, growth)
            'shift': jnp.asarray(_shift_taps_matrix(h, w), bf16),
        }
        if 'trans_conv' in block:
            st, bt = block['trans_norm']
            c_out = block['trans_conv'].shape[0]
            blk['ep_scale'] = st.reshape(1, -1)
            blk['ep_shift'] = bt.reshape(1, -1)
            pm, h, w = _avg_pool_matrix(h, w, 2, 2, 0)
            blk['ep_pool'] = jnp.asarray(pm, bf16)
            blk['tr_w'] = (block['trans_conv'].reshape(c_out, c_total).T
                           .astype(bf16))
            blk['tr_b'] = jnp.zeros((1, c_out), jnp.float32)
        else:
            s5, b5 = params['norm5']
            blk['ep_scale'] = s5.reshape(1, -1)
            blk['ep_shift'] = b5.reshape(1, -1)
            blk['ep_pool'] = jnp.ones((1, hw), bf16)       # global avg pool
            blk['fc_w'] = params['fc_w'].T.astype(jnp.float32)
            blk['fc_b'] = params['fc_b'].reshape(1, -1)
        blocks.append(blk)
    return {'stem': stem, 'blocks': blocks}


def densenet_forward(prep, x_nchw):
    x = jnp.transpose(x_nchw, (0, 2, 3, 1)).astype(jnp.float32)   # NCHW -> NHWC
    patches = _stem_patches(x, prep['stem']['w'].shape[0])
    act = _stem_call(prep['stem'], patches)            # (N, HW0, C0) bf16
    for blk in prep['blocks']:
        act = _dense_block_call(blk, act)              # last block returns logits
    return act


# ----------------------------------------------------------------------------
# main
# ----------------------------------------------------------------------------

if __name__ == "__main__":
    # Small DenseNet config (same structure as the reference module, scaled down).
    GROWTH_RATE = 8
    BLOCK_CONFIG = (2, 2)
    NUM_INIT_FEATURES = 16
    BN_SIZE = 2
    NUM_CLASSES = 10

    key = jax.random.PRNGKey(0)
    k_params, k_input = jax.random.split(key)

    params = init_densenet_params(k_params, GROWTH_RATE, BLOCK_CONFIG,
                                  NUM_INIT_FEATURES, BN_SIZE, NUM_CLASSES)
    prep = prepare_params(params, image_size=(32, 32))   # one-time weight prep

    # PyTorch-convention NCHW input: batch=2, 3 channels, 32x32 spatial.
    x = jax.random.normal(k_input, (2, 3, 32, 32), jnp.float32)

    fwd = jax.jit(densenet_forward)
    out = jax.block_until_ready(fwd(prep, x))

    assert out.shape == (2, NUM_CLASSES), out.shape
    assert jnp.all(jnp.isfinite(out))
    print("KERNEL_OK")
</pallas_src>

<mosaic_0001>
module attributes {stable_mosaic.version = 11 : i64} {
  func.func @_stem_kernel(%arg0: i32, %arg1: memref<1x256x256xbf16, #tpu.memory_space<vmem>>, %arg2: memref<256x16xbf16, #tpu.memory_space<vmem>>, %arg3: memref<1x16xf32, #tpu.memory_space<vmem>>, %arg4: memref<1x16xf32, #tpu.memory_space<vmem>>, %arg5: memref<64x256xbf16, #tpu.memory_space<vmem>>, %arg6: memref<1x64x16xbf16, #tpu.memory_space<vmem>>) attributes {dimension_semantics = [#tpu.dimension_semantics<parallel>], iteration_bounds = array<i64: 2>, scalar_prefetch = 0 : i64, scratch_operands = 0 : i64, tpu.core_type = #tpu.core_type<tc>, window_params = [{transform_indices = @transform_0, window_bounds = array<i64: 1, 256, 256>}, {pipeline_mode = #tpu.pipeline_mode<synchronous>, transform_indices = @transform_1, window_bounds = array<i64: 256, 16>}, {pipeline_mode = #tpu.pipeline_mode<synchronous>, transform_indices = @transform_2, window_bounds = array<i64: 1, 16>}, {pipeline_mode = #tpu.pipeline_mode<synchronous>, transform_indices = @transform_3, window_bounds = array<i64: 1, 16>}, {pipeline_mode = #tpu.pipeline_mode<synchronous>, transform_indices = @transform_4, window_bounds = array<i64: 64, 256>}, {transform_indices = @transform_5, window_bounds = array<i64: 1, 64, 16>}]} {
    %c0 = arith.constant 0 : index
    %c0_0 = arith.constant 0 : index
    %c0_1 = arith.constant 0 : index
    %0 = vector.load %arg1[%c0, %c0_0, %c0_1] : memref<1x256x256xbf16, #tpu.memory_space<vmem>>, vector<1x256x256xbf16>
    %1 = vector.shape_cast %0 : vector<1x256x256xbf16> to vector<256x256xbf16>
    %c0_2 = arith.constant 0 : index
    %c0_3 = arith.constant 0 : index
    %2 = vector.load %arg2[%c0_2, %c0_3] : memref<256x16xbf16, #tpu.memory_space<vmem>>, vector<256x16xbf16>
    %cst = arith.constant dense<0.000000e+00> : vector<256x16xf32>
    %3 = tpu.matmul %1, %2, %cst {dimension_numbers = #tpu.dot_dimension_numbers<[1], [0], [0], [1], [0, 0, 1, 1], [], []>} : vector<256x256xbf16>, vector<256x16xbf16>, vector<256x16xf32> -> vector<256x16xf32>
    %c0_4 = arith.constant 0 : index
    %c0_5 = arith.constant 0 : index
    %4 = vector.load %arg3[%c0_4, %c0_5] : memref<1x16xf32, #tpu.memory_space<vmem>>, vector<1x16xf32>
    %5 = vector.broadcast %4 : vector<1x16xf32> to vector<256x16xf32>
    %6 = arith.mulf %3, %5 : vector<256x16xf32>
    %c0_6 = arith.constant 0 : index
    %c0_7 = arith.constant 0 : index
    %7 = vector.load %arg4[%c0_6, %c0_7] : memref<1x16xf32, #tpu.memory_space<vmem>>, vector<1x16xf32>
    %8 = vector.broadcast %7 : vector<1x16xf32> to vector<256x16xf32>
    %9 = arith.addf %6, %8 : vector<256x16xf32>
    %cst_8 = arith.constant 0.000000e+00 : f32
    %10 = vector.broadcast %cst_8 : f32 to vector<256x16xf32>
    %11 = arith.maximumf %9, %10 : vector<256x16xf32>
    %12 = arith.truncf %11 : vector<256x16xf32> to vector<256x16xbf16>
    %c0_9 = arith.constant 0 : index
    %c0_10 = arith.constant 0 : index
    %13 = vector.load %arg5[%c0_9, %c0_10] : memref<64x256xbf16, #tpu.memory_space<vmem>>, vector<64x256xbf16>
    %cst_11 = arith.constant dense<0.000000e+00> : vector<64x16xf32>
    %14 = tpu.matmul %13, %12, %cst_11 {dimension_numbers = #tpu.dot_dimension_numbers<[1], [0], [0], [1], [0, 0, 1, 1], [], []>} : vector<64x256xbf16>, vector<256x16xbf16>, vector<64x16xf32> -> vector<64x16xf32>
    %cst_12 = arith.constant 0.111111112 : f32
    %15 = vector.broadcast %cst_12 : f32 to vector<64x16xf32>
    %16 = arith.mulf %14, %15 : vector<64x16xf32>
    %17 = arith.truncf %16 : vector<64x16xf32> to vector<64x16xbf16>
    %c0_13 = arith.constant 0 : index
    %c0_14 = arith.constant 0 : index
    %c0_15 = arith.constant 0 : index
    %18 = vector.load %arg6[%c0_13, %c0_14, %c0_15] : memref<1x64x16xbf16, #tpu.memory_space<vmem>>, vector<1x64x16xbf16>
    %19 = vector.shape_cast %18 : vector<1x64x16xbf16> to vector<64x16xbf16>
    %20 = vector.shape_cast %17 : vector<64x16xbf16> to vector<1x64x16xbf16>
    tpu.vector_store %arg6[%c0_13, %c0_14, %c0_15], %20 {strides = array<i32>} : memref<1x64x16xbf16, #tpu.memory_space<vmem>>, vector<1x64x16xbf16>,
    return
  }
  func.func @transform_0(%arg0: i32) -> (i32, i32, i32) {
    %c0_i32 = arith.constant 0 : i32
    %c0_i32_0 = arith.constant 0 : i32
    %c0_i32_1 = arith.constant 0 : i32
    return %arg0, %c0_i32, %c0_i32_0 : i32, i32, i32
  }
  func.func @transform_1(%arg0: i32) -> (i32, i32) {
    %c0_i32 = arith.constant 0 : i32
    %c0_i32_0 = arith.constant 0 : i32
    %c0_i32_1 = arith.constant 0 : i32
    return %c0_i32, %c0_i32_0 : i32, i32
  }
  func.func @transform_2(%arg0: i32) -> (i32, i32) {
    %c0_i32 = arith.constant 0 : i32
    %c0_i32_0 = arith.constant 0 : i32
    %c0_i32_1 = arith.constant 0 : i32
    return %c0_i32, %c0_i32_0 : i32, i32
  }
  func.func @transform_3(%arg0: i32) -> (i32, i32) {
    %c0_i32 = arith.constant 0 : i32
    %c0_i32_0 = arith.constant 0 : i32
    %c0_i32_1 = arith.constant 0 : i32
    return %c0_i32, %c0_i32_0 : i32, i32
  }
  func.func @transform_4(%arg0: i32) -> (i32, i32) {
    %c0_i32 = arith.constant 0 : i32
    %c0_i32_0 = arith.constant 0 : i32
    %c0_i32_1 = arith.constant 0 : i32
    return %c0_i32, %c0_i32_0 : i32, i32
  }
  func.func @transform_5(%arg0: i32) -> (i32, i32, i32) {
    %c0_i32 = arith.constant 0 : i32
    %c0_i32_0 = arith.constant 0 : i32
    %c0_i32_1 = arith.constant 0 : i32
    return %arg0, %c0_i32, %c0_i32_0 : i32, i32, i32
  }
}

module attributes {stable_mosaic.version = 11 : i64} {
  func.func @_dense_block_kernel(%arg0: i32, %arg1: memref<1x64x16xbf16, #tpu.memory_space<vmem>>, %arg2: memref<32x32xbf16, #tpu.memory_space<vmem>>, %arg3: memref<64x16xbf16, #tpu.memory_space<vmem>>, %arg4: memref<2x32xf32, #tpu.memory_space<vmem>>, %arg5: memref<2x32xf32, #tpu.memory_space<vmem>>, %arg6: memref<2x16xf32, #tpu.memory_space<vmem>>, %arg7: memref<2x16xf32, #tpu.memory_space<vmem>>, %arg8: memref<288x8xbf16, #tpu.memory_space<vmem>>, %arg9: memref<576x64xbf16, #tpu.memory_space<vmem>>, %arg10: memref<1x32xf32, #tpu.memory_space<vmem>>, %arg11: memref<1x32xf32, #tpu.memory_space<vmem>>, %arg12: memref<16x64xbf16, #tpu.memory_space<vmem>>, %arg13: memref<32x16xbf16, #tpu.memory_space<vmem>>, %arg14: memref<1x16xf32, #tpu.memory_space<vmem>>, %arg15: memref<1x16x16xbf16, #tpu.memory_space<vmem>>) attributes {dimension_semantics = [#tpu.dimension_semantics<parallel>], iteration_bounds = array<i64: 2>, scalar_prefetch = 0 : i64, scratch_operands = 0 : i64, tpu.core_type = #tpu.core_type<tc>, window_params = [{transform_indices = @transform_0, window_bounds = array<i64: 1, 64, 16>}, {pipeline_mode = #tpu.pipeline_mode<synchronous>, transform_indices = @transform_1, window_bounds = array<i64: 32, 32>}, {pipeline_mode = #tpu.pipeline_mode<synchronous>, transform_indices = @transform_2, window_bounds = array<i64: 64, 16>}, {pipeline_mode = #tpu.pipeline_mode<synchronous>, transform_indices = @transform_3, window_bounds = array<i64: 2, 32>}, {pipeline_mode = #tpu.pipeline_mode<synchronous>, transform_indices = @transform_4, window_bounds = array<i64: 2, 32>}, {pipeline_mode = #tpu.pipeline_mode<synchronous>, transform_indices = @transform_5, window_bounds = array<i64: 2, 16>}, {pipeline_mode = #tpu.pipeline_mode<synchronous>, transform_indices = @transform_6, window_bounds = array<i64: 2, 16>}, {pipeline_mode = #tpu.pipeline_mode<synchronous>, transform_indices = @transform_7, window_bounds = array<i64: 288, 8>}, {pipeline_mode = #tpu.pipeline_mode<synchronous>, transform_indices = @transform_8, window_bounds = array<i64: 576, 64>}, {pipeline_mode = #tpu.pipeline_mode<synchronous>, transform_indices = @transform_9, window_bounds = array<i64: 1, 32>}, {pipeline_mode = #tpu.pipeline_mode<synchronous>, transform_indices = @transform_10, window_bounds = array<i64: 1, 32>}, {pipeline_mode = #tpu.pipeline_mode<synchronous>, transform_indices = @transform_11, window_bounds = array<i64: 16, 64>}, {pipeline_mode = #tpu.pipeline_mode<synchronous>, transform_indices = @transform_12, window_bounds = array<i64: 32, 16>}, {pipeline_mode = #tpu.pipeline_mode<synchronous>, transform_indices = @transform_13, window_bounds = array<i64: 1, 16>}, {transform_indices = @transform_14, window_bounds = array<i64: 1, 16, 16>}]} {
    %c0 = arith.constant 0 : index
    %c0_0 = arith.constant 0 : index
    %c0_1 = arith.constant 0 : index
    %0 = vector.load %arg1[%c0, %c0_0, %c0_1] : memref<1x64x16xbf16, #tpu.memory_space<vmem>>, vector<1x64x16xbf16>
    %1 = vector.shape_cast %0 : vector<1x64x16xbf16> to vector<64x16xbf16>
    %c0_2 = arith.constant 0 : index
    %c0_3 = arith.constant 0 : index
    %2 = vector.load %arg2[%c0_2, %c0_3] : memref<32x32xbf16, #tpu.memory_space<vmem>>, vector<16x32xbf16>
    %cst = arith.constant dense<0.000000e+00> : vector<64x32xf32>
    %3 = tpu.matmul %1, %2, %cst {dimension_numbers = #tpu.dot_dimension_numbers<[1], [0], [0], [1], [0, 0, 1, 1], [], []>} : vector<64x16xbf16>, vector<16x32xbf16>, vector<64x32xf32> -> vector<64x32xf32>
    %c0_4 = arith.constant 0 : index
    %c0_5 = arith.constant 0 : index
    %4 = vector.load %arg9[%c0_4, %c0_5] : memref<576x64xbf16, #tpu.memory_space<vmem>>, vector<576x64xbf16>
    %c0_6 = arith.constant 0 : index
    %c0_7 = arith.constant 0 : index
    %5 = vector.load %arg4[%c0_6, %c0_7] : memref<2x32xf32, #tpu.memory_space<vmem>>, vector<1x32xf32>
    %6 = vector.broadcast %5 : vector<1x32xf32> to vector<64x32xf32>
    %7 = arith.mulf %3, %6 : vector<64x32xf32>
    %c0_8 = arith.constant 0 : index
    %c0_9 = arith.constant 0 : index
    %8 = vector.load %arg5[%c0_8, %c0_9] : memref<2x32xf32, #tpu.memory_space<vmem>>, vector<1x32xf32>
    %9 = vector.broadcast %8 : vector<1x32xf32> to vector<64x32xf32>
    %10 = arith.addf %7, %9 : vector<64x32xf32>
    %cst_10 = arith.constant 0.000000e+00 : f32
    %11 = vector.broadcast %cst_10 : f32 to vector<64x32xf32>
    %12 = arith.maximumf %10, %11 : vector<64x32xf32>
    %13 = arith.truncf %12 : vector<64x32xf32> to vector<64x32xbf16>
    %c0_11 = arith.constant 0 : index
    %c0_12 = arith.constant 0 : index
    %14 = vector.load %arg3[%c0_11, %c0_12] : memref<64x16xbf16, #tpu.memory_space<vmem>>, vector<32x16xbf16>
    %cst_13 = arith.constant dense<0.000000e+00> : vector<64x16xf32>
    %15 = tpu.matmul %13, %14, %cst_13 {dimension_numbers = #tpu.dot_dimension_numbers<[1], [0], [0], [1], [0, 0, 1, 1], [], []>} : vector<64x32xbf16>, vector<32x16xbf16>, vector<64x16xf32> -> vector<64x16xf32>
    %c0_14 = arith.constant 0 : index
    %c0_15 = arith.constant 0 : index
    %16 = vector.load %arg6[%c0_14, %c0_15] : memref<2x16xf32, #tpu.memory_space<vmem>>, vector<1x16xf32>
    %17 = vector.broadcast %16 : vector<1x16xf32> to vector<64x16xf32>
    %18 = arith.mulf %15, %17 : vector<64x16xf32>
    %c0_16 = arith.constant 0 : index
    %c0_17 = arith.constant 0 : index
    %19 = vector.load %arg7[%c0_16, %c0_17] : memref<2x16xf32, #tpu.memory_space<vmem>>, vector<1x16xf32>
    %20 = vector.broadcast %19 : vector<1x16xf32> to vector<64x16xf32>
    %21 = arith.addf %18, %20 : vector<64x16xf32>
    %cst_18 = arith.constant 0.000000e+00 : f32
    %22 = vector.broadcast %cst_18 : f32 to vector<64x16xf32>
    %23 = arith.maximumf %21, %22 : vector<64x16xf32>
    %24 = arith.truncf %23 : vector<64x16xf32> to vector<64x16xbf16>
    %cst_19 = arith.constant dense<0.000000e+00> : vector<576x16xf32>
    %25 = tpu.matmul %4, %24, %cst_19 {dimension_numbers = #tpu.dot_dimension_numbers<[1], [0], [0], [1], [0, 0, 1, 1], [], []>} : vector<576x64xbf16>, vector<64x16xbf16>, vector<576x16xf32> -> vector<576x16xf32>
    %26 = arith.truncf %25 : vector<576x16xf32> to vector<576x16xbf16>
    %cst_20 = arith.constant 0.000000e+00 : f32
    %27 = vector.broadcast %cst_20 : f32 to vector<64x8xf32>
    %c0_21 = arith.constant 0 : index
    %c0_22 = arith.constant 0 : index
    %28 = vector.load %arg8[%c0_21, %c0_22] : memref<288x8xbf16, #tpu.memory_space<vmem>>, vector<16x8xbf16>
    %29 = vector.extract_strided_slice %26 {offsets = [0, 0], sizes = [64, 16], strides = [1, 1]} : vector<576x16xbf16> to vector<64x16xbf16>
    %cst_23 = arith.constant dense<0.000000e+00> : vector<64x8xf32>
    %30 = tpu.matmul %29, %28, %cst_23 {dimension_numbers = #tpu.dot_dimension_numbers<[1], [0], [0], [1], [0, 0, 1, 1], [], []>} : vector<64x16xbf16>, vector<16x8xbf16>, vector<64x8xf32> -> vector<64x8xf32>
    %31 = arith.addf %27, %30 : vector<64x8xf32>
    %c16 = arith.constant 16 : index
    %c0_24 = arith.constant 0 : index
    %32 = vector.load %arg8[%c16, %c0_24] : memref<288x8xbf16, #tpu.memory_space<vmem>>, vector<16x8xbf16>
    %33 = vector.extract_strided_slice %26 {offsets = [64, 0], sizes = [64, 16], strides = [1, 1]} : vector<576x16xbf16> to vector<64x16xbf16>
    %cst_25 = arith.constant dense<0.000000e+00> : vector<64x8xf32>
    %34 = tpu.matmul %33, %32, %cst_25 {dimension_numbers = #tpu.dot_dimension_numbers<[1], [0], [0], [1], [0, 0, 1, 1], [], []>} : vector<64x16xbf16>, vector<16x8xbf16>, vector<64x8xf32> -> vector<64x8xf32>
    %35 = arith.addf %31, %34 : vector<64x8xf32>
    %c32 = arith.constant 32 : index
    %c0_26 = arith.constant 0 : index
    %36 = vector.load %arg8[%c32, %c0_26] : memref<288x8xbf16, #tpu.memory_space<vmem>>, vector<16x8xbf16>
    %37 = vector.extract_strided_slice %26 {offsets = [128, 0], sizes = [64, 16], strides = [1, 1]} : vector<576x16xbf16> to vector<64x16xbf16>
    %cst_27 = arith.constant dense<0.000000e+00> : vector<64x8xf32>
    %38 = tpu.matmul %37, %36, %cst_27 {dimension_numbers = #tpu.dot_dimension_numbers<[1], [0], [0], [1], [0, 0, 1, 1], [], []>} : vector<64x16xbf16>, vector<16x8xbf16>, vector<64x8xf32> -> vector<64x8xf32>
    %39 = arith.addf %35, %38 : vector<64x8xf32>
    %c48 = arith.constant 48 : index
    %c0_28 = arith.constant 0 : index
    %40 = vector.load %arg8[%c48, %c0_28] : memref<288x8xbf16, #tpu.memory_space<vmem>>, vector<16x8xbf16>
    %41 = vector.extract_strided_slice %26 {offsets = [192, 0], sizes = [64, 16], strides = [1, 1]} : vector<576x16xbf16> to vector<64x16xbf16>
    %cst_29 = arith.constant dense<0.000000e+00> : vector<64x8xf32>
    %42 = tpu.matmul %41, %40, %cst_29 {dimension_numbers = #tpu.dot_dimension_numbers<[1], [0], [0], [1], [0, 0, 1, 1], [], []>} : vector<64x16xbf16>, vector<16x8xbf16>, vector<64x8xf32> -> vector<64x8xf32>
    %43 = arith.addf %39, %42 : vector<64x8xf32>
    %c64 = arith.constant 64 : index
    %c0_30 = arith.constant 0 : index
    %44 = vector.load %arg8[%c64, %c0_30] : memref<288x8xbf16, #tpu.memory_space<vmem>>, vector<16x8xbf16>
    %45 = vector.extract_strided_slice %26 {offsets = [256, 0], sizes = [64, 16], strides = [1, 1]} : vector<576x16xbf16> to vector<64x16xbf16>
    %cst_31 = arith.constant dense<0.000000e+00> : vector<64x8xf32>
    %46 = tpu.matmul %45, %44, %cst_31 {dimension_numbers = #tpu.dot_dimension_numbers<[1], [0], [0], [1], [0, 0, 1, 1], [], []>} : vector<64x16xbf16>, vector<16x8xbf16>, vector<64x8xf32> -> vector<64x8xf32>
    %47 = arith.addf %43, %46 : vector<64x8xf32>
    %c80 = arith.constant 80 : index
    %c0_32 = arith.constant 0 : index
    %48 = vector.load %arg8[%c80, %c0_32] : memref<288x8xbf16, #tpu.memory_space<vmem>>, vector<16x8xbf16>
    %49 = vector.extract_strided_slice %26 {offsets = [320, 0], sizes = [64, 16], strides = [1, 1]} : vector<576x16xbf16> to vector<64x16xbf16>
    %cst_33 = arith.constant dense<0.000000e+00> : vector<64x8xf32>
    %50 = tpu.matmul %49, %48, %cst_33 {dimension_numbers = #tpu.dot_dimension_numbers<[1], [0], [0], [1], [0, 0, 1, 1], [], []>} : vector<64x16xbf16>, vector<16x8xbf16>, vector<64x8xf32> -> vector<64x8xf32>
    %51 = arith.addf %47, %50 : vector<64x8xf32>
    %c96 = arith.constant 96 : index
    %c0_34 = arith.constant 0 : index
    %52 = vector.load %arg8[%c96, %c0_34] : memref<288x8xbf16, #tpu.memory_space<vmem>>, vector<16x8xbf16>
    %53 = vector.extract_strided_slice %26 {offsets = [384, 0], sizes = [64, 16], strides = [1, 1]} : vector<576x16xbf16> to vector<64x16xbf16>
    %cst_35 = arith.constant dense<0.000000e+00> : vector<64x8xf32>
    %54 = tpu.matmul %53, %52, %cst_35 {dimension_numbers = #tpu.dot_dimension_numbers<[1], [0], [0], [1], [0, 0, 1, 1], [], []>} : vector<64x16xbf16>, vector<16x8xbf16>, vector<64x8xf32> -> vector<64x8xf32>
    %55 = arith.addf %51, %54 : vector<64x8xf32>
    %c112 = arith.constant 112 : index
    %c0_36 = arith.constant 0 : index
    %56 = vector.load %arg8[%c112, %c0_36] : memref<288x8xbf16, #tpu.memory_space<vmem>>, vector<16x8xbf16>
    %57 = vector.extract_strided_slice %26 {offsets = [448, 0], sizes = [64, 16], strides = [1, 1]} : vector<576x16xbf16> to vector<64x16xbf16>
    %cst_37 = arith.constant dense<0.000000e+00> : vector<64x8xf32>
    %58 = tpu.matmul %57, %56, %cst_37 {dimension_numbers = #tpu.dot_dimension_numbers<[1], [0], [0], [1], [0, 0, 1, 1], [], []>} : vector<64x16xbf16>, vector<16x8xbf16>, vector<64x8xf32> -> vector<64x8xf32>
    %59 = arith.addf %55, %58 : vector<64x8xf32>
    %c128 = arith.constant 128 : index
    %c0_38 = arith.constant 0 : index
    %60 = vector.load %arg8[%c128, %c0_38] : memref<288x8xbf16, #tpu.memory_space<vmem>>, vector<16x8xbf16>
    %61 = vector.extract_strided_slice %26 {offsets = [512, 0], sizes = [64, 16], strides = [1, 1]} : vector<576x16xbf16> to vector<64x16xbf16>
    %cst_39 = arith.constant dense<0.000000e+00> : vector<64x8xf32>
    %62 = tpu.matmul %61, %60, %cst_39 {dimension_numbers = #tpu.dot_dimension_numbers<[1], [0], [0], [1], [0, 0, 1, 1], [], []>} : vector<64x16xbf16>, vector<16x8xbf16>, vector<64x8xf32> -> vector<64x8xf32>
    %63 = arith.addf %59, %62 : vector<64x8xf32>
    %64 = arith.truncf %63 : vector<64x8xf32> to vector<64x8xbf16>
    %c16_40 = arith.constant 16 : index
    %c0_41 = arith.constant 0 : index
    %65 = vector.load %arg2[%c16_40, %c0_41] : memref<32x32xbf16, #tpu.memory_space<vmem>>, vector<8x32xbf16>
    %cst_42 = arith.constant dense<0.000000e+00> : vector<64x32xf32>
    %66 = tpu.matmul %64, %65, %cst_42 {dimension_numbers = #tpu.dot_dimension_numbers<[1], [0], [0], [1], [0, 0, 1, 1], [], []>} : vector<64x8xbf16>, vector<8x32xbf16>, vector<64x32xf32> -> vector<64x32xf32>
    %67 = arith.addf %3, %66 : vector<64x32xf32>
    %c1 = arith.constant 1 : index
    %c0_43 = arith.constant 0 : index
    %68 = vector.load %arg4[%c1, %c0_43] : memref<2x32xf32, #tpu.memory_space<vmem>>, vector<1x32xf32>
    %69 = vector.broadcast %68 : vector<1x32xf32> to vector<64x32xf32>
    %70 = arith.mulf %67, %69 : vector<64x32xf32>
    %c1_44 = arith.constant 1 : index
    %c0_45 = arith.constant 0 : index
    %71 = vector.load %arg5[%c1_44, %c0_45] : memref<2x32xf32, #tpu.memory_space<vmem>>, vector<1x32xf32>
    %72 = vector.broadcast %71 : vector<1x32xf32> to vector<64x32xf32>
    %73 = arith.addf %70, %72 : vector<64x32xf32>
    %cst_46 = arith.constant 0.000000e+00 : f32
    %74 = vector.broadcast %cst_46 : f32 to vector<64x32xf32>
    %75 = arith.maximumf %73, %74 : vector<64x32xf32>
    %76 = arith.truncf %75 : vector<64x32xf32> to vector<64x32xbf16>
    %c32_47 = arith.constant 32 : index
    %c0_48 = arith.constant 0 : index
    %77 = vector.load %arg3[%c32_47, %c0_48] : memref<64x16xbf16, #tpu.memory_space<vmem>>, vector<32x16xbf16>
    %cst_49 = arith.constant dense<0.000000e+00> : vector<64x16xf32>
    %78 = tpu.matmul %76, %77, %cst_49 {dimension_numbers = #tpu.dot_dimension_numbers<[1], [0], [0], [1], [0, 0, 1, 1], [], []>} : vector<64x32xbf16>, vector<32x16xbf16>, vector<64x16xf32> -> vector<64x16xf32>
    %c1_50 = arith.constant 1 : index
    %c0_51 = arith.constant 0 : index
    %79 = vector.load %arg6[%c1_50, %c0_51] : memref<2x16xf32, #tpu.memory_space<vmem>>, vector<1x16xf32>
    %80 = vector.broadcast %79 : vector<1x16xf32> to vector<64x16xf32>
    %81 = arith.mulf %78, %80 : vector<64x16xf32>
    %c1_52 = arith.constant 1 : index
    %c0_53 = arith.constant 0 : index
    %82 = vector.load %arg7[%c1_52, %c0_53] : memref<2x16xf32, #tpu.memory_space<vmem>>, vector<1x16xf32>
    %83 = vector.broadcast %82 : vector<1x16xf32> to vector<64x16xf32>
    %84 = arith.addf %81, %83 : vector<64x16xf32>
    %cst_54 = arith.constant 0.000000e+00 : f32
    %85 = vector.broadcast %cst_54 : f32 to vector<64x16xf32>
    %86 = arith.maximumf %84, %85 : vector<64x16xf32>
    %87 = arith.truncf %86 : vector<64x16xf32> to vector<64x16xbf16>
    %cst_55 = arith.constant dense<0.000000e+00> : vector<576x16xf32>
    %88 = tpu.matmul %4, %87, %cst_55 {dimension_numbers = #tpu.dot_dimension_numbers<[1], [0], [0], [1], [0, 0, 1, 1], [], []>} : vector<576x64xbf16>, vector<64x16xbf16>, vector<576x16xf32> -> vector<576x16xf32>
    %89 = arith.truncf %88 : vector<576x16xf32> to vector<576x16xbf16>
    %cst_56 = arith.constant 0.000000e+00 : f32
    %90 = vector.broadcast %cst_56 : f32 to vector<64x8xf32>
    %c144 = arith.constant 144 : index
    %c0_57 = arith.constant 0 : index
    %91 = vector.load %arg8[%c144, %c0_57] : memref<288x8xbf16, #tpu.memory_space<vmem>>, vector<16x8xbf16>
    %92 = vector.extract_strided_slice %89 {offsets = [0, 0], sizes = [64, 16], strides = [1, 1]} : vector<576x16xbf16> to vector<64x16xbf16>
    %cst_58 = arith.constant dense<0.000000e+00> : vector<64x8xf32>
    %93 = tpu.matmul %92, %91, %cst_58 {dimension_numbers = #tpu.dot_dimension_numbers<[1], [0], [0], [1], [0, 0, 1, 1], [], []>} : vector<64x16xbf16>, vector<16x8xbf16>, vector<64x8xf32> -> vector<64x8xf32>
    %94 = arith.addf %90, %93 : vector<64x8xf32>
    %c160 = arith.constant 160 : index
    %c0_59 = arith.constant 0 : index
    %95 = vector.load %arg8[%c160, %c0_59] : memref<288x8xbf16, #tpu.memory_space<vmem>>, vector<16x8xbf16>
    %96 = vector.extract_strided_slice %89 {offsets = [64, 0], sizes = [64, 16], strides = [1, 1]} : vector<576x16xbf16> to vector<64x16xbf16>
    %cst_60 = arith.constant dense<0.000000e+00> : vector<64x8xf32>
    %97 = tpu.matmul %96, %95, %cst_60 {dimension_numbers = #tpu.dot_dimension_numbers<[1], [0], [0], [1], [0, 0, 1, 1], [], []>} : vector<64x16xbf16>, vector<16x8xbf16>, vector<64x8xf32> -> vector<64x8xf32>
    %98 = arith.addf %94, %97 : vector<64x8xf32>
    %c176 = arith.constant 176 : index
    %c0_61 = arith.constant 0 : index
    %99 = vector.load %arg8[%c176, %c0_61] : memref<288x8xbf16, #tpu.memory_space<vmem>>, vector<16x8xbf16>
    %100 = vector.extract_strided_slice %89 {offsets = [128, 0], sizes = [64, 16], strides = [1, 1]} : vector<576x16xbf16> to vector<64x16xbf16>
    %cst_62 = arith.constant dense<0.000000e+00> : vector<64x8xf32>
    %101 = tpu.matmul %100, %99, %cst_62 {dimension_numbers = #tpu.dot_dimension_numbers<[1], [0], [0], [1], [0, 0, 1, 1], [], []>} : vector<64x16xbf16>, vector<16x8xbf16>, vector<64x8xf32> -> vector<64x8xf32>
    %102 = arith.addf %98, %101 : vector<64x8xf32>
    %c192 = arith.constant 192 : index
    %c0_63 = arith.constant 0 : index
    %103 = vector.load %arg8[%c192, %c0_63] : memref<288x8xbf16, #tpu.memory_space<vmem>>, vector<16x8xbf16>
    %104 = vector.extract_strided_slice %89 {offsets = [192, 0], sizes = [64, 16], strides = [1, 1]} : vector<576x16xbf16> to vector<64x16xbf16>
    %cst_64 = arith.constant dense<0.000000e+00> : vector<64x8xf32>
    %105 = tpu.matmul %104, %103, %cst_64 {dimension_numbers = #tpu.dot_dimension_numbers<[1], [0], [0], [1], [0, 0, 1, 1], [], []>} : vector<64x16xbf16>, vector<16x8xbf16>, vector<64x8xf32> -> vector<64x8xf32>
    %106 = arith.addf %102, %105 : vector<64x8xf32>
    %c208 = arith.constant 208 : index
    %c0_65 = arith.constant 0 : index
    %107 = vector.load %arg8[%c208, %c0_65] : memref<288x8xbf16, #tpu.memory_space<vmem>>, vector<16x8xbf16>
    %108 = vector.extract_strided_slice %89 {offsets = [256, 0], sizes = [64, 16], strides = [1, 1]} : vector<576x16xbf16> to vector<64x16xbf16>
    %cst_66 = arith.constant dense<0.000000e+00> : vector<64x8xf32>
    %109 = tpu.matmul %108, %107, %cst_66 {dimension_numbers = #tpu.dot_dimension_numbers<[1], [0], [0], [1], [0, 0, 1, 1], [], []>} : vector<64x16xbf16>, vector<16x8xbf16>, vector<64x8xf32> -> vector<64x8xf32>
    %110 = arith.addf %106, %109 : vector<64x8xf32>
    %c224 = arith.constant 224 : index
    %c0_67 = arith.constant 0 : index
    %111 = vector.load %arg8[%c224, %c0_67] : memref<288x8xbf16, #tpu.memory_space<vmem>>, vector<16x8xbf16>
    %112 = vector.extract_strided_slice %89 {offsets = [320, 0], sizes = [64, 16], strides = [1, 1]} : vector<576x16xbf16> to vector<64x16xbf16>
    %cst_68 = arith.constant dense<0.000000e+00> : vector<64x8xf32>
    %113 = tpu.matmul %112, %111, %cst_68 {dimension_numbers = #tpu.dot_dimension_numbers<[1], [0], [0], [1], [0, 0, 1, 1], [], []>} : vector<64x16xbf16>, vector<16x8xbf16>, vector<64x8xf32> -> vector<64x8xf32>
    %114 = arith.addf %110, %113 : vector<64x8xf32>
    %c240 = arith.constant 240 : index
    %c0_69 = arith.constant 0 : index
    %115 = vector.load %arg8[%c240, %c0_69] : memref<288x8xbf16, #tpu.memory_space<vmem>>, vector<16x8xbf16>
    %116 = vector.extract_strided_slice %89 {offsets = [384, 0], sizes = [64, 16], strides = [1, 1]} : vector<576x16xbf16> to vector<64x16xbf16>
    %cst_70 = arith.constant dense<0.000000e+00> : vector<64x8xf32>
    %117 = tpu.matmul %116, %115, %cst_70 {dimension_numbers = #tpu.dot_dimension_numbers<[1], [0], [0], [1], [0, 0, 1, 1], [], []>} : vector<64x16xbf16>, vector<16x8xbf16>, vector<64x8xf32> -> vector<64x8xf32>
    %118 = arith.addf %114, %117 : vector<64x8xf32>
    %c256 = arith.constant 256 : index
    %c0_71 = arith.constant 0 : index
    %119 = vector.load %arg8[%c256, %c0_71] : memref<288x8xbf16, #tpu.memory_space<vmem>>, vector<16x8xbf16>
    %120 = vector.extract_strided_slice %89 {offsets = [448, 0], sizes = [64, 16], strides = [1, 1]} : vector<576x16xbf16> to vector<64x16xbf16>
    %cst_72 = arith.constant dense<0.000000e+00> : vector<64x8xf32>
    %121 = tpu.matmul %120, %119, %cst_72 {dimension_numbers = #tpu.dot_dimension_numbers<[1], [0], [0], [1], [0, 0, 1, 1], [], []>} : vector<64x16xbf16>, vector<16x8xbf16>, vector<64x8xf32> -> vector<64x8xf32>
    %122 = arith.addf %118, %121 : vector<64x8xf32>
    %c272 = arith.constant 272 : index
    %c0_73 = arith.constant 0 : index
    %123 = vector.load %arg8[%c272, %c0_73] : memref<288x8xbf16, #tpu.memory_space<vmem>>, vector<16x8xbf16>
    %124 = vector.extract_strided_slice %89 {offsets = [512, 0], sizes = [64, 16], strides = [1, 1]} : vector<576x16xbf16> to vector<64x16xbf16>
    %cst_74 = arith.constant dense<0.000000e+00> : vector<64x8xf32>
    %125 = tpu.matmul %124, %123, %cst_74 {dimension_numbers = #tpu.dot_dimension_numbers<[1], [0], [0], [1], [0, 0, 1, 1], [], []>} : vector<64x16xbf16>, vector<16x8xbf16>, vector<64x8xf32> -> vector<64x8xf32>
    %126 = arith.addf %122, %125 : vector<64x8xf32>
    %127 = arith.truncf %126 : vector<64x8xf32> to vector<64x8xbf16>
    %c24 = arith.constant 24 : index
    %c0_75 = arith.constant 0 : index
    %128 = vector.load %arg2[%c24, %c0_75] : memref<32x32xbf16, #tpu.memory_space<vmem>>, vector<8x32xbf16>
    %cst_76 = arith.constant dense<0.000000e+00> : vector<64x32xf32>
    %129 = tpu.matmul %127, %128, %cst_76 {dimension_numbers = #tpu.dot_dimension_numbers<[1], [0], [0], [1], [0, 0, 1, 1], [], []>} : vector<64x8xbf16>, vector<8x32xbf16>, vector<64x32xf32> -> vector<64x32xf32>
    %130 = arith.addf %67, %129 : vector<64x32xf32>
    %c0_77 = arith.constant 0 : index
    %c0_78 = arith.constant 0 : index
    %131 = vector.load %arg10[%c0_77, %c0_78] : memref<1x32xf32, #tpu.memory_space<vmem>>, vector<1x32xf32>
    %132 = vector.broadcast %131 : vector<1x32xf32> to vector<64x32xf32>
    %133 = arith.mulf %130, %132 : vector<64x32xf32>
    %c0_79 = arith.constant 0 : index
    %c0_80 = arith.constant 0 : index
    %134 = vector.load %arg11[%c0_79, %c0_80] : memref<1x32xf32, #tpu.memory_space<vmem>>, vector<1x32xf32>
    %135 = vector.broadcast %134 : vector<1x32xf32> to vector<64x32xf32>
    %136 = arith.addf %133, %135 : vector<64x32xf32>
    %cst_81 = arith.constant 0.000000e+00 : f32
    %137 = vector.broadcast %cst_81 : f32 to vector<64x32xf32>
    %138 = arith.maximumf %136, %137 : vector<64x32xf32>
    %c0_82 = arith.constant 0 : index
    %c0_83 = arith.constant 0 : index
    %139 = vector.load %arg12[%c0_82, %c0_83] : memref<16x64xbf16, #tpu.memory_space<vmem>>, vector<16x64xbf16>
    %140 = arith.truncf %138 : vector<64x32xf32> to vector<64x32xbf16>
    %cst_84 = arith.constant dense<0.000000e+00> : vector<16x32xf32>
    %141 = tpu.matmul %139, %140, %cst_84 {dimension_numbers = #tpu.dot_dimension_numbers<[1], [0], [0], [1], [0, 0, 1, 1], [], []>} : vector<16x64xbf16>, vector<64x32xbf16>, vector<16x32xf32> -> vector<16x32xf32>
    %cst_85 = arith.constant 2.500000e-01 : f32
    %142 = vector.broadcast %cst_85 : f32 to vector<16x32xf32>
    %143 = arith.mulf %141, %142 : vector<16x32xf32>
    %144 = arith.truncf %143 : vector<16x32xf32> to vector<16x32xbf16>
    %c0_86 = arith.constant 0 : index
    %c0_87 = arith.constant 0 : index
    %145 = vector.load %arg13[%c0_86, %c0_87] : memref<32x16xbf16, #tpu.memory_space<vmem>>, vector<32x16xbf16>
    %cst_88 = arith.constant dense<0.000000e+00> : vector<16x16xf32>
    %146 = tpu.matmul %144, %145, %cst_88 {dimension_numbers = #tpu.dot_dimension_numbers<[1], [0], [0], [1], [0, 0, 1, 1], [], []>} : vector<16x32xbf16>, vector<32x16xbf16>, vector<16x16xf32> -> vector<16x16xf32>
    %c0_89 = arith.constant 0 : index
    %c0_90 = arith.constant 0 : index
    %147 = vector.load %arg14[%c0_89, %c0_90] : memref<1x16xf32, #tpu.memory_space<vmem>>, vector<1x16xf32>
    %148 = vector.broadcast %147 : vector<1x16xf32> to vector<16x16xf32>
    %149 = arith.addf %146, %148 : vector<16x16xf32>
    %150 = arith.truncf %149 : vector<16x16xf32> to vector<16x16xbf16>
    %c0_91 = arith.constant 0 : index
    %c0_92 = arith.constant 0 : index
    %c0_93 = arith.constant 0 : index
    %151 = vector.load %arg15[%c0_91, %c0_92, %c0_93] : memref<1x16x16xbf16, #tpu.memory_space<vmem>>, vector<1x16x16xbf16>
    %152 = vector.shape_cast %151 : vector<1x16x16xbf16> to vector<16x16xbf16>
    %153 = vector.shape_cast %150 : vector<16x16xbf16> to vector<1x16x16xbf16>
    tpu.vector_store %arg15[%c0_91, %c0_92, %c0_93], %153 {strides = array<i32>} : memref<1x16x16xbf16, #tpu.memory_space<vmem>>, vector<1x16x16xbf16>,
    return
  }
  func.func @transform_0(%arg0: i32) -> (i32, i32, i32) {
    %c0_i32 = arith.constant 0 : i32
    %c0_i32_0 = arith.constant 0 : i32
    %c0_i32_1 = arith.constant 0 : i32
    return %arg0, %c0_i32, %c0_i32_0 : i32, i32, i32
  }
  func.func @transform_1(%arg0: i32) -> (i32, i32) {
    %c0_i32 = arith.constant 0 : i32
    %c0_i32_0 = arith.constant 0 : i32
    %c0_i32_1 = arith.constant 0 : i32
    return %c0_i32, %c0_i32_0 : i32, i32
  }
  func.func @transform_2(%arg0: i32) -> (i32, i32) {
    %c0_i32 = arith.constant 0 : i32
    %c0_i32_0 = arith.constant 0 : i32
    %c0_i32_1 = arith.constant 0 : i32
    return %c0_i32, %c0_i32_0 : i32, i32
  }
  func.func @transform_3(%arg0: i32) -> (i32, i32) {
    %c0_i32 = arith.constant 0 : i32
    %c0_i32_0 = arith.constant 0 : i32
    %c0_i32_1 = arith.constant 0 : i32
    return %c0_i32, %c0_i32_0 : i32, i32
  }
  func.func @transform_4(%arg0: i32) -> (i32, i32) {
    %c0_i32 = arith.constant 0 : i32
    %c0_i32_0 = arith.constant 0 : i32
    %c0_i32_1 = arith.constant 0 : i32
    return %c0_i32, %c0_i32_0 : i32, i32
  }
  func.func @transform_5(%arg0: i32) -> (i32, i32) {
    %c0_i32 = arith.constant 0 : i32
    %c0_i32_0 = arith.constant 0 : i32
    %c0_i32_1 = arith.constant 0 : i32
    return %c0_i32, %c0_i32_0 : i32, i32
  }
  func.func @transform_6(%arg0: i32) -> (i32, i32) {
    %c0_i32 = arith.constant 0 : i32
    %c0_i32_0 = arith.constant 0 : i32
    %c0_i32_1 = arith.constant 0 : i32
    return %c0_i32, %c0_i32_0 : i32, i32
  }
  func.func @transform_7(%arg0: i32) -> (i32, i32) {
    %c0_i32 = arith.constant 0 : i32
    %c0_i32_0 = arith.constant 0 : i32
    %c0_i32_1 = arith.constant 0 : i32
    return %c0_i32, %c0_i32_0 : i32, i32
  }
  func.func @transform_8(%arg0: i32) -> (i32, i32) {
    %c0_i32 = arith.constant 0 : i32
    %c0_i32_0 = arith.constant 0 : i32
    %c0_i32_1 = arith.constant 0 : i32
    return %c0_i32, %c0_i32_0 : i32, i32
  }
  func.func @transform_9(%arg0: i32) -> (i32, i32) {
    %c0_i32 = arith.constant 0 : i32
    %c0_i32_0 = arith.constant 0 : i32
    %c0_i32_1 = arith.constant 0 : i32
    return %c0_i32, %c0_i32_0 : i32, i32
  }
  func.func @transform_10(%arg0: i32) -> (i32, i32) {
    %c0_i32 = arith.constant 0 : i32
    %c0_i32_0 = arith.constant 0 : i32
    %c0_i32_1 = arith.constant 0 : i32
    return %c0_i32, %c0_i32_0 : i32, i32
  }
  func.func @transform_11(%arg0: i32) -> (i32, i32) {
    %c0_i32 = arith.constant 0 : i32
    %c0_i32_0 = arith.constant 0 : i32
    %c0_i32_1 = arith.constant 0 : i32
    return %c0_i32, %c0_i32_0 : i32, i32
  }
  func.func @transform_12(%arg0: i32) -> (i32, i32) {
    %c0_i32 = arith.constant 0 : i32
    %c0_i32_0 = arith.constant 0 : i32
    %c0_i32_1 = arith.constant 0 : i32
    return %c0_i32, %c0_i32_0 : i32, i32
  }
  func.func @transform_13(%arg0: i32) -> (i32, i32) {
    %c0_i32 = arith.constant 0 : i32
    %c0_i32_0 = arith.constant 0 : i32
    %c0_i32_1 = arith.constant 0 : i32
    return %c0_i32, %c0_i32_0 : i32, i32
  }
  func.func @transform_14(%arg0: i32) -> (i32, i32, i32) {
    %c0_i32 = arith.constant 0 : i32
    %c0_i32_0 = arith.constant 0 : i32
    %c0_i32_1 = arith.constant 0 : i32
    return %arg0, %c0_i32, %c0_i32_0 : i32, i32, i32
  }
}

module attributes {stable_mosaic.version = 11 : i64} {
  func.func @_dense_block_kernel(%arg0: i32, %arg1: memref<1x16x16xbf16, #tpu.memory_space<vmem>>, %arg2: memref<32x32xbf16, #tpu.memory_space<vmem>>, %arg3: memref<64x16xbf16, #tpu.memory_space<vmem>>, %arg4: memref<2x32xf32, #tpu.memory_space<vmem>>, %arg5: memref<2x32xf32, #tpu.memory_space<vmem>>, %arg6: memref<2x16xf32, #tpu.memory_space<vmem>>, %arg7: memref<2x16xf32, #tpu.memory_space<vmem>>, %arg8: memref<288x8xbf16, #tpu.memory_space<vmem>>, %arg9: memref<144x16xbf16, #tpu.memory_space<vmem>>, %arg10: memref<1x32xf32, #tpu.memory_space<vmem>>, %arg11: memref<1x32xf32, #tpu.memory_space<vmem>>, %arg12: memref<1x16xbf16, #tpu.memory_space<vmem>>, %arg13: memref<32x10xf32, #tpu.memory_space<vmem>>, %arg14: memref<1x10xf32, #tpu.memory_space<vmem>>, %arg15: memref<1x1x10xf32, #tpu.memory_space<vmem>>) attributes {dimension_semantics = [#tpu.dimension_semantics<parallel>], iteration_bounds = array<i64: 2>, scalar_prefetch = 0 : i64, scratch_operands = 0 : i64, tpu.core_type = #tpu.core_type<tc>, window_params = [{transform_indices = @transform_0, window_bounds = array<i64: 1, 16, 16>}, {pipeline_mode = #tpu.pipeline_mode<synchronous>, transform_indices = @transform_1, window_bounds = array<i64: 32, 32>}, {pipeline_mode = #tpu.pipeline_mode<synchronous>, transform_indices = @transform_2, window_bounds = array<i64: 64, 16>}, {pipeline_mode = #tpu.pipeline_mode<synchronous>, transform_indices = @transform_3, window_bounds = array<i64: 2, 32>}, {pipeline_mode = #tpu.pipeline_mode<synchronous>, transform_indices = @transform_4, window_bounds = array<i64: 2, 32>}, {pipeline_mode = #tpu.pipeline_mode<synchronous>, transform_indices = @transform_5, window_bounds = array<i64: 2, 16>}, {pipeline_mode = #tpu.pipeline_mode<synchronous>, transform_indices = @transform_6, window_bounds = array<i64: 2, 16>}, {pipeline_mode = #tpu.pipeline_mode<synchronous>, transform_indices = @transform_7, window_bounds = array<i64: 288, 8>}, {pipeline_mode = #tpu.pipeline_mode<synchronous>, transform_indices = @transform_8, window_bounds = array<i64: 144, 16>}, {pipeline_mode = #tpu.pipeline_mode<synchronous>, transform_indices = @transform_9, window_bounds = array<i64: 1, 32>}, {pipeline_mode = #tpu.pipeline_mode<synchronous>, transform_indices = @transform_10, window_bounds = array<i64: 1, 32>}, {pipeline_mode = #tpu.pipeline_mode<synchronous>, transform_indices = @transform_11, window_bounds = array<i64: 1, 16>}, {pipeline_mode = #tpu.pipeline_mode<synchronous>, transform_indices = @transform_12, window_bounds = array<i64: 32, 10>}, {pipeline_mode = #tpu.pipeline_mode<synchronous>, transform_indices = @transform_13, window_bounds = array<i64: 1, 10>}, {transform_indices = @transform_14, window_bounds = array<i64: 1, 1, 10>}]} {
    %c0 = arith.constant 0 : index
    %c0_0 = arith.constant 0 : index
    %c0_1 = arith.constant 0 : index
    %0 = vector.load %arg1[%c0, %c0_0, %c0_1] : memref<1x16x16xbf16, #tpu.memory_space<vmem>>, vector<1x16x16xbf16>
    %1 = vector.shape_cast %0 : vector<1x16x16xbf16> to vector<16x16xbf16>
    %c0_2 = arith.constant 0 : index
    %c0_3 = arith.constant 0 : index
    %2 = vector.load %arg2[%c0_2, %c0_3] : memref<32x32xbf16, #tpu.memory_space<vmem>>, vector<16x32xbf16>
    %cst = arith.constant dense<0.000000e+00> : vector<16x32xf32>
    %3 = tpu.matmul %1, %2, %cst {dimension_numbers = #tpu.dot_dimension_numbers<[1], [0], [0], [1], [0, 0, 1, 1], [], []>} : vector<16x16xbf16>, vector<16x32xbf16>, vector<16x32xf32> -> vector<16x32xf32>
    %c0_4 = arith.constant 0 : index
    %c0_5 = arith.constant 0 : index
    %4 = vector.load %arg9[%c0_4, %c0_5] : memref<144x16xbf16, #tpu.memory_space<vmem>>, vector<144x16xbf16>
    %c0_6 = arith.constant 0 : index
    %c0_7 = arith.constant 0 : index
    %5 = vector.load %arg4[%c0_6, %c0_7] : memref<2x32xf32, #tpu.memory_space<vmem>>, vector<1x32xf32>
    %6 = vector.broadcast %5 : vector<1x32xf32> to vector<16x32xf32>
    %7 = arith.mulf %3, %6 : vector<16x32xf32>
    %c0_8 = arith.constant 0 : index
    %c0_9 = arith.constant 0 : index
    %8 = vector.load %arg5[%c0_8, %c0_9] : memref<2x32xf32, #tpu.memory_space<vmem>>, vector<1x32xf32>
    %9 = vector.broadcast %8 : vector<1x32xf32> to vector<16x32xf32>
    %10 = arith.addf %7, %9 : vector<16x32xf32>
    %cst_10 = arith.constant 0.000000e+00 : f32
    %11 = vector.broadcast %cst_10 : f32 to vector<16x32xf32>
    %12 = arith.maximumf %10, %11 : vector<16x32xf32>
    %13 = arith.truncf %12 : vector<16x32xf32> to vector<16x32xbf16>
    %c0_11 = arith.constant 0 : index
    %c0_12 = arith.constant 0 : index
    %14 = vector.load %arg3[%c0_11, %c0_12] : memref<64x16xbf16, #tpu.memory_space<vmem>>, vector<32x16xbf16>
    %cst_13 = arith.constant dense<0.000000e+00> : vector<16x16xf32>
    %15 = tpu.matmul %13, %14, %cst_13 {dimension_numbers = #tpu.dot_dimension_numbers<[1], [0], [0], [1], [0, 0, 1, 1], [], []>} : vector<16x32xbf16>, vector<32x16xbf16>, vector<16x16xf32> -> vector<16x16xf32>
    %c0_14 = arith.constant 0 : index
    %c0_15 = arith.constant 0 : index
    %16 = vector.load %arg6[%c0_14, %c0_15] : memref<2x16xf32, #tpu.memory_space<vmem>>, vector<1x16xf32>
    %17 = vector.broadcast %16 : vector<1x16xf32> to vector<16x16xf32>
    %18 = arith.mulf %15, %17 : vector<16x16xf32>
    %c0_16 = arith.constant 0 : index
    %c0_17 = arith.constant 0 : index
    %19 = vector.load %arg7[%c0_16, %c0_17] : memref<2x16xf32, #tpu.memory_space<vmem>>, vector<1x16xf32>
    %20 = vector.broadcast %19 : vector<1x16xf32> to vector<16x16xf32>
    %21 = arith.addf %18, %20 : vector<16x16xf32>
    %cst_18 = arith.constant 0.000000e+00 : f32
    %22 = vector.broadcast %cst_18 : f32 to vector<16x16xf32>
    %23 = arith.maximumf %21, %22 : vector<16x16xf32>
    %24 = arith.truncf %23 : vector<16x16xf32> to vector<16x16xbf16>
    %cst_19 = arith.constant dense<0.000000e+00> : vector<144x16xf32>
    %25 = tpu.matmul %4, %24, %cst_19 {dimension_numbers = #tpu.dot_dimension_numbers<[1], [0], [0], [1], [0, 0, 1, 1], [], []>} : vector<144x16xbf16>, vector<16x16xbf16>, vector<144x16xf32> -> vector<144x16xf32>
    %26 = arith.truncf %25 : vector<144x16xf32> to vector<144x16xbf16>
    %cst_20 = arith.constant 0.000000e+00 : f32
    %27 = vector.broadcast %cst_20 : f32 to vector<16x8xf32>
    %c0_21 = arith.constant 0 : index
    %c0_22 = arith.constant 0 : index
    %28 = vector.load %arg8[%c0_21, %c0_22] : memref<288x8xbf16, #tpu.memory_space<vmem>>, vector<16x8xbf16>
    %29 = vector.extract_strided_slice %26 {offsets = [0, 0], sizes = [16, 16], strides = [1, 1]} : vector<144x16xbf16> to vector<16x16xbf16>
    %cst_23 = arith.constant dense<0.000000e+00> : vector<16x8xf32>
    %30 = tpu.matmul %29, %28, %cst_23 {dimension_numbers = #tpu.dot_dimension_numbers<[1], [0], [0], [1], [0, 0, 1, 1], [], []>} : vector<16x16xbf16>, vector<16x8xbf16>, vector<16x8xf32> -> vector<16x8xf32>
    %31 = arith.addf %27, %30 : vector<16x8xf32>
    %c16 = arith.constant 16 : index
    %c0_24 = arith.constant 0 : index
    %32 = vector.load %arg8[%c16, %c0_24] : memref<288x8xbf16, #tpu.memory_space<vmem>>, vector<16x8xbf16>
    %33 = vector.extract_strided_slice %26 {offsets = [16, 0], sizes = [16, 16], strides = [1, 1]} : vector<144x16xbf16> to vector<16x16xbf16>
    %cst_25 = arith.constant dense<0.000000e+00> : vector<16x8xf32>
    %34 = tpu.matmul %33, %32, %cst_25 {dimension_numbers = #tpu.dot_dimension_numbers<[1], [0], [0], [1], [0, 0, 1, 1], [], []>} : vector<16x16xbf16>, vector<16x8xbf16>, vector<16x8xf32> -> vector<16x8xf32>
    %35 = arith.addf %31, %34 : vector<16x8xf32>
    %c32 = arith.constant 32 : index
    %c0_26 = arith.constant 0 : index
    %36 = vector.load %arg8[%c32, %c0_26] : memref<288x8xbf16, #tpu.memory_space<vmem>>, vector<16x8xbf16>
    %37 = vector.extract_strided_slice %26 {offsets = [32, 0], sizes = [16, 16], strides = [1, 1]} : vector<144x16xbf16> to vector<16x16xbf16>
    %cst_27 = arith.constant dense<0.000000e+00> : vector<16x8xf32>
    %38 = tpu.matmul %37, %36, %cst_27 {dimension_numbers = #tpu.dot_dimension_numbers<[1], [0], [0], [1], [0, 0, 1, 1], [], []>} : vector<16x16xbf16>, vector<16x8xbf16>, vector<16x8xf32> -> vector<16x8xf32>
    %39 = arith.addf %35, %38 : vector<16x8xf32>
    %c48 = arith.constant 48 : index
    %c0_28 = arith.constant 0 : index
    %40 = vector.load %arg8[%c48, %c0_28] : memref<288x8xbf16, #tpu.memory_space<vmem>>, vector<16x8xbf16>
    %41 = vector.extract_strided_slice %26 {offsets = [48, 0], sizes = [16, 16], strides = [1, 1]} : vector<144x16xbf16> to vector<16x16xbf16>
    %cst_29 = arith.constant dense<0.000000e+00> : vector<16x8xf32>
    %42 = tpu.matmul %41, %40, %cst_29 {dimension_numbers = #tpu.dot_dimension_numbers<[1], [0], [0], [1], [0, 0, 1, 1], [], []>} : vector<16x16xbf16>, vector<16x8xbf16>, vector<16x8xf32> -> vector<16x8xf32>
    %43 = arith.addf %39, %42 : vector<16x8xf32>
    %c64 = arith.constant 64 : index
    %c0_30 = arith.constant 0 : index
    %44 = vector.load %arg8[%c64, %c0_30] : memref<288x8xbf16, #tpu.memory_space<vmem>>, vector<16x8xbf16>
    %45 = vector.extract_strided_slice %26 {offsets = [64, 0], sizes = [16, 16], strides = [1, 1]} : vector<144x16xbf16> to vector<16x16xbf16>
    %cst_31 = arith.constant dense<0.000000e+00> : vector<16x8xf32>
    %46 = tpu.matmul %45, %44, %cst_31 {dimension_numbers = #tpu.dot_dimension_numbers<[1], [0], [0], [1], [0, 0, 1, 1], [], []>} : vector<16x16xbf16>, vector<16x8xbf16>, vector<16x8xf32> -> vector<16x8xf32>
    %47 = arith.addf %43, %46 : vector<16x8xf32>
    %c80 = arith.constant 80 : index
    %c0_32 = arith.constant 0 : index
    %48 = vector.load %arg8[%c80, %c0_32] : memref<288x8xbf16, #tpu.memory_space<vmem>>, vector<16x8xbf16>
    %49 = vector.extract_strided_slice %26 {offsets = [80, 0], sizes = [16, 16], strides = [1, 1]} : vector<144x16xbf16> to vector<16x16xbf16>
    %cst_33 = arith.constant dense<0.000000e+00> : vector<16x8xf32>
    %50 = tpu.matmul %49, %48, %cst_33 {dimension_numbers = #tpu.dot_dimension_numbers<[1], [0], [0], [1], [0, 0, 1, 1], [], []>} : vector<16x16xbf16>, vector<16x8xbf16>, vector<16x8xf32> -> vector<16x8xf32>
    %51 = arith.addf %47, %50 : vector<16x8xf32>
    %c96 = arith.constant 96 : index
    %c0_34 = arith.constant 0 : index
    %52 = vector.load %arg8[%c96, %c0_34] : memref<288x8xbf16, #tpu.memory_space<vmem>>, vector<16x8xbf16>
    %53 = vector.extract_strided_slice %26 {offsets = [96, 0], sizes = [16, 16], strides = [1, 1]} : vector<144x16xbf16> to vector<16x16xbf16>
    %cst_35 = arith.constant dense<0.000000e+00> : vector<16x8xf32>
    %54 = tpu.matmul %53, %52, %cst_35 {dimension_numbers = #tpu.dot_dimension_numbers<[1], [0], [0], [1], [0, 0, 1, 1], [], []>} : vector<16x16xbf16>, vector<16x8xbf16>, vector<16x8xf32> -> vector<16x8xf32>
    %55 = arith.addf %51, %54 : vector<16x8xf32>
    %c112 = arith.constant 112 : index
    %c0_36 = arith.constant 0 : index
    %56 = vector.load %arg8[%c112, %c0_36] : memref<288x8xbf16, #tpu.memory_space<vmem>>, vector<16x8xbf16>
    %57 = vector.extract_strided_slice %26 {offsets = [112, 0], sizes = [16, 16], strides = [1, 1]} : vector<144x16xbf16> to vector<16x16xbf16>
    %cst_37 = arith.constant dense<0.000000e+00> : vector<16x8xf32>
    %58 = tpu.matmul %57, %56, %cst_37 {dimension_numbers = #tpu.dot_dimension_numbers<[1], [0], [0], [1], [0, 0, 1, 1], [], []>} : vector<16x16xbf16>, vector<16x8xbf16>, vector<16x8xf32> -> vector<16x8xf32>
    %59 = arith.addf %55, %58 : vector<16x8xf32>
    %c128 = arith.constant 128 : index
    %c0_38 = arith.constant 0 : index
    %60 = vector.load %arg8[%c128, %c0_38] : memref<288x8xbf16, #tpu.memory_space<vmem>>, vector<16x8xbf16>
    %61 = vector.extract_strided_slice %26 {offsets = [128, 0], sizes = [16, 16], strides = [1, 1]} : vector<144x16xbf16> to vector<16x16xbf16>
    %cst_39 = arith.constant dense<0.000000e+00> : vector<16x8xf32>
    %62 = tpu.matmul %61, %60, %cst_39 {dimension_numbers = #tpu.dot_dimension_numbers<[1], [0], [0], [1], [0, 0, 1, 1], [], []>} : vector<16x16xbf16>, vector<16x8xbf16>, vector<16x8xf32> -> vector<16x8xf32>
    %63 = arith.addf %59, %62 : vector<16x8xf32>
    %64 = arith.truncf %63 : vector<16x8xf32> to vector<16x8xbf16>
    %c16_40 = arith.constant 16 : index
    %c0_41 = arith.constant 0 : index
    %65 = vector.load %arg2[%c16_40, %c0_41] : memref<32x32xbf16, #tpu.memory_space<vmem>>, vector<8x32xbf16>
    %cst_42 = arith.constant dense<0.000000e+00> : vector<16x32xf32>
    %66 = tpu.matmul %64, %65, %cst_42 {dimension_numbers = #tpu.dot_dimension_numbers<[1], [0], [0], [1], [0, 0, 1, 1], [], []>} : vector<16x8xbf16>, vector<8x32xbf16>, vector<16x32xf32> -> vector<16x32xf32>
    %67 = arith.addf %3, %66 : vector<16x32xf32>
    %c1 = arith.constant 1 : index
    %c0_43 = arith.constant 0 : index
    %68 = vector.load %arg4[%c1, %c0_43] : memref<2x32xf32, #tpu.memory_space<vmem>>, vector<1x32xf32>
    %69 = vector.broadcast %68 : vector<1x32xf32> to vector<16x32xf32>
    %70 = arith.mulf %67, %69 : vector<16x32xf32>
    %c1_44 = arith.constant 1 : index
    %c0_45 = arith.constant 0 : index
    %71 = vector.load %arg5[%c1_44, %c0_45] : memref<2x32xf32, #tpu.memory_space<vmem>>, vector<1x32xf32>
    %72 = vector.broadcast %71 : vector<1x32xf32> to vector<16x32xf32>
    %73 = arith.addf %70, %72 : vector<16x32xf32>
    %cst_46 = arith.constant 0.000000e+00 : f32
    %74 = vector.broadcast %cst_46 : f32 to vector<16x32xf32>
    %75 = arith.maximumf %73, %74 : vector<16x32xf32>
    %76 = arith.truncf %75 : vector<16x32xf32> to vector<16x32xbf16>
    %c32_47 = arith.constant 32 : index
    %c0_48 = arith.constant 0 : index
    %77 = vector.load %arg3[%c32_47, %c0_48] : memref<64x16xbf16, #tpu.memory_space<vmem>>, vector<32x16xbf16>
    %cst_49 = arith.constant dense<0.000000e+00> : vector<16x16xf32>
    %78 = tpu.matmul %76, %77, %cst_49 {dimension_numbers = #tpu.dot_dimension_numbers<[1], [0], [0], [1], [0, 0, 1, 1], [], []>} : vector<16x32xbf16>, vector<32x16xbf16>, vector<16x16xf32> -> vector<16x16xf32>
    %c1_50 = arith.constant 1 : index
    %c0_51 = arith.constant 0 : index
    %79 = vector.load %arg6[%c1_50, %c0_51] : memref<2x16xf32, #tpu.memory_space<vmem>>, vector<1x16xf32>
    %80 = vector.broadcast %79 : vector<1x16xf32> to vector<16x16xf32>
    %81 = arith.mulf %78, %80 : vector<16x16xf32>
    %c1_52 = arith.constant 1 : index
    %c0_53 = arith.constant 0 : index
    %82 = vector.load %arg7[%c1_52, %c0_53] : memref<2x16xf32, #tpu.memory_space<vmem>>, vector<1x16xf32>
    %83 = vector.broadcast %82 : vector<1x16xf32> to vector<16x16xf32>
    %84 = arith.addf %81, %83 : vector<16x16xf32>
    %cst_54 = arith.constant 0.000000e+00 : f32
    %85 = vector.broadcast %cst_54 : f32 to vector<16x16xf32>
    %86 = arith.maximumf %84, %85 : vector<16x16xf32>
    %87 = arith.truncf %86 : vector<16x16xf32> to vector<16x16xbf16>
    %cst_55 = arith.constant dense<0.000000e+00> : vector<144x16xf32>
    %88 = tpu.matmul %4, %87, %cst_55 {dimension_numbers = #tpu.dot_dimension_numbers<[1], [0], [0], [1], [0, 0, 1, 1], [], []>} : vector<144x16xbf16>, vector<16x16xbf16>, vector<144x16xf32> -> vector<144x16xf32>
    %89 = arith.truncf %88 : vector<144x16xf32> to vector<144x16xbf16>
    %cst_56 = arith.constant 0.000000e+00 : f32
    %90 = vector.broadcast %cst_56 : f32 to vector<16x8xf32>
    %c144 = arith.constant 144 : index
    %c0_57 = arith.constant 0 : index
    %91 = vector.load %arg8[%c144, %c0_57] : memref<288x8xbf16, #tpu.memory_space<vmem>>, vector<16x8xbf16>
    %92 = vector.extract_strided_slice %89 {offsets = [0, 0], sizes = [16, 16], strides = [1, 1]} : vector<144x16xbf16> to vector<16x16xbf16>
    %cst_58 = arith.constant dense<0.000000e+00> : vector<16x8xf32>
    %93 = tpu.matmul %92, %91, %cst_58 {dimension_numbers = #tpu.dot_dimension_numbers<[1], [0], [0], [1], [0, 0, 1, 1], [], []>} : vector<16x16xbf16>, vector<16x8xbf16>, vector<16x8xf32> -> vector<16x8xf32>
    %94 = arith.addf %90, %93 : vector<16x8xf32>
    %c160 = arith.constant 160 : index
    %c0_59 = arith.constant 0 : index
    %95 = vector.load %arg8[%c160, %c0_59] : memref<288x8xbf16, #tpu.memory_space<vmem>>, vector<16x8xbf16>
    %96 = vector.extract_strided_slice %89 {offsets = [16, 0], sizes = [16, 16], strides = [1, 1]} : vector<144x16xbf16> to vector<16x16xbf16>
    %cst_60 = arith.constant dense<0.000000e+00> : vector<16x8xf32>
    %97 = tpu.matmul %96, %95, %cst_60 {dimension_numbers = #tpu.dot_dimension_numbers<[1], [0], [0], [1], [0, 0, 1, 1], [], []>} : vector<16x16xbf16>, vector<16x8xbf16>, vector<16x8xf32> -> vector<16x8xf32>
    %98 = arith.addf %94, %97 : vector<16x8xf32>
    %c176 = arith.constant 176 : index
    %c0_61 = arith.constant 0 : index
    %99 = vector.load %arg8[%c176, %c0_61] : memref<288x8xbf16, #tpu.memory_space<vmem>>, vector<16x8xbf16>
    %100 = vector.extract_strided_slice %89 {offsets = [32, 0], sizes = [16, 16], strides = [1, 1]} : vector<144x16xbf16> to vector<16x16xbf16>
    %cst_62 = arith.constant dense<0.000000e+00> : vector<16x8xf32>
    %101 = tpu.matmul %100, %99, %cst_62 {dimension_numbers = #tpu.dot_dimension_numbers<[1], [0], [0], [1], [0, 0, 1, 1], [], []>} : vector<16x16xbf16>, vector<16x8xbf16>, vector<16x8xf32> -> vector<16x8xf32>
    %102 = arith.addf %98, %101 : vector<16x8xf32>
    %c192 = arith.constant 192 : index
    %c0_63 = arith.constant 0 : index
    %103 = vector.load %arg8[%c192, %c0_63] : memref<288x8xbf16, #tpu.memory_space<vmem>>, vector<16x8xbf16>
    %104 = vector.extract_strided_slice %89 {offsets = [48, 0], sizes = [16, 16], strides = [1, 1]} : vector<144x16xbf16> to vector<16x16xbf16>
    %cst_64 = arith.constant dense<0.000000e+00> : vector<16x8xf32>
    %105 = tpu.matmul %104, %103, %cst_64 {dimension_numbers = #tpu.dot_dimension_numbers<[1], [0], [0], [1], [0, 0, 1, 1], [], []>} : vector<16x16xbf16>, vector<16x8xbf16>, vector<16x8xf32> -> vector<16x8xf32>
    %106 = arith.addf %102, %105 : vector<16x8xf32>
    %c208 = arith.constant 208 : index
    %c0_65 = arith.constant 0 : index
    %107 = vector.load %arg8[%c208, %c0_65] : memref<288x8xbf16, #tpu.memory_space<vmem>>, vector<16x8xbf16>
    %108 = vector.extract_strided_slice %89 {offsets = [64, 0], sizes = [16, 16], strides = [1, 1]} : vector<144x16xbf16> to vector<16x16xbf16>
    %cst_66 = arith.constant dense<0.000000e+00> : vector<16x8xf32>
    %109 = tpu.matmul %108, %107, %cst_66 {dimension_numbers = #tpu.dot_dimension_numbers<[1], [0], [0], [1], [0, 0, 1, 1], [], []>} : vector<16x16xbf16>, vector<16x8xbf16>, vector<16x8xf32> -> vector<16x8xf32>
    %110 = arith.addf %106, %109 : vector<16x8xf32>
    %c224 = arith.constant 224 : index
    %c0_67 = arith.constant 0 : index
    %111 = vector.load %arg8[%c224, %c0_67] : memref<288x8xbf16, #tpu.memory_space<vmem>>, vector<16x8xbf16>
    %112 = vector.extract_strided_slice %89 {offsets = [80, 0], sizes = [16, 16], strides = [1, 1]} : vector<144x16xbf16> to vector<16x16xbf16>
    %cst_68 = arith.constant dense<0.000000e+00> : vector<16x8xf32>
    %113 = tpu.matmul %112, %111, %cst_68 {dimension_numbers = #tpu.dot_dimension_numbers<[1], [0], [0], [1], [0, 0, 1, 1], [], []>} : vector<16x16xbf16>, vector<16x8xbf16>, vector<16x8xf32> -> vector<16x8xf32>
    %114 = arith.addf %110, %113 : vector<16x8xf32>
    %c240 = arith.constant 240 : index
    %c0_69 = arith.constant 0 : index
    %115 = vector.load %arg8[%c240, %c0_69] : memref<288x8xbf16, #tpu.memory_space<vmem>>, vector<16x8xbf16>
    %116 = vector.extract_strided_slice %89 {offsets = [96, 0], sizes = [16, 16], strides = [1, 1]} : vector<144x16xbf16> to vector<16x16xbf16>
    %cst_70 = arith.constant dense<0.000000e+00> : vector<16x8xf32>
    %117 = tpu.matmul %116, %115, %cst_70 {dimension_numbers = #tpu.dot_dimension_numbers<[1], [0], [0], [1], [0, 0, 1, 1], [], []>} : vector<16x16xbf16>, vector<16x8xbf16>, vector<16x8xf32> -> vector<16x8xf32>
    %118 = arith.addf %114, %117 : vector<16x8xf32>
    %c256 = arith.constant 256 : index
    %c0_71 = arith.constant 0 : index
    %119 = vector.load %arg8[%c256, %c0_71] : memref<288x8xbf16, #tpu.memory_space<vmem>>, vector<16x8xbf16>
    %120 = vector.extract_strided_slice %89 {offsets = [112, 0], sizes = [16, 16], strides = [1, 1]} : vector<144x16xbf16> to vector<16x16xbf16>
    %cst_72 = arith.constant dense<0.000000e+00> : vector<16x8xf32>
    %121 = tpu.matmul %120, %119, %cst_72 {dimension_numbers = #tpu.dot_dimension_numbers<[1], [0], [0], [1], [0, 0, 1, 1], [], []>} : vector<16x16xbf16>, vector<16x8xbf16>, vector<16x8xf32> -> vector<16x8xf32>
    %122 = arith.addf %118, %121 : vector<16x8xf32>
    %c272 = arith.constant 272 : index
    %c0_73 = arith.constant 0 : index
    %123 = vector.load %arg8[%c272, %c0_73] : memref<288x8xbf16, #tpu.memory_space<vmem>>, vector<16x8xbf16>
    %124 = vector.extract_strided_slice %89 {offsets = [128, 0], sizes = [16, 16], strides = [1, 1]} : vector<144x16xbf16> to vector<16x16xbf16>
    %cst_74 = arith.constant dense<0.000000e+00> : vector<16x8xf32>
    %125 = tpu.matmul %124, %123, %cst_74 {dimension_numbers = #tpu.dot_dimension_numbers<[1], [0], [0], [1], [0, 0, 1, 1], [], []>} : vector<16x16xbf16>, vector<16x8xbf16>, vector<16x8xf32> -> vector<16x8xf32>
    %126 = arith.addf %122, %125 : vector<16x8xf32>
    %127 = arith.truncf %126 : vector<16x8xf32> to vector<16x8xbf16>
    %c24 = arith.constant 24 : index
    %c0_75 = arith.constant 0 : index
    %128 = vector.load %arg2[%c24, %c0_75] : memref<32x32xbf16, #tpu.memory_space<vmem>>, vector<8x32xbf16>
    %cst_76 = arith.constant dense<0.000000e+00> : vector<16x32xf32>
    %129 = tpu.matmul %127, %128, %cst_76 {dimension_numbers = #tpu.dot_dimension_numbers<[1], [0], [0], [1], [0, 0, 1, 1], [], []>} : vector<16x8xbf16>, vector<8x32xbf16>, vector<16x32xf32> -> vector<16x32xf32>
    %130 = arith.addf %67, %129 : vector<16x32xf32>
    %c0_77 = arith.constant 0 : index
    %c0_78 = arith.constant 0 : index
    %131 = vector.load %arg10[%c0_77, %c0_78] : memref<1x32xf32, #tpu.memory_space<vmem>>, vector<1x32xf32>
    %132 = vector.broadcast %131 : vector<1x32xf32> to vector<16x32xf32>
    %133 = arith.mulf %130, %132 : vector<16x32xf32>
    %c0_79 = arith.constant 0 : index
    %c0_80 = arith.constant 0 : index
    %134 = vector.load %arg11[%c0_79, %c0_80] : memref<1x32xf32, #tpu.memory_space<vmem>>, vector<1x32xf32>
    %135 = vector.broadcast %134 : vector<1x32xf32> to vector<16x32xf32>
    %136 = arith.addf %133, %135 : vector<16x32xf32>
    %cst_81 = arith.constant 0.000000e+00 : f32
    %137 = vector.broadcast %cst_81 : f32 to vector<16x32xf32>
    %138 = arith.maximumf %136, %137 : vector<16x32xf32>
    %c0_82 = arith.constant 0 : index
    %c0_83 = arith.constant 0 : index
    %139 = vector.load %arg12[%c0_82, %c0_83] : memref<1x16xbf16, #tpu.memory_space<vmem>>, vector<1x16xbf16>
    %140 = arith.truncf %138 : vector<16x32xf32> to vector<16x32xbf16>
    %cst_84 = arith.constant dense<0.000000e+00> : vector<1x32xf32>
    %141 = tpu.matmul %139, %140, %cst_84 {dimension_numbers = #tpu.dot_dimension_numbers<[1], [0], [0], [1], [0, 0, 1, 1], [], []>} : vector<1x16xbf16>, vector<16x32xbf16>, vector<1x32xf32> -> vector<1x32xf32>
    %cst_85 = arith.constant 6.250000e-02 : f32
    %142 = vector.broadcast %cst_85 : f32 to vector<1x32xf32>
    %143 = arith.mulf %141, %142 : vector<1x32xf32>
    %c0_86 = arith.constant 0 : index
    %c0_87 = arith.constant 0 : index
    %144 = vector.load %arg13[%c0_86, %c0_87] : memref<32x10xf32, #tpu.memory_space<vmem>>, vector<32x10xf32>
    %cst_88 = arith.constant dense<0.000000e+00> : vector<1x10xf32>
    %145 = tpu.matmul %143, %144, %cst_88 {dimension_numbers = #tpu.dot_dimension_numbers<[1], [0], [0], [1], [0, 0, 1, 1], [], []>} : vector<1x32xf32>, vector<32x10xf32>, vector<1x10xf32> -> vector<1x10xf32>
    %c0_89 = arith.constant 0 : index
    %c0_90 = arith.constant 0 : index
    %146 = vector.load %arg14[%c0_89, %c0_90] : memref<1x10xf32, #tpu.memory_space<vmem>>, vector<1x10xf32>
    %147 = arith.addf %145, %146 : vector<1x10xf32>
    %c0_91 = arith.constant 0 : index
    %c0_92 = arith.constant 0 : index
    %c0_93 = arith.constant 0 : index
    %148 = vector.load %arg15[%c0_91, %c0_92, %c0_93] : memref<1x1x10xf32, #tpu.memory_space<vmem>>, vector<1x1x10xf32>
    %149 = vector.shape_cast %148 : vector<1x1x10xf32> to vector<1x10xf32>
    %150 = vector.shape_cast %147 : vector<1x10xf32> to vector<1x1x10xf32>
    tpu.vector_store %arg15[%c0_91, %c0_92, %c0_93], %150 {strides = array<i32>} : memref<1x1x10xf32, #tpu.memory_space<vmem>>, vector<1x1x10xf32>,
    return
  }
  func.func @transform_0(%arg0: i32) -> (i32, i32, i32) {
    %c0_i32 = arith.constant 0 : i32
    %c0_i32_0 = arith.constant 0 : i32
    %c0_i32_1 = arith.constant 0 : i32
    return %arg0, %c0_i32, %c0_i32_0 : i32, i32, i32
  }
  func.func @transform_1(%arg0: i32) -> (i32, i32) {
    %c0_i32 = arith.constant 0 : i32
    %c0_i32_0 = arith.constant 0 : i32
    %c0_i32_1 = arith.constant 0 : i32
    return %c0_i32, %c0_i32_0 : i32, i32
  }
  func.func @transform_2(%arg0: i32) -> (i32, i32) {
    %c0_i32 = arith.constant 0 : i32
    %c0_i32_0 = arith.constant 0 : i32
    %c0_i32_1 = arith.constant 0 : i32
    return %c0_i32, %c0_i32_0 : i32, i32
  }
  func.func @transform_3(%arg0: i32) -> (i32, i32) {
    %c0_i32 = arith.constant 0 : i32
    %c0_i32_0 = arith.constant 0 : i32
    %c0_i32_1 = arith.constant 0 : i32
    return %c0_i32, %c0_i32_0 : i32, i32
  }
  func.func @transform_4(%arg0: i32) -> (i32, i32) {
    %c0_i32 = arith.constant 0 : i32
    %c0_i32_0 = arith.constant 0 : i32
    %c0_i32_1 = arith.constant 0 : i32
    return %c0_i32, %c0_i32_0 : i32, i32
  }
  func.func @transform_5(%arg0: i32) -> (i32, i32) {
    %c0_i32 = arith.constant 0 : i32
    %c0_i32_0 = arith.constant 0 : i32
    %c0_i32_1 = arith.constant 0 : i32
    return %c0_i32, %c0_i32_0 : i32, i32
  }
  func.func @transform_6(%arg0: i32) -> (i32, i32) {
    %c0_i32 = arith.constant 0 : i32
    %c0_i32_0 = arith.constant 0 : i32
    %c0_i32_1 = arith.constant 0 : i32
    return %c0_i32, %c0_i32_0 : i32, i32
  }
  func.func @transform_7(%arg0: i32) -> (i32, i32) {
    %c0_i32 = arith.constant 0 : i32
    %c0_i32_0 = arith.constant 0 : i32
    %c0_i32_1 = arith.constant 0 : i32
    return %c0_i32, %c0_i32_0 : i32, i32
  }
  func.func @transform_8(%arg0: i32) -> (i32, i32) {
    %c0_i32 = arith.constant 0 : i32
    %c0_i32_0 = arith.constant 0 : i32
    %c0_i32_1 = arith.constant 0 : i32
    return %c0_i32, %c0_i32_0 : i32, i32
  }
  func.func @transform_9(%arg0: i32) -> (i32, i32) {
    %c0_i32 = arith.constant 0 : i32
    %c0_i32_0 = arith.constant 0 : i32
    %c0_i32_1 = arith.constant 0 : i32
    return %c0_i32, %c0_i32_0 : i32, i32
  }
  func.func @transform_10(%arg0: i32) -> (i32, i32) {
    %c0_i32 = arith.constant 0 : i32
    %c0_i32_0 = arith.constant 0 : i32
    %c0_i32_1 = arith.constant 0 : i32
    return %c0_i32, %c0_i32_0 : i32, i32
  }
  func.func @transform_11(%arg0: i32) -> (i32, i32) {
    %c0_i32 = arith.constant 0 : i32
    %c0_i32_0 = arith.constant 0 : i32
    %c0_i32_1 = arith.constant 0 : i32
    return %c0_i32, %c0_i32_0 : i32, i32
  }
  func.func @transform_12(%arg0: i32) -> (i32, i32) {
    %c0_i32 = arith.constant 0 : i32
    %c0_i32_0 = arith.constant 0 : i32
    %c0_i32_1 = arith.constant 0 : i32
    return %c0_i32, %c0_i32_0 : i32, i32
  }
  func.func @transform_13(%arg0: i32) -> (i32, i32) {
    %c0_i32 = arith.constant 0 : i32
    %c0_i32_0 = arith.constant 0 : i32
    %c0_i32_1 = arith.constant 0 : i32
    return %c0_i32, %c0_i32_0 : i32, i32
  }
  func.func @transform_14(%arg0: i32) -> (i32, i32, i32) {
    %c0_i32 = arith.constant 0 : i32
    %c0_i32_0 = arith.constant 0 : i32
    %c0_i32_1 = arith.constant 0 : i32
    return %arg0, %c0_i32, %c0_i32_0 : i32, i32, i32
  }
}

</mosaic_0001>

<bundles_post_ra>
// kernel: densenet_forward.3
= control target key start
LH: loop header
LB: loop body
LE: loop exit
PB: predicated region body
PF: predicated region fallthrough
CT: control target
= control target key end

     0   :  { %s1427_s18 = smov 0   ;;  %s1676_s0 = inlined_call_operand.vmem [shape: bf16[2,256,256], index: 0, kind: input, shape index: {}]   ;;  %s1677_s1 = inlined_call_operand.vmem [shape: bf16[256,16], index: 1, kind: input, shape index: {}]   ;;  %s1678_s2 = inlined_call_operand.vmem [shape: f32[1,16], index: 2, kind: input, shape index: {}]   ;;  %s1679_s3 = inlined_call_operand.vmem [shape: f32[1,16], index: 3, kind: input, shape index: {}]   ;;  %s1680_s4 = inlined_call_operand.vmem [shape: bf16[64,256], index: 4, kind: input, shape index: {}]   ;;  %s1681_s5 = inlined_call_operand.vmem [shape: bf16[2,64,16], index: 5, kind: output, shape index: {}]  }
   0x1 LB: > { %s1050_s19 = sadd.s32 4294967295, %s1395_s18   ;;  %p1054_p0 = scmp.ge.s32.totalorder %s1395_s18, 1  ;;  %s1395_s18 = sphi %s1427_s18, %s15_s18  }
   0x2   : > { %p187_p1 = scmp.lt.s32.totalorder %s1395_s18, 3 }
   0x4   : > { %p188_p2 = pnand %p1054_p0, %p187_p1 }
   0x5   : > { %v1313_v0 = vld [vmem:[%s1677_s1 + $0x40] sm:$0xff] (!%p188_p2)   ;;  %v1315_v2 = vld [vmem:[%s1677_s1 + $0x48] sm:$0xff] (!%p188_p2)   ;;  %p215_p3 = scmp.lt.s32.totalorder (!%p188_p2), %s1050_s19, 1  ;;  %v1317_v4 = vld [vmem:[%s1677_s1 + $0x50] sm:$0xff] (!%p188_p2)   ;;  %vm986_vm0 = vcmask (!%p188_p2), 125952  }
   0x6   : > { %191 = sbr.rel (%p188_p2) target bundleno = 609 (0x261), region = 40  ;;  %v1314_v1 = vld [vmem:[%s1677_s1] sm:$0xff] (!%p188_p2)   ;;  %1137 = vmatprep.subr.bf16.mxu0 (!%p188_p2), %v1313_v0  ;;  %1289 = vmatprep.subr.bf16.mxu1 (!%p188_p2), %v1313_v0  ;;  %v1316_v3 = vld [vmem:[%s1677_s1 + $0x8] sm:$0xff] (!%p188_p2)   ;;  %v1318_v5 = vld [vmem:[%s1677_s1 + $0x10] sm:$0xff] (!%p188_p2)  }
   0x7   : > { %1138 = vmatpush3.bf16.msra.mxu0 (!%p188_p2), %v1314_v1  ;;  %1297 = vmatpush3.bf16.msra.mxu1 (!%p188_p2), %v1314_v1  ;;  %v1319_v6 = vld [vmem:[%s1677_s1 + $0x58] sm:$0xff] (!%p188_p2)   ;;  %v1321_v8 = vld [vmem:[%s1677_s1 + $0x60] sm:$0xff] (!%p188_p2)   ;;  %v1323_v10 = vld [vmem:[%s1677_s1 + $0x68] sm:$0xff] (!%p188_p2)  }
   0x8   : > { %1139 = vmatprep.subr.bf16.mxu0 (!%p188_p2), %v1315_v2  ;;  %1290 = vmatprep.subr.bf16.mxu1 (!%p188_p2), %v1315_v2  ;;  %v1320_v7 = vld [vmem:[%s1677_s1 + $0x18] sm:$0xff] (!%p188_p2)   ;;  %v1322_v9 = vld [vmem:[%s1677_s1 + $0x20] sm:$0xff] (!%p188_p2)   ;;  %v1324_v12 = vld [vmem:[%s1677_s1 + $0x28] sm:$0xff] (!%p188_p2)  }
   0x9   : > { %v1325_v13 = vld [vmem:[%s1677_s1 + $0x70] sm:$0xff] (!%p188_p2)   ;;  %v1327_v15 = vld [vmem:[%s1677_s1 + $0x78] sm:$0xff] (!%p188_p2)   ;;  %v1379_v48 = vld [vmem:[%s1680_s4 + $0x4] ss:$8 sps:$4 sm:$0xff] (!%p188_p2)  }
   0xa   : > { %v1326_v14 = vld [vmem:[%s1677_s1 + $0x30] sm:$0xff] (!%p188_p2)   ;;  %v1328_v16 = vld [vmem:[%s1677_s1 + $0x38] sm:$0xff] (!%p188_p2)   ;;  %v1529_v51 = vld [vmem:[%s1678_s2] ss:$0 sm:$0xff] (!%p188_p2) }
   0xb   : > { %1140 = vmatpush3.bf16.msra.mxu0 (!%p188_p2), %v1316_v3  ;;  %1298 = vmatpush3.bf16.msra.mxu1 (!%p188_p2), %v1316_v3  ;;  %v1534_v56 = vld [vmem:[%s1679_s3] ss:$0 sm:$0xff] (!%p188_p2) }
   0xc   : > { %1141 = vmatprep.subr.bf16.mxu0 (!%p188_p2), %v1317_v4  ;;  %1291 = vmatprep.subr.bf16.mxu1 (!%p188_p2), %v1317_v4 }
   0xd   : > { %s1683_s19 = smov (!%p215_p3, %s1050_s19), 1 }
   0xe   : > { %s1127_s11 = sshll.u32 %s1683_s19, 8  ;;  %s1128_s30 = sshll.u32 %s1683_s19, 5 }
   0xf   : > { %1142 = vmatpush3.bf16.msra.mxu0 %v1318_v5  ;;  %1299 = vmatpush3.bf16.msra.mxu1 %v1318_v5  ;;  %s1468_s16 = scalar_lea.vmem %s1676_s0, %s1127_s11  ;;  %s1655_s8 = scalar_lea.vmem %s1681_s5, %s1128_s30 }
  0x10   : > { %1143 = vmatprep.subr.bf16.mxu0 %v1319_v6  ;;  %1292 = vmatprep.subr.bf16.mxu1 %v1319_v6  ;;  %v1331_v11 = vld [vmem:[%s1468_s16 + $0x4] ss:$8 sps:$4 sm:$0xff]   ;;  %v1329_v18 = vld [vmem:[%s1468_s16] ss:$8 sps:$4 sm:$0xff]   ;;  %v1332_v19 = vld [vmem:[%s1468_s16 + $0x14] ss:$8 sps:$4 sm:$0xff]  }
  0x11   : > { %578 = vmatprep.mubr.bf16.mxu0 %v1331_v11  ;;  %v1354_v17 = vld [vmem:[%s1468_s16 + $0xa4] ss:$8 sps:$4 sm:$0xff]   ;;  %v1352_v20 = vld [vmem:[%s1468_s16 + $0xa0] ss:$8 sps:$4 sm:$0xff]   ;;  %v1358_v21 = vld [vmem:[%s1468_s16 + $0xb4] ss:$8 sps:$4 sm:$0xff]  }
  0x12   : > { %658 = vmatprep.mubr.bf16.mxu1 %v1354_v17  ;;  %v1334_v22 = vld [vmem:[%s1468_s16 + $0x10] ss:$8 sps:$4 sm:$0xff]   ;;  %v1335_v23 = vld [vmem:[%s1468_s16 + $0x24] ss:$8 sps:$4 sm:$0xff]   ;;  %v1337_v26 = vld [vmem:[%s1468_s16 + $0x20] ss:$8 sps:$4 sm:$0xff]  }
  0x13   : > { %1144 = vmatpush3.bf16.msra.mxu0 %v1320_v7  ;;  %1300 = vmatpush3.bf16.msra.mxu1 %v1320_v7  ;;  %v1361_v24 = vld [vmem:[%s1468_s16 + $0xb0] ss:$8 sps:$4 sm:$0xff]   ;;  %v1364_v25 = vld [vmem:[%s1468_s16 + $0xc4] ss:$8 sps:$4 sm:$0xff]   ;;  %v1338_v27 = vld [vmem:[%s1468_s16 + $0x34] ss:$8 sps:$4 sm:$0xff]  }
  0x14   : > { %1145 = vmatprep.subr.bf16.mxu0 %v1321_v8  ;;  %1293 = vmatprep.subr.bf16.mxu1 %v1321_v8  ;;  %v1367_v28 = vld [vmem:[%s1468_s16 + $0xc0] ss:$8 sps:$4 sm:$0xff]   ;;  %v1368_v29 = vld [vmem:[%s1468_s16 + $0xd4] ss:$8 sps:$4 sm:$0xff]   ;;  %v1340_v30 = vld [vmem:[%s1468_s16 + $0x30] ss:$8 sps:$4 sm:$0xff]  }
  0x15   : > { %v1341_v31 = vld [vmem:[%s1468_s16 + $0x44] ss:$8 sps:$4 sm:$0xff]   ;;  %v1370_v32 = vld [vmem:[%s1468_s16 + $0xd0] ss:$8 sps:$4 sm:$0xff]   ;;  %v1343_v34 = vld [vmem:[%s1468_s16 + $0x40] ss:$8 sps:$4 sm:$0xff]  }
  0x16   : > { %v1371_v33 = vld [vmem:[%s1468_s16 + $0xe4] ss:$8 sps:$4 sm:$0xff]   ;;  %v1344_v35 = vld [vmem:[%s1468_s16 + $0x54] ss:$8 sps:$4 sm:$0xff]   ;;  %v1373_v36 = vld [vmem:[%s1468_s16 + $0xe0] ss:$8 sps:$4 sm:$0xff]  }
  0x17   : > { %1146 = vmatpush3.bf16.msra.mxu0 %v1322_v9  ;;  %1301 = vmatpush3.bf16.msra.mxu1 %v1322_v9  ;;  %v1374_v37 = vld [vmem:[%s1468_s16 + $0xf4] ss:$8 sps:$4 sm:$0xff]   ;;  %v1346_v38 = vld [vmem:[%s1468_s16 + $0x50] ss:$8 sps:$4 sm:$0xff]   ;;  %v1347_v39 = vld [vmem:[%s1468_s16 + $0x64] ss:$8 sps:$4 sm:$0xff]  }
  0x18   : > { %1147 = vmatprep.subr.bf16.mxu0 %v1323_v10  ;;  %1294 = vmatprep.subr.bf16.mxu1 %v1323_v10  ;;  %v1376_v40 = vld [vmem:[%s1468_s16 + $0xf0] ss:$8 sps:$4 sm:$0xff]   ;;  %v1349_v41 = vld [vmem:[%s1468_s16 + $0x60] ss:$8 sps:$4 sm:$0xff]   ;;  %v1350_v42 = vld [vmem:[%s1468_s16 + $0x74] ss:$8 sps:$4 sm:$0xff]  }
  0x19   : > { %v1355_v43 = vld [vmem:[%s1468_s16 + $0x70] ss:$8 sps:$4 sm:$0xff]   ;;  %v1356_v44 = vld [vmem:[%s1468_s16 + $0x84] ss:$8 sps:$4 sm:$0xff]   ;;  %v1360_v45 = vld [vmem:[%s1468_s16 + $0x80] ss:$8 sps:$4 sm:$0xff]  }
  0x1a   : > { %v1362_v46 = vld [vmem:[%s1468_s16 + $0x94] ss:$8 sps:$4 sm:$0xff]   ;;  %v1366_v47 = vld [vmem:[%s1468_s16 + $0x90] ss:$8 sps:$4 sm:$0xff]  }
  0x1b   : > { %1148 = vmatpush3.bf16.msra.mxu0 %v1324_v12  ;;  %1302 = vmatpush3.bf16.msra.mxu1 %v1324_v12 }
  0x1c   : > { %1149 = vmatprep.subr.bf16.mxu0 %v1325_v13  ;;  %1295 = vmatprep.subr.bf16.mxu1 %v1325_v13 }
  0x1f   : > { %1150 = vmatpush3.bf16.msra.mxu0 %v1326_v14  ;;  %1303 = vmatpush3.bf16.msra.mxu1 %v1326_v14 }
  0x20   : > { %1151 = vmatprep.subr.bf16.mxu0 %v1327_v15  ;;  %1296 = vmatprep.subr.bf16.mxu1 %v1327_v15 }
  0x23   : > { %1152 = vmatpush3.bf16.msra.mxu0 %v1328_v16  ;;  %1304 = vmatpush3.bf16.msra.mxu1 %v1328_v16 }
  0x26   : > { %579 = vmatmul.mubr.bf16.vlgmr.msra.gmra.mrb[0].mxu0 %v1329_v18  ;;  %659 = vmatmul.mubr.bf16.vlgmr.msra.gmra.mrb[0].mxu1 %v1352_v20 }
  0x27   : > { %586 = vmatprep.mubr.bf16.mxu0 %v1332_v19  ;;  %666 = vmatprep.mubr.bf16.mxu1 %v1358_v21 }
  0x2e   : > { %587 = vmatmul.mubr.bf16.gmra.mrb[4].mxu0 %v1334_v22  ;;  %667 = vmatmul.mubr.bf16.gmra.mrb[4].mxu1 %v1361_v24 }
  0x2f   : > { %594 = vmatprep.mubr.bf16.mxu0 %v1335_v23  ;;  %674 = vmatprep.mubr.bf16.mxu1 %v1364_v25 }
  0x36   : > { %595 = vmatmul.mubr.bf16.gmra.mrb[8].mxu0 %v1337_v26  ;;  %675 = vmatmul.mubr.bf16.gmra.mrb[8].mxu1 %v1367_v28 }
  0x37   : > { %602 = vmatprep.mubr.bf16.mxu0 %v1338_v27  ;;  %682 = vmatprep.mubr.bf16.mxu1 %v1368_v29 }
  0x3e   : > { %603 = vmatmul.mubr.bf16.gmra.mrb[12].mxu0 %v1340_v30  ;;  %683 = vmatmul.mubr.bf16.gmra.mrb[12].mxu1 %v1370_v32 }
  0x3f   : > { %610 = vmatprep.mubr.bf16.mxu0 %v1341_v31  ;;  %690 = vmatprep.mubr.bf16.mxu1 %v1371_v33 }
  0x46   : > { %611 = vmatmul.mubr.bf16.gmra.mrb[16].mxu0 %v1343_v34  ;;  %691 = vmatmul.mubr.bf16.gmra.mrb[16].mxu1 %v1373_v36 }
  0x47   : > { %618 = vmatprep.mubr.bf16.mxu0 %v1344_v35  ;;  %698 = vmatprep.mubr.bf16.mxu1 %v1374_v37 }
  0x4e   : > { %619 = vmatmul.mubr.bf16.gmra.mrb[20].mxu0 %v1346_v38  ;;  %699 = vmatmul.mubr.bf16.gmra.mrb[20].mxu1 %v1376_v40 }
  0x4f   : > { %626 = vmatprep.mubr.bf16.mxu0 %v1347_v39  ;;  %913 = vmatprep.mubr.bf16.mxu1 %v1379_v48 }
  0x56   : > { %627 = vmatmul.mubr.bf16.gmra.mrb[24].mxu0 %v1349_v41 }
  0x57   : > { %634 = vmatprep.mubr.bf16.mxu0 %v1350_v42 }
  0x5e   : > { %635 = vmatmul.mubr.bf16.gmra.mrb[28].mxu0 %v1355_v43 }
  0x5f   : > { %642 = vmatprep.mubr.bf16.mxu0 %v1356_v44 }
  0x66   : > { %643 = vmatmul.mubr.bf16.gmra.mrb[32].mxu0 %v1360_v45 }
  0x67   : > { %650 = vmatprep.mubr.bf16.mxu0 %v1362_v46 }
  0x6e   : > { %651 = vmatmul.mubr.bf16.gmra.mrb[36].mxu0 %v1366_v47 }
  0xf9   : > { %v1153_v49 = vpop.f32.mrb[0].mxu0  ;;  %v1213_v52 = vpop.f32.mrb[0].mxu1 }
  0xfa   : > { %v1154_v50 = vpop.f32.mrb[1].mxu0  ;;  %v1214_v55 = vpop.f32.mrb[1].mxu1 }
  0xfb   : > { %v1155_v53 = vadd.f32 %v1154_v50, %v1153_v49  ;;  %v1156_v54 = vpop.f32.mrb[2].mxu0  ;;  %v1215_v58 = vadd.f32 %v1214_v55, %v1213_v52  ;;  %v1216_v59 = vpop.f32.mrb[2].mxu1 }
  0xfc   : > { %v1157_v57 = vpop.f32.mrb[3].mxu0  ;;  %v1217_v62 = vpop.f32.mrb[3].mxu1 }
  0xfd   : > { %v714_v60 = vmul.f32 %v1155_v53, %v1529_v51  ;;  %v1158_v61 = vadd.f32 %v1157_v57, %v1156_v54  ;;  %v734_v63 = vmul.f32 %v1215_v58, %v1529_v51  ;;  %v1218_v0 = vadd.f32 %v1217_v62, %v1216_v59 }
  0xff   : > { %v753_v1 = vadd.f32 %v1534_v56, %v714_v60  ;;  %v715_v2 = vmul.f32 %v1158_v61, %v1529_v51  ;;  %v773_v3 = vadd.f32 %v1534_v56, %v734_v63  ;;  %v735_v4 = vmul.f32 %v1218_v0, %v1529_v51 }
 0x101   : > { %v754_v5 = vadd.f32 %v1534_v56, %v715_v2  ;;  %v1159_v6 = vpop.f32.mrb[4].mxu0  ;;  %v805_v8 = vmax.f32 %v773_v3, 0.0  ;;  %v774_v9 = vadd.f32 %v1534_v56, %v735_v4  ;;  %v1219_v10 = vpop.f32.mrb[4].mxu1  ;;  %v785_v11 = vmax.f32 %v753_v1, 0.0 }
 0x102   : > { %v1160_v7 = vpop.f32.mrb[5].mxu0  ;;  %v1220_v15 = vpop.f32.mrb[5].mxu1 }
 0x103   : > { %v786_v12 = vmax.f32 %v754_v5, 0.0  ;;  %v1161_v13 = vadd.f32 %v1160_v7, %v1159_v6  ;;  %v1162_v14 = vpop.f32.mrb[6].mxu0  ;;  %v806_v17 = vmax.f32 %v774_v9, 0.0  ;;  %v1221_v18 = vadd.f32 %v1220_v15, %v1219_v10  ;;  %v1222_v19 = vpop.f32.mrb[6].mxu1 }
 0x104   : > { %v1163_v16 = vpop.f32.mrb[7].mxu0  ;;  %v1223_v23 = vpop.f32.mrb[7].mxu1 }
 0x105   : > { %v1544_v20 = vpack.c.bf16 %v786_v12, %v785_v11  ;;  %v716_v21 = vmul.f32 %v1161_v13, %v1529_v51  ;;  %v1164_v22 = vadd.f32 %v1163_v16, %v1162_v14  ;;  %v736_v24 = vmul.f32 %v1221_v18, %v1529_v51 }
 0x106   : > { %v1224_v25 = vadd.f32 %v1223_v23, %v1222_v19  ;;  %v1548_v26 = vpack.c.bf16 %v806_v17, %v805_v8 }
 0x107   : > { %v755_v27 = vadd.f32 %v1534_v56, %v716_v21  ;;  %v717_v28 = vmul.f32 %v1164_v22, %v1529_v51  ;;  %v775_v29 = vadd.f32 %v1534_v56, %v736_v24 }
 0x108   : > { %v737_v30 = vmul.f32 %v1224_v25, %v1529_v51 }
 0x109   : > { %v756_v31 = vadd.f32 %v1534_v56, %v717_v28  ;;  %v1165_v32 = vpop.f32.mrb[8].mxu0  ;;  %v807_v34 = vmax.f32 %v775_v29, 0.0  ;;  %v1225_v36 = vpop.f32.mrb[8].mxu1  ;;  %v787_v37 = vmax.f32 %v755_v27, 0.0 }
 0x10a   : > { %v1166_v33 = vpop.f32.mrb[9].mxu0  ;;  %v776_v35 = vadd.f32 %v1534_v56, %v737_v30  ;;  %v1226_v41 = vpop.f32.mrb[9].mxu1 }
 0x10b   : > { %v788_v38 = vmax.f32 %v756_v31, 0.0  ;;  %v1167_v39 = vadd.f32 %v1166_v33, %v1165_v32  ;;  %v1168_v40 = vpop.f32.mrb[10].mxu0  ;;  %v1227_v44 = vadd.f32 %v1226_v41, %v1225_v36  ;;  %v1228_v45 = vpop.f32.mrb[10].mxu1 }
 0x10c   : > { %v1169_v42 = vpop.f32.mrb[11].mxu0  ;;  %v808_v43 = vmax.f32 %v776_v35, 0.0  ;;  %v1229_v49 = vpop.f32.mrb[11].mxu1 }
 0x10d   : > { %v1556_v46 = vpack.c.bf16 %v788_v38, %v787_v37  ;;  %v718_v47 = vmul.f32 %v1167_v39, %v1529_v51  ;;  %v1170_v48 = vadd.f32 %v1169_v42, %v1168_v40  ;;  %v738_v50 = vmul.f32 %v1227_v44, %v1529_v51 }
 0x10e   : > { %v1230_v52 = vadd.f32 %v1229_v49, %v1228_v45  ;;  %v1560_v53 = vpack.c.bf16 %v808_v43, %v807_v34 }
 0x10f   : > { %v757_v54 = vadd.f32 %v1534_v56, %v718_v47  ;;  %v719_v55 = vmul.f32 %v1170_v48, %v1529_v51  ;;  %v777_v57 = vadd.f32 %v1534_v56, %v738_v50 }
 0x110   : > { %v739_v58 = vmul.f32 %v1230_v52, %v1529_v51 }
 0x111   : > { %v758_v59 = vadd.f32 %v1534_v56, %v719_v55  ;;  %v1171_v60 = vpop.f32.mrb[12].mxu0  ;;  %v809_v62 = vmax.f32 %v777_v57, 0.0  ;;  %v1231_v0 = vpop.f32.mrb[12].mxu1  ;;  %v789_v1 = vmax.f32 %v757_v54, 0.0 }
 0x112   : > { %v1172_v61 = vpop.f32.mrb[13].mxu0  ;;  %v778_v63 = vadd.f32 %v1534_v56, %v739_v58  ;;  %v1232_v5 = vpop.f32.mrb[13].mxu1 }
 0x113   : > { %v790_v2 = vmax.f32 %v758_v59, 0.0  ;;  %v1173_v3 = vadd.f32 %v1172_v61, %v1171_v60  ;;  %v1174_v4 = vpop.f32.mrb[14].mxu0  ;;  %v1233_v8 = vadd.f32 %v1232_v5, %v1231_v0  ;;  %v1234_v9 = vpop.f32.mrb[14].mxu1 }
 0x114   : > { %v1175_v6 = vpop.f32.mrb[15].mxu0  ;;  %v810_v7 = vmax.f32 %v778_v63, 0.0  ;;  %v1235_v13 = vpop.f32.mrb[15].mxu1 }
 0x115   : > { %v1568_v10 = vpack.c.bf16 %v790_v2, %v789_v1  ;;  %v720_v11 = vmul.f32 %v1173_v3, %v1529_v51  ;;  %v1176_v12 = vadd.f32 %v1175_v6, %v1174_v4  ;;  %v740_v14 = vmul.f32 %v1233_v8, %v1529_v51 }
 0x116   : > { %v1236_v15 = vadd.f32 %v1235_v13, %v1234_v9  ;;  %v1572_v16 = vpack.c.bf16 %v810_v7, %v809_v62 }
 0x117   : > { %v759_v17 = vadd.f32 %v1534_v56, %v720_v11  ;;  %v721_v18 = vmul.f32 %v1176_v12, %v1529_v51  ;;  %v779_v19 = vadd.f32 %v1534_v56, %v740_v14 }
 0x118   : > { %v741_v21 = vmul.f32 %v1236_v15, %v1529_v51 }
 0x119   : > { %v760_v22 = vadd.f32 %v1534_v56, %v721_v18  ;;  %v1177_v23 = vpop.f32.mrb[16].mxu0  ;;  %v811_v25 = vmax.f32 %v779_v19, 0.0  ;;  %v1237_v28 = vpop.f32.mrb[16].mxu1  ;;  %v791_v29 = vmax.f32 %v759_v17, 0.0 }
 0x11a   : > { %v1178_v24 = vpop.f32.mrb[17].mxu0  ;;  %v780_v27 = vadd.f32 %v1534_v56, %v741_v21  ;;  %v1238_v33 = vpop.f32.mrb[17].mxu1 }
 0x11b   : > { %v792_v30 = vmax.f32 %v760_v22, 0.0  ;;  %v1179_v31 = vadd.f32 %v1178_v24, %v1177_v23  ;;  %v1180_v32 = vpop.f32.mrb[18].mxu0  ;;  %v1239_v36 = vadd.f32 %v1238_v33, %v1237_v28  ;;  %v1240_v37 = vpop.f32.mrb[18].mxu1 }
 0x11c   : > { %v1181_v34 = vpop.f32.mrb[19].mxu0  ;;  %v812_v35 = vmax.f32 %v780_v27, 0.0  ;;  %v1241_v41 = vpop.f32.mrb[19].mxu1 }
 0x11d   : > { %v1580_v38 = vpack.c.bf16 %v792_v30, %v791_v29  ;;  %v722_v39 = vmul.f32 %v1179_v31, %v1529_v51  ;;  %v1182_v40 = vadd.f32 %v1181_v34, %v1180_v32  ;;  %v742_v42 = vmul.f32 %v1239_v36, %v1529_v51 }
 0x11e   : > { %v1242_v43 = vadd.f32 %v1241_v41, %v1240_v37  ;;  %v1584_v44 = vpack.c.bf16 %v812_v35, %v811_v25 }
 0x11f   : > { %v761_v45 = vadd.f32 %v1534_v56, %v722_v39  ;;  %v723_v47 = vmul.f32 %v1182_v40, %v1529_v51  ;;  %v781_v48 = vadd.f32 %v1534_v56, %v742_v42 }
 0x120   : > { %v743_v49 = vmul.f32 %v1242_v43, %v1529_v51 }
 0x121   : > { %v762_v50 = vadd.f32 %v1534_v56, %v723_v47  ;;  %v1183_v52 = vpop.f32.mrb[20].mxu0  ;;  %v813_v55 = vmax.f32 %v781_v48, 0.0  ;;  %v1243_v58 = vpop.f32.mrb[20].mxu1  ;;  %v793_v59 = vmax.f32 %v761_v45, 0.0 }
 0x122   : > { %v1184_v54 = vpop.f32.mrb[21].mxu0  ;;  %v782_v57 = vadd.f32 %v1534_v56, %v743_v49  ;;  %v1244_v63 = vpop.f32.mrb[21].mxu1 }
 0x123   : > { %v794_v60 = vmax.f32 %v762_v50, 0.0  ;;  %v1185_v61 = vadd.f32 %v1184_v54, %v1183_v52  ;;  %v1186_v62 = vpop.f32.mrb[22].mxu0  ;;  %v1245_v2 = vadd.f32 %v1244_v63, %v1243_v58  ;;  %v1246_v3 = vpop.f32.mrb[22].mxu1 }
 0x124   : > { %v1187_v0 = vpop.f32.mrb[23].mxu0  ;;  %v814_v1 = vmax.f32 %v782_v57, 0.0  ;;  %v1247_v7 = vpop.f32.mrb[23].mxu1 }
 0x125   : > { %v1592_v4 = vpack.c.bf16 %v794_v60, %v793_v59  ;;  %v724_v5 = vmul.f32 %v1185_v61, %v1529_v51  ;;  %v1188_v6 = vadd.f32 %v1187_v0, %v1186_v62  ;;  %v744_v8 = vmul.f32 %v1245_v2, %v1529_v51 }
 0x126   : > { %v1248_v9 = vadd.f32 %v1247_v7, %v1246_v3  ;;  %v1596_v11 = vpack.c.bf16 %v814_v1, %v813_v55 }
 0x127   : > { %v763_v12 = vadd.f32 %v1534_v56, %v724_v5  ;;  %v725_v13 = vmul.f32 %v1188_v6, %v1529_v51  ;;  %v783_v14 = vadd.f32 %v1534_v56, %v744_v8 }
 0x128   : > { %v745_v15 = vmul.f32 %v1248_v9, %v1529_v51 }
 0x129   : > { %v764_v17 = vadd.f32 %v1534_v56, %v725_v13  ;;  %v1189_v18 = vpop.f32.mrb[24].mxu0  ;;  %v815_v21 = vmax.f32 %v783_v14, 0.0  ;;  %v795_v23 = vmax.f32 %v763_v12, 0.0 }
 0x12a   : > { %v1190_v19 = vpop.f32.mrb[25].mxu0  ;;  %v784_v22 = vadd.f32 %v1534_v56, %v745_v15 }
 0x12b   : > { %v796_v24 = vmax.f32 %v764_v17, 0.0  ;;  %v1191_v25 = vadd.f32 %v1190_v19, %v1189_v18  ;;  %v1192_v27 = vpop.f32.mrb[26].mxu0 }
 0x12c   : > { %v1193_v28 = vpop.f32.mrb[27].mxu0  ;;  %v816_v29 = vmax.f32 %v784_v22, 0.0 }
 0x12d   : > { %v822_v30 = vpack.c.bf16 %v796_v24, %v795_v23  ;;  %v726_v31 = vmul.f32 %v1191_v25, %v1529_v51  ;;  %v1194_v32 = vadd.f32 %v1193_v28, %v1192_v27 }
 0x12e   : > { %v832_v33 = vpack.c.bf16 %v816_v29, %v815_v21 }
 0x12f   : > { %v765_v34 = vadd.f32 %v1534_v56, %v726_v31  ;;  %v727_v35 = vmul.f32 %v1194_v32, %v1529_v51 }
 0x131   : > { %v766_v36 = vadd.f32 %v1534_v56, %v727_v35  ;;  %v1195_v37 = vpop.f32.mrb[28].mxu0  ;;  %v797_v40 = vmax.f32 %v765_v34, 0.0 }
 0x132   : > { %v1196_v39 = vpop.f32.mrb[29].mxu0 }
 0x133   : > { %v798_v41 = vmax.f32 %v766_v36, 0.0  ;;  %v1197_v42 = vadd.f32 %v1196_v39, %v1195_v37  ;;  %v1198_v43 = vpop.f32.mrb[30].mxu0 }
 0x134   : > { %v1199_v45 = vpop.f32.mrb[31].mxu0 }
 0x135   : > { %v823_v47 = vpack.c.bf16 %v798_v41, %v797_v40  ;;  %v728_v48 = vmul.f32 %v1197_v42, %v1529_v51  ;;  %v1200_v49 = vadd.f32 %v1199_v45, %v1198_v43 }
 0x137   : > { %v767_v50 = vadd.f32 %v1534_v56, %v728_v48  ;;  %v729_v52 = vmul.f32 %v1200_v49, %v1529_v51 }
 0x139   : > { %v768_v54 = vadd.f32 %v1534_v56, %v729_v52  ;;  %v1201_v55 = vpop.f32.mrb[32].mxu0  ;;  %v799_v58 = vmax.f32 %v767_v50, 0.0 }
 0x13a   : > { %v1202_v57 = vpop.f32.mrb[33].mxu0 }
 0x13b   : > { %v800_v59 = vmax.f32 %v768_v54, 0.0  ;;  %v1203_v60 = vadd.f32 %v1202_v57, %v1201_v55  ;;  %v1204_v61 = vpop.f32.mrb[34].mxu0 }
 0x13c   : > { %v1205_v62 = vpop.f32.mrb[35].mxu0 }
 0x13d   : > { %v824_v63 = vpack.c.bf16 %v800_v59, %v799_v58  ;;  %v730_v0 = vmul.f32 %v1203_v60, %v1529_v51  ;;  %v1206_v1 = vadd.f32 %v1205_v62, %v1204_v61 }
 0x13f   : > { %v769_v2 = vadd.f32 %v1534_v56, %v730_v0  ;;  %v731_v3 = vmul.f32 %v1206_v1, %v1529_v51 }
 0x141   : > { %v770_v5 = vadd.f32 %v1534_v56, %v731_v3  ;;  %v1207_v6 = vpop.f32.mrb[36].mxu0  ;;  %v801_v8 = vmax.f32 %v769_v2, 0.0 }
 0x142   : > { %v1208_v7 = vpop.f32.mrb[37].mxu0 }
 0x143   : > { %v802_v9 = vmax.f32 %v770_v5, 0.0  ;;  %v1209_v12 = vadd.f32 %v1208_v7, %v1207_v6  ;;  %v1210_v13 = vpop.f32.mrb[38].mxu0 }
 0x144   : > { %v1211_v14 = vpop.f32.mrb[39].mxu0 }
 0x145   : > { %v732_v15 = vmul.f32 %v1209_v12, %v1529_v51  ;;  %v1212_v17 = vadd.f32 %v1211_v14, %v1210_v13  ;;  %v825_v18 = vpack.c.bf16 %v802_v9, %v801_v8 }
 0x147   : > { %v771_v19 = vadd.f32 %v1534_v56, %v732_v15  ;;  %v733_v21 = vmul.f32 %v1212_v17, %v1529_v51  ;;  %1249 = vmatprep.subr.bf16.mxu1 %v825_v18  ;;  %v1377_v51 = vld [vmem:[%s1680_s4] ss:$8 sps:$4 sm:$0xff]  }
 0x148   : > { %1250 = vmatpush3.bf16.msra.mxu1 %v1544_v20  ;;  %v1382_v20 = vld [vmem:[%s1680_s4 + $0x10] ss:$8 sps:$4 sm:$0xff]  }
 0x149   : > { %v772_v22 = vadd.f32 %v1534_v56, %v733_v21  ;;  %v803_v23 = vmax.f32 %v771_v19, 0.0  ;;  %v1380_v56 = vld [vmem:[%s1680_s4 + $0x14] ss:$8 sps:$4 sm:$0xff]  }
 0x14b   : > { %v804_v24 = vmax.f32 %v772_v22, 0.0 }
 0x14d   : > { %v826_v25 = vpack.c.bf16 %v804_v24, %v803_v23 }
 0x14f   : > { %1251 = vmatprep.subr.bf16.mxu1 %v826_v25 }
 0x150   : > { %1252 = vmatpush3.bf16.msra.mxu1 %v1556_v46  ;;  %v1385_v46 = vld [vmem:[%s1680_s4 + $0x20] ss:$8 sps:$4 sm:$0xff]  }
 0x151   : > { %1253 = vmatprep.subr.bf16.mxu1 %v1548_v26  ;;  %v1383_v26 = vld [vmem:[%s1680_s4 + $0x24] ss:$8 sps:$4 sm:$0xff]  }
 0x154   : > { %1254 = vmatpush3.bf16.msra.mxu1 %v1568_v10  ;;  %v1388_v10 = vld [vmem:[%s1680_s4 + $0x30] ss:$8 sps:$4 sm:$0xff]  }
 0x155   : > { %1255 = vmatprep.subr.bf16.mxu1 %v1560_v53  ;;  %v1386_v53 = vld [vmem:[%s1680_s4 + $0x34] ss:$8 sps:$4 sm:$0xff]  }
 0x158   : > { %1256 = vmatpush3.bf16.msra.mxu1 %v1580_v38 }
 0x159   : > { %1257 = vmatprep.subr.bf16.mxu1 %v1572_v16 }
 0x15c   : > { %1258 = vmatpush3.bf16.msra.mxu1 %v1592_v4 }
 0x15d   : > { %1259 = vmatprep.subr.bf16.mxu1 %v1584_v44 }
 0x160   : > { %1260 = vmatpush3.bf16.msra.mxu1 %v822_v30 }
 0x161   : > { %1261 = vmatprep.subr.bf16.mxu1 %v1596_v11 }
 0x164   : > { %1262 = vmatpush3.bf16.msra.mxu1 %v823_v47 }
 0x165   : > { %1263 = vmatprep.subr.bf16.mxu1 %v832_v33 }
 0x168   : > { %1264 = vmatpush3.bf16.msra.mxu1 %v824_v63 }
 0x16b   : > { %914 = vmatmul.mubr.bf16.vlgmr.msra.gmra.mrb[24].mxu1 %v1377_v51 }
 0x16c   : > { %921 = vmatprep.mubr.bf16.mxu1 %v1380_v56 }
 0x173   : > { %922 = vmatmul.mubr.bf16.gmra.mrb[28].mxu1 %v1382_v20 }
 0x174   : > { %929 = vmatprep.mubr.bf16.mxu1 %v1383_v26 }
 0x17b   : > { %930 = vmatmul.mubr.bf16.gmra.mrb[32].mxu1 %v1385_v46 }
 0x17c   : > { %937 = vmatprep.mubr.bf16.mxu1 %v1386_v53 }
 0x183   : > { %938 = vmatmul.mubr.bf16.gmra.mrb[36].mxu1 %v1388_v10 }
 0x23e   : > { %v1265_v16 = vpop.f32.mrb[24].mxu1 }
 0x23f   : > { %v1266_v38 = vpop.f32.mrb[25].mxu1 }
 0x240   : > { %v1267_v44 = vadd.f32 %v1266_v38, %v1265_v16  ;;  %v1268_v4 = vpop.f32.mrb[26].mxu1 }
 0x241   : > { %v1269_v11 = vpop.f32.mrb[27].mxu1 }
 0x242   : > { %v946_v27 = vmul.f32 0.11111111, %v1267_v44  ;;  %v1270_v28 = vadd.f32 %v1269_v11, %v1268_v4 }
 0x244   : > { %v1129_v29 = vpack.c.bf16 %v946_v27, %v946_v27  ;;  %v947_v30 = vmul.f32 0.11111111, %v1270_v28 }
 0x246   : > { %987 = vst.msk [vmem:[%s1655_s8] sm:$0xf] %vm986_vm0, %v1129_v29  ;;  %v1130_v31 = vpack.c.bf16 %v947_v30, %v947_v30  ;;  %v1271_v32 = vpop.f32.mrb[28].mxu1 }
 0x247   : > { %v1272_v33 = vpop.f32.mrb[29].mxu1 }
 0x248   : > { %988 = vst.msk [vmem:[%s1655_s8 + $0x4] sm:$0xf] %vm986_vm0, %v1130_v31  ;;  %v1273_v34 = vadd.f32 %v1272_v33, %v1271_v32  ;;  %v1274_v35 = vpop.f32.mrb[30].mxu1 }
 0x249   : > { %v1275_v36 = vpop.f32.mrb[31].mxu1 }
 0x24a   : > { %v948_v37 = vmul.f32 0.11111111, %v1273_v34  ;;  %v1276_v39 = vadd.f32 %v1275_v36, %v1274_v35 }
 0x24c   : > { %v1131_v40 = vpack.c.bf16 %v948_v37, %v948_v37  ;;  %v949_v41 = vmul.f32 0.11111111, %v1276_v39 }
 0x24e   : > { %989 = vst.msk [vmem:[%s1655_s8 + $0x8] sm:$0xf] %vm986_vm0, %v1131_v40  ;;  %v1132_v42 = vpack.c.bf16 %v949_v41, %v949_v41  ;;  %v1277_v43 = vpop.f32.mrb[32].mxu1 }
 0x24f   : > { %v1278_v45 = vpop.f32.mrb[33].mxu1 }
 0x250   : > { %990 = vst.msk [vmem:[%s1655_s8 + $0xc] sm:$0xf] %vm986_vm0, %v1132_v42  ;;  %v1279_v47 = vadd.f32 %v1278_v45, %v1277_v43  ;;  %v1280_v48 = vpop.f32.mrb[34].mxu1 }
 0x251   : > { %v1281_v49 = vpop.f32.mrb[35].mxu1 }
 0x252   : > { %v950_v50 = vmul.f32 0.11111111, %v1279_v47  ;;  %v1282_v52 = vadd.f32 %v1281_v49, %v1280_v48 }
 0x254   : > { %v1133_v54 = vpack.c.bf16 %v950_v50, %v950_v50  ;;  %v951_v55 = vmul.f32 0.11111111, %v1282_v52 }
 0x256   : > { %991 = vst.msk [vmem:[%s1655_s8 + $0x10] sm:$0xf] %vm986_vm0, %v1133_v54  ;;  %v1134_v57 = vpack.c.bf16 %v951_v55, %v951_v55  ;;  %v1283_v58 = vpop.f32.mrb[36].mxu1 }
 0x257   : > { %v1284_v59 = vpop.f32.mrb[37].mxu1 }
 0x258   : > { %992 = vst.msk [vmem:[%s1655_s8 + $0x14] sm:$0xf] %vm986_vm0, %v1134_v57  ;;  %v1285_v60 = vadd.f32 %v1284_v59, %v1283_v58  ;;  %v1286_v61 = vpop.f32.mrb[38].mxu1 }
 0x259   : > { %v1287_v62 = vpop.f32.mrb[39].mxu1 }
 0x25a   : > { %v952_v63 = vmul.f32 0.11111111, %v1285_v60  ;;  %v1288_v0 = vadd.f32 %v1287_v62, %v1286_v61 }
 0x25c   : > { %v1135_v1 = vpack.c.bf16 %v952_v63, %v952_v63  ;;  %v953_v2 = vmul.f32 0.11111111, %v1288_v0 }
 0x25e   : > { %993 = vst.msk [vmem:[%s1655_s8 + $0x18] sm:$0xf] %vm986_vm0, %v1135_v1  ;;  %v1136_v3 = vpack.c.bf16 %v953_v2, %v953_v2 }
 0x260   : > { %994 = vst.msk [vmem:[%s1655_s8 + $0x1c] sm:$0xf] %vm986_vm0, %v1136_v3 }
 0x261 PF: > { %s15_s18 = sadd.s32 1, %s1395_s18  }
 0x262   : > { %p12_p4 = scmp.ge.s32.totalorder %s15_s18, 4  }
 0x264   :  { %14 = sbr.rel (!%p12_p4) target bundleno = 1 (0x1), region = 70 }

// kernel: densenet_forward.5
= control target key start
LH: loop header
LB: loop body
LE: loop exit
PB: predicated region body
PF: predicated region fallthrough
CT: control target
= control target key end

     0   :  { %s3470_s0 = inlined_call_operand.vmem [shape: bf16[2,16,16], index: 0, kind: input, shape index: {}]   ;;  %s3471_s1 = inlined_call_operand.vmem [shape: bf16[32,32], index: 1, kind: input, shape index: {}]   ;;  %s3472_s2 = inlined_call_operand.vmem [shape: bf16[64,16], index: 2, kind: input, shape index: {}]   ;;  %s3473_s3 = inlined_call_operand.vmem [shape: f32[2,32], index: 3, kind: input, shape index: {}]   ;;  %s3474_s4 = inlined_call_operand.vmem [shape: f32[2,32], index: 4, kind: input, shape index: {}]   ;;  %s3475_s5 = inlined_call_operand.vmem [shape: f32[2,16], index: 5, kind: input, shape index: {}]   ;;  %s3476_s6 = inlined_call_operand.vmem [shape: f32[2,16], index: 6, kind: input, shape index: {}]   ;;  %s3477_s7 = inlined_call_operand.vmem [shape: bf16[288,8], index: 7, kind: input, shape index: {}]   ;;  %s3478_s8 = inlined_call_operand.vmem [shape: bf16[144,16], index: 8, kind: input, shape index: {}]   ;;  %s3479_s9 = inlined_call_operand.vmem [shape: f32[1,32], index: 9, kind: input, shape index: {}]   ;;  %s3480_s10 = inlined_call_operand.vmem [shape: f32[1,32], index: 10, kind: input, shape index: {}]   ;;  %s3481_s11 = inlined_call_operand.vmem [shape: bf16[1,16], index: 11, kind: input, shape index: {}]   ;;  %s3482_s12 = inlined_call_operand.vmem [shape: f32[32,10], index: 12, kind: input, shape index: {}]   ;;  %s3483_s13 = inlined_call_operand.vmem [shape: f32[1,10], index: 13, kind: input, shape index: {}]   ;;  %s3484_s14 = inlined_call_operand.hbm [shape: f32[2,1,10], index: 14, kind: output, shape index: {}]  }
   0x1   :  { %3485 = sst [smem:[#allocation6_spill]] %s3470_s0 }
   0x2   :  { %3486 = sst [smem:[#allocation7_spill]] %s3471_s1 }
   0x3   :  { %3487 = sst [smem:[#allocation8_spill]] %s3472_s2 }
   0x4   :  { %19 = vsyncpa [#allocation3], 0 }
   0x5   :  { %21 = vsyncpa [#allocation3 + $0x1], 0  ;;  %s3009_s29 = smov 0   ;;  %s3011_s30 = smov 0  }
   0x6   :  { %s3013_s15 = smov 0   ;;  %s3015_s16 = smov 0  }
   0x7 LB: > { %s3030_s17 = sadd.s32 4294967295, %s2928_s16   ;;  %s2315_s18 = sadd.s32 4294967294, %s2928_s16   ;;  %s2928_s16 = sphi %s3015_s16, %s3498_s16   ;;  %s2924_s15 = sphi %s3013_s15, %s3497_s15   ;;  %s2920_s30 = sphi %s3011_s30, %s3496_s30   ;;  %s2916_s29 = sphi %s3009_s29, %s3495_s29  }
   0x8   : > { %s3034_s19 = sadd.s32 1, %s2928_s16   ;;  %s333_s20 = sadd.s32 1, %s2924_s15 }
   0x9   : > { %s330_s21 = ssub.s32 %s2928_s16, %s3034_s19  ;;  %p343_p0 = scmp.ne.s32.totalorder %s2924_s15, %s2920_s30 }
   0xa   : > { %p331_p1 = scmp.eq.s32.totalorder %s330_s21, 0  ;;  %p344_p2 = scmp.eq.s32.totalorder %s3030_s17, 1 }
   0xb   : > { %p349_p3 = scmp.ne.s32.totalorder %s2920_s30, %s2916_s29  ;;  %p350_p4 = scmp.eq.s32.totalorder %s2315_s18, 1 }
   0xc   : > { %s3045_s22 = scalar_select %p331_p1, %s2924_s15, %s333_s20  }
   0xd   : > { %p3047_p5 = por %p344_p2, %p343_p0  ;;  %p3051_p6 = por %p350_p4, %p349_p3 }
   0xe   : > { %3488 = sst [smem:[#allocation5_spill]] %s3045_s22  ;;  %p2318_p7 = scmp.ge.s32.totalorder %s2928_s16, 1 }
   0xf   : > { %p415_p8 = scmp.lt.s32.totalorder %s2928_s16, 3 }
  0x11   : > { %p416_p9 = pnand %p2318_p7, %p415_p8 }
  0x12   : > { %s3491_s1 = sld [smem:[#allocation7_spill]] (!%p416_p9)  ;;  %v2930_v1 = vmov (!%p416_p9), 0.0   ;;  %p460_p10 = scmp.lt.s32.totalorder (!%p416_p9), %s3030_s17, 1  ;;  %vm2931_vm0 = vmmov (!%p416_p9), 0   ;;  %vm481_vm1 = vcmask (!%p416_p9), 130048   ;;  %vm577_vm2 = vcmask (!%p416_p9), 261120  }
  0x13   : > { %419 = sbr.rel (%p416_p9) target bundleno = 2668 (0xa6c), region = 76  ;;  %2486 = vmatprep.subr.bf16.mxu0 (!%p416_p9), %v2930_v1  ;;  %2492 = vmatprep.subr.bf16.mxu1 (!%p416_p9), %v2930_v1  ;;  %s3492_s0 = sld [smem:[#allocation6_spill]] (!%p416_p9)  ;;  %v2324_v5 = vld [vmem:[%s3473_s3] ss:$0 sm:$0xff] (!%p416_p9)  ;;  %v3117_v32 = vld [vmem:[%s3478_s8 + $0x8] sm:$0xff] (!%p416_p9)   ;;  %v3126_v33 = vld [vmem:[%s3478_s8 + $0x10] sm:$0xff] (!%p416_p9)  }
  0x14   : > { %2488 = vmatprep.mubr.msk.bf16.mxu0 (!%p416_p9), %vm2931_vm0, %v2930_v1  ;;  %2496 = vmatprep.mubr.msk.bf16.mxu1 (!%p416_p9), %vm2931_vm0, %v2930_v1  ;;  %s3493_s2 = sld [smem:[#allocation8_spill]] (!%p416_p9)  ;;  %v2325_v7 = vld [vmem:[%s3474_s4] ss:$0 sm:$0xff] (!%p416_p9)  ;;  %v3135_v34 = vld [vmem:[%s3478_s8 + $0x18] sm:$0xff] (!%p416_p9)   ;;  %v3153_v36 = vld [vmem:[%s3478_s8 + $0x28] sm:$0xff] (!%p416_p9)   ;;  %vm1313_vm3 = vcmask (!%p416_p9), 1043456  }
  0x15   : > { %v2329_v18 = vld [vmem:[%s3475_s5] ss:$0 sm:$0xff] (!%p416_p9)  ;;  %v3162_v37 = vld [vmem:[%s3478_s8 + $0x30] sm:$0xff] (!%p416_p9)   ;;  %v3171_v38 = vld [vmem:[%s3478_s8 + $0x38] sm:$0xff] (!%p416_p9)   ;;  %vm1309_vm4 = vcmask (!%p416_p9), 64512   ;;  %s458_s22 = sand.u32 (!%p416_p9), 1, %s2920_s30  }
  0x16   : > { %v2330_v20 = vld [vmem:[%s3476_s6] ss:$0 sm:$0xff] (!%p416_p9)  ;;  %v2846_v40 = vld [vmem:[%s3477_s7 + $0x8] sm:$0xff] (!%p416_p9)   ;;  %v2848_v59 = vld [vmem:[%s3477_s7 + $0x10] sm:$0xff] (!%p416_p9)   ;;  %vm2245_vm5 = vcmask (!%p416_p9), 73728   ;;  %s2248_s25 = scalar_lea.sflag (!%p416_p9), [#allocation3], %s458_s22 }
  0x17   : > { %v3107_v31 = vld [vmem:[%s3478_s8] sm:$0xff] (!%p416_p9)  }
  0x18   : > { %v2833_v0 = vld [vmem:[%s3491_s1] sm:$0xff] (!%p416_p9)   ;;  %v1308_v41 = vld [vmem:[%s3491_s1 + $0x8] sm:$0xf] (!%p416_p9) }
  0x19   : > { %2487 = vmatpush3.bf16.msra.mxu0 (!%p416_p9), %v2833_v0  ;;  %v3144_v35 = vld [vmem:[%s3478_s8 + $0x20] sm:$0xff] (!%p416_p9)   ;;  %v1315_v42 = vsel (!%p416_p9), %vm1313_vm3, %v1308_v41, 0  ;;  %v2852_v41 = vld [vmem:[%s3477_s7 + $0x30] sm:$0xff] (!%p416_p9)  }
  0x1a   : > { %s461_s27 = scalar_select %p460_p10, %s3030_s17, 1  ;;  %2500 = vmatprep.subr.bf16.mxu0 %v2930_v1  ;;  %v2835_v3 = vld [vmem:[%s3493_s2] sm:$0xff]   ;;  %v2836_v4 = vld [vmem:[%s3493_s2 + $0x8] sm:$0xff]  }
  0x1b   : > { %2493 = vmatpush3.bf16.msra.mxu1 %v2835_v3  ;;  %v3180_v39 = vld [vmem:[%s3478_s8 + $0x40] sm:$0xff]  }
  0x1c   : > { %s2410_s28 = sshll.u32 %s461_s27, 3  ;;  %2494 = vmatprep.subr.bf16.mxu1 %v2930_v1  ;;  %v2847_v51 = vld [vmem:[%s3477_s7] sm:$0xff]   ;;  %s2407_s27 = sshll.u32 %s3030_s17, 4 }
  0x1d   : > { %s464_s21 = scalar_lea.vmem %s3492_s0, %s2410_s28  ;;  %s459_s28 = scalar_lea.vmem [#allocation2], %s458_s22 }
  0x1e   : > { %v2834_v2 = vld [vmem:[%s464_s21] sm:$0xff]   ;;  %s2260_s18 = sshll.u32 %s459_s28, 4  ;;  %s3428_s0 = scalar_lea.hbm %s3484_s14, %s2407_s27  ;;  %s3430_s18 = int_to_ptr.vmem [resolvable:$true] %s2260_s18 }
  0x1f   : > { %2489 = vmatmul.mubr.msk.bf16.vlgmr.msra.gmra.mrb[0].mxu0 %vm481_vm1, %v2834_v2  ;;  %2495 = vmatpush3.bf16.msra.mxu1 %v2836_v4  ;;  %v2849_v4 = vld [vmem:[%s3477_s7 + $0x18] sm:$0xff]   ;;  %s2866_s26 = scalar_lea.vmem %s3430_s18, 16  ;;  %s2933_s17 = smov [#allocation2]  }
  0x20   : > { %2502 = vmatprep.mubr.msk.bf16.mxu0 %vm2931_vm0, %v2930_v1  ;;  %2538 = vmatprep.subr.bf16.mxu1 %v2930_v1  ;;  %p2867_p11 = scmp.ne.s32.totalorder %s3430_s18, %s2866_s26 }
  0x22   : > { %p2868_p12 = pnand %p2867_p11, %p3047_p5 }
  0x24   : > { %p2869_p13 = pneg %p2868_p12 }
  0xf2   : > { %v3086_v6 = vpop.f32.mrb[0].mxu0 }
  0xf3   : > { %v549_v8 = vmul.f32 %v2324_v5, %v3086_v6  ;;  %v2490_v9 = vpop.f32.mrb[1].mxu0 }
  0xf4   : > { %v3092_v10 = vpop.f32.mrb[2].mxu0 }
  0xf5   : > { %v556_v11 = vadd.f32 %v2325_v7, %v549_v8  ;;  %v550_v12 = vmul.f32 %v2324_v5, %v3092_v10  ;;  %v2491_v13 = vpop.f32.mrb[3].mxu0 }
  0xf7   : > { %v557_v14 = vadd.f32 %v2325_v7, %v550_v12  ;;  %v558_v15 = vmax.f32 %v556_v11, 0.0 }
  0xf9   : > { %v559_v16 = vmax.f32 %v557_v14, 0.0 }
  0xfb   : > { %v560_v17 = vpack.c.bf16 %v559_v16, %v558_v15  ;;  %v2850_v15 = vld [vmem:[%s3477_s7 + $0x20] sm:$0xff]  }
  0xfd   : > { %2497 = vmatmul.mubr.msk.bf16.vlgmr.msra.gmra.mrb[0].mxu1 %vm577_vm2, %v560_v17 }
  0xfe   : > { %2540 = vmatprep.mubr.msk.bf16.mxu1 %vm2931_vm0, %v2930_v1  ;;  %2539 = vmatpush3.bf16.msra.mxu1 %v2846_v40 }
  0xff   : > { %2544 = vmatprep.subr.bf16.mxu1 %v2930_v1 }
 0x1d0   : > { %v615_v19 = vpop.f32.mrb[0].mxu1 }
 0x1d1   : > { %v627_v21 = vmul.f32 %v2329_v18, %v615_v19  ;;  %v2498_v22 = vpop.f32.mrb[1].mxu1 }
 0x1d2   : > { %v618_v23 = vpop.f32.mrb[2].mxu1 }
 0x1d3   : > { %v634_v24 = vadd.f32 %v2330_v20, %v627_v21  ;;  %v628_v25 = vmul.f32 %v2329_v18, %v618_v23  ;;  %v2499_v26 = vpop.f32.mrb[3].mxu1  ;;  %v2851_v23 = vld [vmem:[%s3477_s7 + $0x28] sm:$0xff]  }
 0x1d5   : > { %v635_v27 = vadd.f32 %v2330_v20, %v628_v25  ;;  %v636_v28 = vmax.f32 %v634_v24, 0.0 }
 0x1d7   : > { %v637_v29 = vmax.f32 %v635_v27, 0.0 }
 0x1d9   : > { %v638_v30 = vpack.c.bf16 %v637_v29, %v636_v28 }
 0x1db   : > { %2501 = vmatpush3.bf16.msra.mxu0 %v638_v30 }
 0x1dc   : > { %2592 = vmatprep.subr.bf16.mxu0 %v2930_v1 }
 0x1de   : > { %2503 = vmatmul.mubr.msk.bf16.vlgmr.msra.gmra.mrb[4].mxu0 %vm481_vm1, %v3107_v31 }
 0x1df   : > { %2506 = vmatprep.mubr.msk.bf16.mxu0 %vm2931_vm0, %v2930_v1  ;;  %2593 = vmatpush3.bf16.msra.mxu0 %v1315_v42  ;;  %v2853_v42 = vld [vmem:[%s3477_s7 + $0x38] sm:$0xff]  }
 0x1e0   : > { %2606 = vmatprep.subr.bf16.mxu0 %v2930_v1 }
 0x1e6   : > { %2507 = vmatmul.mubr.msk.bf16.gmra.mrb[8].mxu0 %vm481_vm1, %v3117_v32 }
 0x1e7   : > { %2510 = vmatprep.mubr.msk.bf16.mxu0 %vm2931_vm0, %v2930_v1 }
 0x1ee   : > { %2511 = vmatmul.mubr.msk.bf16.gmra.mrb[12].mxu0 %vm481_vm1, %v3126_v33 }
 0x1ef   : > { %2514 = vmatprep.mubr.msk.bf16.mxu0 %vm2931_vm0, %v2930_v1 }
 0x1f6   : > { %2515 = vmatmul.mubr.msk.bf16.gmra.mrb[16].mxu0 %vm481_vm1, %v3135_v34 }
 0x1f7   : > { %2518 = vmatprep.mubr.msk.bf16.mxu0 %vm2931_vm0, %v2930_v1 }
 0x1fe   : > { %2519 = vmatmul.mubr.msk.bf16.gmra.mrb[20].mxu0 %vm481_vm1, %v3144_v35 }
 0x1ff   : > { %2522 = vmatprep.mubr.msk.bf16.mxu0 %vm2931_vm0, %v2930_v1 }
 0x206   : > { %2523 = vmatmul.mubr.msk.bf16.gmra.mrb[24].mxu0 %vm481_vm1, %v3153_v36 }
 0x207   : > { %2526 = vmatprep.mubr.msk.bf16.mxu0 %vm2931_vm0, %v2930_v1 }
 0x20e   : > { %2527 = vmatmul.mubr.msk.bf16.gmra.mrb[28].mxu0 %vm481_vm1, %v3162_v37 }
 0x20f   : > { %2530 = vmatprep.mubr.msk.bf16.mxu0 %vm2931_vm0, %v2930_v1 }
 0x216   : > { %2531 = vmatmul.mubr.msk.bf16.gmra.mrb[32].mxu0 %vm481_vm1, %v3171_v38 }
 0x217   : > { %2534 = vmatprep.mubr.msk.bf16.mxu0 %vm2931_vm0, %v2930_v1 }
 0x21e   : > { %2535 = vmatmul.mubr.msk.bf16.gmra.mrb[36].mxu0 %vm481_vm1, %v3180_v39 }
 0x21f   : > { %2594 = vmatprep.mubr.msk.bf16.mxu0 %vm2931_vm0, %v2930_v1 }
 0x2b1   : > { %v745_v43 = vpop.f32.mrb[4].mxu0 }
 0x2b2   : > { %v2504_v44 = vpop.f32.mrb[5].mxu0 }
 0x2b3   : > { %v748_v45 = vpop.f32.mrb[6].mxu0 }
 0x2b4   : > { %v816_v46 = vpack.c.bf16 %v748_v45, %v745_v43  ;;  %v2505_v47 = vpop.f32.mrb[7].mxu0  ;;  %v2854_v43 = vld [vmem:[%s3477_s7 + $0x40] sm:$0xff]  }
 0x2b9   : > { %v753_v48 = vpop.f32.mrb[8].mxu0 }
 0x2ba   : > { %v2508_v49 = vpop.f32.mrb[9].mxu0 }
 0x2bb   : > { %v756_v50 = vpop.f32.mrb[10].mxu0  ;;  %v2855_v49 = vld [vmem:[%s3493_s2 + $0x10] sm:$0xff]  }
 0x2bc   : > { %v817_v52 = vpack.c.bf16 %v756_v50, %v753_v48  ;;  %v2509_v53 = vpop.f32.mrb[11].mxu0  ;;  %v2856_v50 = vld [vmem:[%s3493_s2 + $0x18] sm:$0xff]  }
 0x2be   : > { %2541 = vmatmul.mubr.msk.bf16.vlgmr.msra.gmra.mrb[4].mxu1 %vm481_vm1, %v817_v52  ;;  %v2368_v52 = vld [vmem:[%s3473_s3 + $0x1] ss:$0 sm:$0xff] }
 0x2bf   : > { %2545 = vmatpush3.bf16.msra.mxu1 %v2847_v51  ;;  %2546 = vmatprep.mubr.msk.bf16.mxu1 %vm2931_vm0, %v2930_v1 }
 0x2c0   : > { %2550 = vmatprep.subr.bf16.mxu1 %v2930_v1 }
 0x2c1   : > { %v761_v54 = vpop.f32.mrb[12].mxu0 }
 0x2c2   : > { %v2512_v55 = vpop.f32.mrb[13].mxu0 }
 0x2c3   : > { %v764_v56 = vpop.f32.mrb[14].mxu0  ;;  %v2369_v55 = vld [vmem:[%s3474_s4 + $0x1] ss:$0 sm:$0xff] }
 0x2c4   : > { %v818_v57 = vpack.c.bf16 %v764_v56, %v761_v54  ;;  %v2513_v58 = vpop.f32.mrb[15].mxu0 }
 0x2c9   : > { %v769_v60 = vpop.f32.mrb[16].mxu0 }
 0x2ca   : > { %2547 = vmatmul.mubr.msk.bf16.vlgmr.msra.gmra.mrb[4].mxu1 %vm481_vm1, %v816_v46  ;;  %v2516_v61 = vpop.f32.mrb[17].mxu0 }
 0x2cb   : > { %2551 = vmatpush3.bf16.msra.mxu1 %v2848_v59  ;;  %2552 = vmatprep.mubr.msk.bf16.mxu1 %vm2931_vm0, %v2930_v1  ;;  %v772_v62 = vpop.f32.mrb[18].mxu0 }
 0x2cc   : > { %2556 = vmatprep.subr.bf16.mxu1 %v2930_v1  ;;  %v819_v63 = vpack.c.bf16 %v772_v62, %v769_v60  ;;  %v2517_v0 = vpop.f32.mrb[19].mxu0 }
 0x2d1   : > { %v777_v2 = vpop.f32.mrb[20].mxu0 }
 0x2d2   : > { %v2520_v3 = vpop.f32.mrb[21].mxu0 }
 0x2d3   : > { %v780_v5 = vpop.f32.mrb[22].mxu0 }
 0x2d4   : > { %v820_v7 = vpack.c.bf16 %v780_v5, %v777_v2  ;;  %v2521_v8 = vpop.f32.mrb[23].mxu0  ;;  %v2373_v2 = vld [vmem:[%s3475_s5 + $0x1] ss:$0 sm:$0xff] }
 0x2d6   : > { %2553 = vmatmul.mubr.msk.bf16.vlgmr.msra.gmra.mrb[4].mxu1 %vm481_vm1, %v818_v57 }
 0x2d7   : > { %2557 = vmatpush3.bf16.msra.mxu1 %v2849_v4  ;;  %2558 = vmatprep.mubr.msk.bf16.mxu1 %vm2931_vm0, %v2930_v1 }
 0x2d8   : > { %2562 = vmatprep.subr.bf16.mxu1 %v2930_v1 }
 0x2d9   : > { %v785_v9 = vpop.f32.mrb[24].mxu0 }
 0x2da   : > { %v2524_v11 = vpop.f32.mrb[25].mxu0 }
 0x2db   : > { %v788_v12 = vpop.f32.mrb[26].mxu0 }
 0x2dc   : > { %v821_v13 = vpack.c.bf16 %v788_v12, %v785_v9  ;;  %v2525_v14 = vpop.f32.mrb[27].mxu0 }
 0x2e1   : > { %v793_v16 = vpop.f32.mrb[28].mxu0 }
 0x2e2   : > { %2559 = vmatmul.mubr.msk.bf16.vlgmr.msra.gmra.mrb[4].mxu1 %vm481_vm1, %v819_v63  ;;  %v2528_v17 = vpop.f32.mrb[29].mxu0 }
 0x2e3   : > { %2563 = vmatpush3.bf16.msra.mxu1 %v2850_v15  ;;  %2564 = vmatprep.mubr.msk.bf16.mxu1 %vm2931_vm0, %v2930_v1  ;;  %v796_v18 = vpop.f32.mrb[30].mxu0 }
 0x2e4   : > { %2568 = vmatprep.subr.bf16.mxu1 %v2930_v1  ;;  %v822_v19 = vpack.c.bf16 %v796_v18, %v793_v16  ;;  %v2529_v20 = vpop.f32.mrb[31].mxu0  ;;  %v2858_v18 = vld [vmem:[%s3477_s7 + $0x48] sm:$0xff]  }
 0x2e9   : > { %v801_v21 = vpop.f32.mrb[32].mxu0 }
 0x2ea   : > { %v2532_v22 = vpop.f32.mrb[33].mxu0 }
 0x2eb   : > { %v804_v24 = vpop.f32.mrb[34].mxu0 }
 0x2ec   : > { %v823_v25 = vpack.c.bf16 %v804_v24, %v801_v21  ;;  %v2533_v26 = vpop.f32.mrb[35].mxu0 }
 0x2ed   : > { %v2859_v26 = vld [vmem:[%s3477_s7 + $0x58] sm:$0xff]  }
 0x2ee   : > { %2565 = vmatmul.mubr.msk.bf16.vlgmr.msra.gmra.mrb[4].mxu1 %vm481_vm1, %v820_v7 }
 0x2ef   : > { %2569 = vmatpush3.bf16.msra.mxu1 %v2851_v23  ;;  %2570 = vmatprep.mubr.msk.bf16.mxu1 %vm2931_vm0, %v2930_v1 }
 0x2f0   : > { %2574 = vmatprep.subr.bf16.mxu1 %v2930_v1 }
 0x2f1   : > { %v809_v27 = vpop.f32.mrb[36].mxu0 }
 0x2f2   : > { %v2536_v28 = vpop.f32.mrb[37].mxu0 }
 0x2f3   : > { %v812_v29 = vpop.f32.mrb[38].mxu0 }
 0x2f4   : > { %v824_v30 = vpack.c.bf16 %v812_v29, %v809_v27  ;;  %v2537_v40 = vpop.f32.mrb[39].mxu0 }
 0x2fa   : > { %2571 = vmatmul.mubr.msk.bf16.vlgmr.msra.gmra.mrb[4].mxu1 %vm481_vm1, %v821_v13 }
 0x2fb   : > { %2575 = vmatpush3.bf16.msra.mxu1 %v2852_v41  ;;  %2576 = vmatprep.mubr.msk.bf16.mxu1 %vm2931_vm0, %v2930_v1 }
 0x2fc   : > { %2580 = vmatprep.subr.bf16.mxu1 %v2930_v1 }
 0x306   : > { %2577 = vmatmul.mubr.msk.bf16.vlgmr.msra.gmra.mrb[4].mxu1 %vm481_vm1, %v822_v19 }
 0x307   : > { %2581 = vmatpush3.bf16.msra.mxu1 %v2853_v42  ;;  %2582 = vmatprep.mubr.msk.bf16.mxu1 %vm2931_vm0, %v2930_v1 }
 0x308   : > { %2586 = vmatprep.subr.bf16.mxu1 %v2930_v1 }
 0x312   : > { %2583 = vmatmul.mubr.msk.bf16.vlgmr.msra.gmra.mrb[4].mxu1 %vm481_vm1, %v823_v25 }
 0x313   : > { %2587 = vmatpush3.bf16.msra.mxu1 %v2854_v43  ;;  %2588 = vmatprep.mubr.msk.bf16.mxu1 %vm2931_vm0, %v2930_v1  ;;  %v2860_v43 = vld [vmem:[%s3477_s7 + $0x60] sm:$0xff]  }
 0x314   : > { %2598 = vmatprep.subr.bf16.mxu1 %v2930_v1 }
 0x31e   : > { %2589 = vmatmul.mubr.msk.bf16.vlgmr.msra.gmra.mrb[4].mxu1 %vm481_vm1, %v824_v30 }
 0x31f   : > { %2602 = vmatprep.mubr.msk.bf16.mxu1 %vm2931_vm0, %v2930_v1  ;;  %2599 = vmatpush3.bf16.msra.mxu1 %v2855_v49 }
 0x320   : > { %2600 = vmatprep.subr.bf16.mxu1 %v2930_v1 }
 0x323   : > { %2601 = vmatpush3.bf16.msra.mxu1 %v2856_v50 }
 0x324   : > { %2644 = vmatprep.subr.bf16.mxu1 %v2930_v1 }
 0x3f1   : > { %v1298_v44 = vpop.f32.mrb[4].mxu1 }
 0x3f2   : > { %v2590_v45 = vpop.f32.mrb[5].mxu1 }
 0x3f3   : > { %v1301_v46 = vpop.f32.mrb[6].mxu1 }
 0x3f4   : > { %v1307_v47 = vpack.c.bf16 %v1301_v46, %v1298_v44  ;;  %v2591_v48 = vpop.f32.mrb[7].mxu1 }
 0x3f6   : > { %2595 = vmatmul.mubr.msk.bf16.vlgmr.msra.gmra.mrb[40].mxu0 %vm1309_vm4, %v1307_v47 }
 0x3f7   : > { %2608 = vmatprep.mubr.msk.bf16.mxu0 %vm2931_vm0, %v2930_v1 }
 0x4c9   : > { %v1351_v51 = vpop.f32.mrb[40].mxu0 }
 0x4ca   : > { %v3269_v53 = vadd.f32 %v1351_v51, %v3086_v6  ;;  %v2596_v54 = vpop.f32.mrb[41].mxu0 }
 0x4cb   : > { %v1354_v56 = vpop.f32.mrb[42].mxu0 }
 0x4cc   : > { %v1365_v57 = vmul.f32 %v2368_v52, %v3269_v53  ;;  %v3276_v58 = vadd.f32 %v1354_v56, %v3092_v10  ;;  %v2597_v59 = vpop.f32.mrb[43].mxu0  ;;  %v2374_v10 = vld [vmem:[%s3476_s6 + $0x1] ss:$0 sm:$0xff] }
 0x4ce   : > { %v1372_v60 = vadd.f32 %v2369_v55, %v1365_v57  ;;  %v1366_v61 = vmul.f32 %v2368_v52, %v3276_v58  ;;  %v2861_v52 = vld [vmem:[%s3477_s7 + $0x68] sm:$0xff]  }
 0x4d0   : > { %v1373_v62 = vadd.f32 %v2369_v55, %v1366_v61  ;;  %v1374_v63 = vmax.f32 %v1372_v60, 0.0 }
 0x4d2   : > { %v1375_v0 = vmax.f32 %v1373_v62, 0.0  ;;  %v2862_v62 = vld [vmem:[%s3477_s7 + $0x70] sm:$0xff]  }
 0x4d4   : > { %v1376_v6 = vpack.c.bf16 %v1375_v0, %v1374_v63 }
 0x4d6   : > { %2603 = vmatmul.mubr.msk.bf16.vlgmr.msra.gmra.mrb[8].mxu1 %vm577_vm2, %v1376_v6 }
 0x4d7   : > { %2646 = vmatprep.mubr.msk.bf16.mxu1 %vm2931_vm0, %v2930_v1 }
 0x5a9   : > { %v1430_v3 = vpop.f32.mrb[8].mxu1 }
 0x5aa   : > { %v1442_v4 = vmul.f32 %v2373_v2, %v1430_v3  ;;  %v2604_v5 = vpop.f32.mrb[9].mxu1 }
 0x5ab   : > { %v1433_v7 = vpop.f32.mrb[10].mxu1 }
 0x5ac   : > { %v1449_v8 = vadd.f32 %v2374_v10, %v1442_v4  ;;  %v1443_v9 = vmul.f32 %v2373_v2, %v1433_v7  ;;  %v2605_v11 = vpop.f32.mrb[11].mxu1  ;;  %v2863_v7 = vld [vmem:[%s3477_s7 + $0x78] sm:$0xff]  }
 0x5ae   : > { %v1450_v12 = vadd.f32 %v2374_v10, %v1443_v9  ;;  %v1451_v13 = vmax.f32 %v1449_v8, 0.0  ;;  %v2864_v8 = vld [vmem:[%s3477_s7 + $0x80] sm:$0xff]   ;;  %v2865_v9 = vld [vmem:[%s3477_s7 + $0x88] sm:$0xff]  }
 0x5b0   : > { %v1452_v14 = vmax.f32 %v1450_v12, 0.0 }
 0x5b2   : > { %v1453_v15 = vpack.c.bf16 %v1452_v14, %v1451_v13 }
 0x5b4   : > { %2607 = vmatpush3.bf16.msra.mxu0 %v1453_v15 }
 0x5b5   : > { %2698 = vmatprep.subr.bf16.mxu0 %v2930_v1 }
 0x5b7   : > { %2609 = vmatmul.mubr.msk.bf16.vlgmr.msra.gmra.mrb[44].mxu0 %vm481_vm1, %v3107_v31  ;;  %v2857_v31 = vld [vmem:[%s3477_s7 + $0x50] sm:$0xff]  }
 0x5b8   : > { %2612 = vmatprep.mubr.msk.bf16.mxu0 %vm2931_vm0, %v2930_v1  ;;  %2645 = vmatpush3.bf16.msra.mxu1 %v2857_v31  ;;  %v2167_v31 = vld [vmem:[%s3482_s12] sm:$0xff] }
 0x5b9   : > { %2650 = vmatprep.subr.bf16.mxu1 %v2930_v1 }
 0x5bf   : > { %2613 = vmatmul.mubr.msk.bf16.gmra.mrb[48].mxu0 %vm481_vm1, %v3117_v32  ;;  %v2051_v32 = vld [vmem:[%s3491_s1 + $0xc] sm:$0xf]  ;;  %s2870_s1 = sshll.u32 %s2933_s17, 4  ;;  %s2871_s1 = int_to_ptr.vmem [resolvable:$false] %s2870_s1 }
 0x5c0   : > { %2616 = vmatprep.mubr.msk.bf16.mxu0 %vm2931_vm0, %v2930_v1  ;;  %s2872_s2 = scalar_lea.vmem %s2871_s1, 32  ;;  %p2873_p0 = scmp.lt.s32.totalorder %s3430_s18, %s2871_s1 }
 0x5c1   : > { %p2874_p1 = scmp.lt.s32.totalorder %s2872_s2, %s2866_s26 }
 0x5c3   : > { %p2875_p2 = por %p2874_p1, %p2873_p0 }
 0x5c5   : > { %p2876_p3 = pnand %p2875_p2, %p2869_p13 }
 0x5c7   : > { %2617 = vmatmul.mubr.msk.bf16.gmra.mrb[52].mxu0 %vm481_vm1, %v3126_v33  ;;  %v2056_v33 = vsel %vm1313_vm3, %v2051_v32, 0  ;;  %v2168_v32 = vld [vmem:[%s3482_s12 + $0x8] sm:$0xff] }
 0x5c8   : > { %2620 = vmatprep.mubr.msk.bf16.mxu0 %vm2931_vm0, %v2930_v1  ;;  %2699 = vmatpush3.bf16.msra.mxu0 %v2056_v33  ;;  %v2932_v33 = vmov 0.0|0.0  }
 0x5c9   : > { %2721 = vmatprep.subr.bf16.mxu0 %v2932_v33 }
 0x5cf   : > { %2621 = vmatmul.mubr.msk.bf16.gmra.mrb[56].mxu0 %vm481_vm1, %v3135_v34 }
 0x5d0   : > { %2624 = vmatprep.mubr.msk.bf16.mxu0 %vm2931_vm0, %v2930_v1 }
 0x5d7   : > { %2625 = vmatmul.mubr.msk.bf16.gmra.mrb[60].mxu0 %vm481_vm1, %v3144_v35 }
 0x5d8   : > { %2628 = vmatprep.mubr.msk.bf16.mxu0 %vm2931_vm0, %v2930_v1 }
 0x5df   : > { %2629 = vmatmul.mubr.msk.bf16.gmra.mrb[64].mxu0 %vm481_vm1, %v3153_v36 }
 0x5e0   : > { %2632 = vmatprep.mubr.msk.bf16.mxu0 %vm2931_vm0, %v2930_v1 }
 0x5e7   : > { %2633 = vmatmul.mubr.msk.bf16.gmra.mrb[68].mxu0 %vm481_vm1, %v3162_v37 }
 0x5e8   : > { %2636 = vmatprep.mubr.msk.bf16.mxu0 %vm2931_vm0, %v2930_v1 }
 0x5ef   : > { %2637 = vmatmul.mubr.msk.bf16.gmra.mrb[72].mxu0 %vm481_vm1, %v3171_v38 }
 0x5f0   : > { %2640 = vmatprep.mubr.msk.bf16.mxu0 %vm2931_vm0, %v2930_v1 }
 0x5f7   : > { %2641 = vmatmul.mubr.msk.bf16.gmra.mrb[76].mxu0 %vm481_vm1, %v3180_v39 }
 0x5f8   : > { %2700 = vmatprep.mubr.msk.bf16.mxu0 %vm2931_vm0, %v2930_v1 }
 0x68a   : > { %v1488_v34 = vpop.f32.mrb[44].mxu0 }
 0x68b   : > { %v2610_v35 = vpop.f32.mrb[45].mxu0 }
 0x68c   : > { %v1491_v36 = vpop.f32.mrb[46].mxu0 }
 0x68d   : > { %v1559_v37 = vpack.c.bf16 %v1491_v36, %v1488_v34  ;;  %v2611_v38 = vpop.f32.mrb[47].mxu0  ;;  %v2722_v34 = vpack.c.bf16 %v2168_v32, %v2167_v31  ;;  %v2403_v36 = vld [vmem:[%s3479_s9] ss:$0 sm:$0xff] }
 0x68e   : > { %v2404_v38 = vld [vmem:[%s3480_s10] ss:$0 sm:$0xff] }
 0x692   : > { %v1496_v39 = vpop.f32.mrb[48].mxu0 }
 0x693   : > { %v2614_v16 = vpop.f32.mrb[49].mxu0 }
 0x694   : > { %v1499_v17 = vpop.f32.mrb[50].mxu0 }
 0x695   : > { %v1560_v19 = vpack.c.bf16 %v1499_v17, %v1496_v39  ;;  %v2615_v20 = vpop.f32.mrb[51].mxu0 }
 0x697   : > { %2647 = vmatmul.mubr.msk.bf16.vlgmr.msra.gmra.mrb[12].mxu1 %vm481_vm1, %v1560_v19 }
 0x698   : > { %2651 = vmatpush3.bf16.msra.mxu1 %v2858_v18  ;;  %2652 = vmatprep.mubr.msk.bf16.mxu1 %vm2931_vm0, %v2930_v1 }
 0x699   : > { %2656 = vmatprep.subr.bf16.mxu1 %v2930_v1 }
 0x69a   : > { %v1504_v21 = vpop.f32.mrb[52].mxu0 }
 0x69b   : > { %v2618_v22 = vpop.f32.mrb[53].mxu0 }
 0x69c   : > { %v1507_v23 = vpop.f32.mrb[54].mxu0 }
 0x69d   : > { %v1561_v24 = vpack.c.bf16 %v1507_v23, %v1504_v21  ;;  %v2619_v25 = vpop.f32.mrb[55].mxu0 }
 0x69e   : > { %v2170_v25 = vld [vmem:[%s3482_s12 + $0x18] sm:$0xff] }
 0x6a2   : > { %v1512_v27 = vpop.f32.mrb[56].mxu0 }
 0x6a3   : > { %2653 = vmatmul.mubr.msk.bf16.vlgmr.msra.gmra.mrb[12].mxu1 %vm481_vm1, %v1559_v37  ;;  %v2622_v28 = vpop.f32.mrb[57].mxu0 }
 0x6a4   : > { %2657 = vmatpush3.bf16.msra.mxu1 %v2859_v26  ;;  %2658 = vmatprep.mubr.msk.bf16.mxu1 %vm2931_vm0, %v2930_v1  ;;  %v1515_v29 = vpop.f32.mrb[58].mxu0 }
 0x6a5   : > { %2662 = vmatprep.subr.bf16.mxu1 %v2930_v1  ;;  %v1562_v30 = vpack.c.bf16 %v1515_v29, %v1512_v27  ;;  %v2623_v40 = vpop.f32.mrb[59].mxu0 }
 0x6aa   : > { %v1520_v41 = vpop.f32.mrb[60].mxu0 }
 0x6ab   : > { %v2626_v42 = vpop.f32.mrb[61].mxu0 }
 0x6ac   : > { %v1523_v44 = vpop.f32.mrb[62].mxu0 }
 0x6ad   : > { %v1563_v45 = vpack.c.bf16 %v1523_v44, %v1520_v41  ;;  %v2627_v46 = vpop.f32.mrb[63].mxu0  ;;  %v2171_v41 = vld [vmem:[%s3483_s13] sm:$0x1] }
 0x6af   : > { %2659 = vmatmul.mubr.msk.bf16.vlgmr.msra.gmra.mrb[12].mxu1 %vm481_vm1, %v1561_v24 }
 0x6b0   : > { %2663 = vmatpush3.bf16.msra.mxu1 %v2860_v43  ;;  %2664 = vmatprep.mubr.msk.bf16.mxu1 %vm2931_vm0, %v2930_v1 }
 0x6b1   : > { %2668 = vmatprep.subr.bf16.mxu1 %v2930_v1 }
 0x6b2   : > { %v1528_v47 = vpop.f32.mrb[64].mxu0 }
 0x6b3   : > { %v2630_v48 = vpop.f32.mrb[65].mxu0 }
 0x6b4   : > { %v1531_v49 = vpop.f32.mrb[66].mxu0 }
 0x6b5   : > { %v1564_v50 = vpack.c.bf16 %v1531_v49, %v1528_v47  ;;  %v2631_v51 = vpop.f32.mrb[67].mxu0 }
 0x6ba   : > { %v1536_v54 = vpop.f32.mrb[68].mxu0 }
 0x6bb   : > { %2665 = vmatmul.mubr.msk.bf16.vlgmr.msra.gmra.mrb[12].mxu1 %vm481_vm1, %v1562_v30  ;;  %v2634_v55 = vpop.f32.mrb[69].mxu0 }
 0x6bc   : > { %2669 = vmatpush3.bf16.msra.mxu1 %v2861_v52  ;;  %2670 = vmatprep.mubr.msk.bf16.mxu1 %vm2931_vm0, %v2930_v1  ;;  %v1539_v56 = vpop.f32.mrb[70].mxu0 }
 0x6bd   : > { %2674 = vmatprep.subr.bf16.mxu1 %v2930_v1  ;;  %v1565_v57 = vpack.c.bf16 %v1539_v56, %v1536_v54  ;;  %v2635_v59 = vpop.f32.mrb[71].mxu0 }
 0x6c2   : > { %v1544_v60 = vpop.f32.mrb[72].mxu0 }
 0x6c3   : > { %v2638_v61 = vpop.f32.mrb[73].mxu0 }
 0x6c4   : > { %v1547_v63 = vpop.f32.mrb[74].mxu0 }
 0x6c5   : > { %v1566_v0 = vpack.c.bf16 %v1547_v63, %v1544_v60  ;;  %v2639_v6 = vpop.f32.mrb[75].mxu0 }
 0x6c7   : > { %2671 = vmatmul.mubr.msk.bf16.vlgmr.msra.gmra.mrb[12].mxu1 %vm481_vm1, %v1563_v45 }
 0x6c8   : > { %2675 = vmatpush3.bf16.msra.mxu1 %v2862_v62  ;;  %2676 = vmatprep.mubr.msk.bf16.mxu1 %vm2931_vm0, %v2930_v1 }
 0x6c9   : > { %2680 = vmatprep.subr.bf16.mxu1 %v2930_v1 }
 0x6ca   : > { %v1552_v2 = vpop.f32.mrb[76].mxu0 }
 0x6cb   : > { %v2642_v3 = vpop.f32.mrb[77].mxu0 }
 0x6cc   : > { %v1555_v10 = vpop.f32.mrb[78].mxu0 }
 0x6cd   : > { %v1567_v4 = vpack.c.bf16 %v1555_v10, %v1552_v2  ;;  %v2643_v5 = vpop.f32.mrb[79].mxu0 }
 0x6d3   : > { %2677 = vmatmul.mubr.msk.bf16.vlgmr.msra.gmra.mrb[12].mxu1 %vm481_vm1, %v1564_v50 }
 0x6d4   : > { %2681 = vmatpush3.bf16.msra.mxu1 %v2863_v7  ;;  %2682 = vmatprep.mubr.msk.bf16.mxu1 %vm2931_vm0, %v2930_v1 }
 0x6d5   : > { %2686 = vmatprep.subr.bf16.mxu1 %v2930_v1 }
 0x6df   : > { %2683 = vmatmul.mubr.msk.bf16.vlgmr.msra.gmra.mrb[12].mxu1 %vm481_vm1, %v1565_v57 }
 0x6e0   : > { %2687 = vmatpush3.bf16.msra.mxu1 %v2864_v8  ;;  %2688 = vmatprep.mubr.msk.bf16.mxu1 %vm2931_vm0, %v2930_v1 }
 0x6e1   : > { %2692 = vmatprep.subr.bf16.mxu1 %v2930_v1 }
 0x6eb   : > { %2689 = vmatmul.mubr.msk.bf16.vlgmr.msra.gmra.mrb[12].mxu1 %vm481_vm1, %v1566_v0 }
 0x6ec   : > { %2693 = vmatpush3.bf16.msra.mxu1 %v2865_v9  ;;  %2694 = vmatprep.mubr.msk.bf16.mxu1 %vm2931_vm0, %v2930_v1 }
 0x6ed   : > { %2704 = vmatprep.subr.bf16.mxu1 %v2930_v1 }
 0x6f7   : > { %2695 = vmatmul.mubr.msk.bf16.vlgmr.msra.gmra.mrb[12].mxu1 %vm481_vm1, %v1567_v4 }
 0x6f8   : > { %2706 = vmatprep.mubr.msk.bf16.mxu1 %vm2931_vm0, %v2930_v1 }
 0x7ca   : > { %v2041_v11 = vpop.f32.mrb[12].mxu1 }
 0x7cb   : > { %v2696_v12 = vpop.f32.mrb[13].mxu1 }
 0x7cc   : > { %v2044_v13 = vpop.f32.mrb[14].mxu1 }
 0x7cd   : > { %v2050_v14 = vpack.c.bf16 %v2044_v13, %v2041_v11  ;;  %v2697_v15 = vpop.f32.mrb[15].mxu1 }
 0x7cf   : > { %2701 = vmatmul.mubr.msk.bf16.vlgmr.msra.gmra.mrb[80].mxu0 %vm1309_vm4, %v2050_v14 }
 0x7d0   : > { %2718 = vmatprep.mubr.msk.f32.mxu0 %vm2931_vm0, %v2930_v1  ;;  %2723 = vmatpush3.bf16.msra.mxu0 %v2722_v34 }
 0x7d1   : > { %2724 = vmatprep.subr.bf16.mxu0 %v2932_v33 }
 0x8a2   : > { %v2092_v35 = vpop.f32.mrb[80].mxu0 }
 0x8a3   : > { %v2099_v1 = vadd.f32 %v2092_v35, %v3269_v53  ;;  %v2702_v37 = vpop.f32.mrb[81].mxu0  ;;  %v2121_v53 = vld [vmem:[%s3481_s11] sm:$0x1] }
 0x8a4   : > { %v2095_v39 = vpop.f32.mrb[82].mxu0 }
 0x8a5   : > { %v2108_v16 = vmul.f32 %v2403_v36, %v2099_v1  ;;  %v2100_v17 = vadd.f32 %v2095_v39, %v3276_v58  ;;  %v2703_v18 = vpop.f32.mrb[83].mxu0  ;;  %v2169_v58 = vld [vmem:[%s3482_s12 + $0x10] sm:$0xff] }
 0x8a6   : > { %v2725_v26 = vpack.c.bf16 %v2170_v25, %v2169_v58 }
 0x8a7   : > { %v2117_v19 = vadd.f32 %v2404_v38, %v2108_v16  ;;  %v2109_v20 = vmul.f32 %v2403_v36, %v2100_v17 }
 0x8a8   : > { %2726 = vmatpush3.bf16.msra.mxu0 %v2725_v26 }
 0x8a9   : > { %v2118_v21 = vadd.f32 %v2404_v38, %v2109_v20  ;;  %v2119_v22 = vmax.f32 %v2117_v19, 0.0 }
 0x8ab   : > { %v2120_v23 = vmax.f32 %v2118_v21, 0.0 }
 0x8ad   : > { %v2122_v24 = vpack.c.bf16 %v2120_v23, %v2119_v22 }
 0x8af   : > { %2705 = vmatpush3.bf16.msra.mxu1 %v2122_v24 }
 0x8b2   : > { %2707 = vmatmul.mubr.msk.bf16.vlgmr.msra.gmra.mrb[16].mxu1 %vm481_vm1, %v2121_v53 }
 0x985   : > { %v2160_v27 = vpop.f32.mrb[16].mxu1 }
 0x986   : > { %v2166_v28 = vmul.f32 0.0625, %v2160_v27  ;;  %v2708_v29 = vpop.f32.mrb[17].mxu1 }
 0x987   : > { %v2163_v30 = vpop.f32.mrb[18].mxu1 }
 0x988   : > { %v2709_v40 = vpop.f32.mrb[19].mxu1  ;;  %2719 = vmatmul.mubr.msk.f32.vlgmr.msra.gmra.mrb[84].mxu0 %vm577_vm2, %v2166_v28 }
 0xa5b   : > { %v2241_v42 = vpop.f32.mrb[84].mxu0 }
 0xa5c   : > { %v2242_v43 = vadd.f32 %v2241_v42, %v2171_v41  ;;  %v2720_v44 = vpop.f32.mrb[85].mxu0 }
 0xa5e   : > { %2246 = vst.msk [vmem:[%s459_s28] sm:$0x1] %vm2245_vm5, %v2242_v43 }
 0xa5f   : > { %2879 = shalt.err (!%p2876_p3)
}
 0xa60   : > { %s2880_s22 = scalar_lea.hbm %s3428_s0, 16  ;;  %s2884_s20 = scalar_lea.hbm %s3484_s14, 32 }
 0xa61   : > { %p2881_p4 = scmp.ne.s32.totalorder %s3428_s0, %s2880_s22  ;;  %p2885_p9 = scmp.lt.u32.totalorder %s3428_s0, %s3484_s14 }
 0xa62   : > { %p2886_p10 = scmp.lt.u32.totalorder %s2884_s20, %s2880_s22  ;;  %p2888_p12 = scmp.lt.u32.totalorder %s2880_s22, %s3428_s0 }
 0xa63   : > { %p2882_p7 = pnand %p2881_p4, %p3047_p5 }
 0xa64   : > { %p2887_p11 = por %p2886_p10, %p2885_p9 }
 0xa65   : > { %p2883_p8 = pneg %p2882_p7 }
 0xa66   : > { %p2889_p13 = por %p2888_p12, %p2887_p11 }
 0xa68   : > { %p2890_p0 = pnand %p2889_p13, %p2883_p8 }
 0xa6a   : > { %2893 = shalt.err (!%p2890_p0)
}
 0xa6b   : > { %2791 = dma.vmem_to_hbm [thread:$0]  (%p3047_p5), %s3430_s18, 16, %s3428_s0, %s2248_s25  }
 0xa6c PF: > { %p2797_p1 = scmp.ge.s32.totalorder %s2928_s16, 2  ;;  %s2272_s2 = sand.u32 1, %s2916_s29  }
 0xa6d   : > { %s2273_s26 = scalar_lea.sflag [#allocation3], %s2272_s2 }
 0xa6e   : > { %p2794_p2 = pnand %p2797_p1, %p3051_p6 }
 0xa70   : > { %2911 = dma.done.wait (!%p2794_p2), %s2273_s26, 16  }
 0xa71   : > { %2913 = vsyncadd (!%p2794_p2), %s2273_s26, 4294967280  ;;  %s3494_s17 = sld [smem:[#allocation5_spill]]  ;;  %p24_p3 = scmp.ge.s32.totalorder %s3034_s19, 4  }
 0xa72   : > { %s3495_s29 = smov %s2920_s30  ;;  %s3496_s30 = smov %s2924_s15 }
 0xa73   : > { %s3498_s16 = smov %s3034_s19  ;;  %26 = sbr.rel (!%p24_p3) target bundleno = 7 (0x7), region = 111 }
 0xa77   : > { %s3497_s15 = smov %s3494_s17 }
 0xa7a   :  { %2277 = vsyncpa [#allocation3], 1 }
 0xa7b   :  { %2279 = vsyncpa [#allocation3 + $0x1], 1 }

// kernel: densenet_forward.4
= control target key start
LH: loop header
LB: loop body
LE: loop exit
PB: predicated region body
PF: predicated region fallthrough
CT: control target
= control target key end

     0   :  { %s5226_s29 = smov 0   ;;  %s5852_s0 = inlined_call_operand.vmem [shape: bf16[2,64,16], index: 0, kind: input, shape index: {}]   ;;  %s5853_s1 = inlined_call_operand.vmem [shape: bf16[32,32], index: 1, kind: input, shape index: {}]   ;;  %s5854_s2 = inlined_call_operand.vmem [shape: bf16[64,16], index: 2, kind: input, shape index: {}]   ;;  %s5855_s3 = inlined_call_operand.vmem [shape: f32[2,32], index: 3, kind: input, shape index: {}]   ;;  %s5856_s4 = inlined_call_operand.vmem [shape: f32[2,32], index: 4, kind: input, shape index: {}]   ;;  %s5857_s5 = inlined_call_operand.vmem [shape: f32[2,16], index: 5, kind: input, shape index: {}]   ;;  %s5858_s6 = inlined_call_operand.vmem [shape: f32[2,16], index: 6, kind: input, shape index: {}]   ;;  %s5859_s7 = inlined_call_operand.vmem [shape: bf16[288,8], index: 7, kind: input, shape index: {}]   ;;  %s5860_s8 = inlined_call_operand.vmem [shape: bf16[576,64], index: 8, kind: input, shape index: {}]   ;;  %s5861_s9 = inlined_call_operand.vmem [shape: f32[1,32], index: 9, kind: input, shape index: {}]   ;;  %s5862_s10 = inlined_call_operand.vmem [shape: f32[1,32], index: 10, kind: input, shape index: {}]   ;;  %s5863_s11 = inlined_call_operand.vmem [shape: bf16[16,64], index: 11, kind: input, shape index: {}]   ;;  %s5864_s12 = inlined_call_operand.vmem [shape: bf16[32,16], index: 12, kind: input, shape index: {}]   ;;  %s5865_s13 = inlined_call_operand.vmem [shape: f32[1,16], index: 13, kind: input, shape index: {}]   ;;  %s5866_s14 = inlined_call_operand.vmem [shape: bf16[2,16,16], index: 14, kind: output, shape index: {}]  }
   0x1 LB: > { %s4056_s30 = sadd.s32 4294967295, %s5147_s29   ;;  %p4060_p0 = scmp.ge.s32.totalorder %s5147_s29, 1  ;;  %s5147_s29 = sphi %s5226_s29, %s24_s29  }
   0x2   : > { %p412_p1 = scmp.lt.s32.totalorder %s5147_s29, 3 }
   0x4   : > { %p413_p2 = pnand %p4060_p0, %p412_p1 }
   0x6   : > { %416 = sbr.rel (%p413_p2) target bundleno = 2785 (0xae1), region = 76 }
   0xd   : > { %v5075_v0 = vld [vmem:[%s5853_s1] sm:$0xff]   ;;  %p458_p3 = scmp.lt.s32.totalorder %s4056_s30, 1  ;;  %vm505_vm0 = vcmask 130048   ;;  %v5081_v6 = vld [vmem:[%s5854_s2 + $0x8] sm:$0xff]   ;;  %vm709_vm1 = vcmask 261120   ;;  %vm1005_vm2 = vcmask 523264  }
   0xe   : > { %4521 = vmatprep.subr.bf16.mxu0 %v5075_v0  ;;  %v5080_v5 = vld [vmem:[%s5854_s2] sm:$0xff]   ;;  %vm2310_vm3 = vcmask 1043456   ;;  %vm2297_vm4 = vcmask 64512   ;;  %vm5150_vm5 = vmmov 0   ;;  %vm3998_vm6 = vcmask 125952  }
   0xf   : > { %s5883_s30 = smov (!%p458_p3, %s4056_s30), 1  ;;  %4522 = vmatpush3.bf16.msra.mxu0 %v5075_v0  ;;  %4531 = vmatprep.subr.bf16.mxu1 %v5080_v5  ;;  %v4074_v7 = vld [vmem:[%s5855_s3] ss:$0 sm:$0xff] }
  0x10   : > { %s4312_s17 = sshll.u32 %s5883_s30, 5  ;;  %4532 = vmatpush3.bf16.msra.mxu1 %v5080_v5  ;;  %v4075_v9 = vld [vmem:[%s5856_s4] ss:$0 sm:$0xff]  ;;  %s4313_s15 = sshll.u32 %s5883_s30, 3 }
  0x11   : > { %s462_s20 = scalar_lea.vmem %s5852_s0, %s4312_s17  ;;  %4533 = vmatprep.subr.bf16.mxu1 %v5081_v6  ;;  %v5290_v45 = vld [vmem:[%s5860_s8] sm:$0xff]   ;;  %s467_s18 = scalar_lea.vmem %s5866_s14, %s4313_s15 }
  0x12   : > { %v5076_v1 = vld [vmem:[%s462_s20] sm:$0xff]   ;;  %v5077_v2 = vld [vmem:[%s462_s20 + $0x8] sm:$0xff]   ;;  %v5078_v3 = vld [vmem:[%s462_s20 + $0x10] sm:$0xff]  }
  0x13   : > { %4523 = vmatprep.mubr.msk.bf16.mxu0 %vm505_vm0, %v5076_v1  ;;  %v5079_v4 = vld [vmem:[%s462_s20 + $0x18] sm:$0xff]   ;;  %v4082_v46 = vld [vmem:[%s5857_s5] ss:$0 sm:$0xff] }
  0x14   : > { %4524 = vmatmul.mubr.msk.bf16.vlgmr.msra.gmra.mrb[0].mxu0 %vm505_vm0, %v5077_v2  ;;  %4534 = vmatpush3.bf16.msra.mxu1 %v5081_v6  ;;  %v4083_v48 = vld [vmem:[%s5858_s6] ss:$0 sm:$0xff] }
  0x15   : > { %4527 = vmatprep.mubr.msk.bf16.mxu0 %vm505_vm0, %v5078_v3 }
  0x1c   : > { %4528 = vmatmul.mubr.msk.bf16.gmra.mrb[4].mxu0 %vm505_vm0, %v5079_v4 }
  0x1d   : > { %4551 = vmatprep.mubr.msk.bf16.mxu0 %vm1005_vm2, %v5290_v45 }
  0xe7   : > { %v5256_v8 = vpop.f32.mrb[0].mxu0 }
  0xe8   : > { %v662_v10 = vmul.f32 %v5256_v8, %v4074_v7  ;;  %v5262_v11 = vpop.f32.mrb[1].mxu0 }
  0xe9   : > { %v660_v12 = vmul.f32 %v4074_v7, %v5262_v11  ;;  %v5265_v13 = vpop.f32.mrb[2].mxu0 }
  0xea   : > { %v675_v14 = vadd.f32 %v4075_v9, %v662_v10  ;;  %v663_v15 = vmul.f32 %v5265_v13, %v4074_v7  ;;  %v5268_v16 = vpop.f32.mrb[3].mxu0 }
  0xeb   : > { %v673_v17 = vadd.f32 %v4075_v9, %v660_v12  ;;  %v661_v18 = vmul.f32 %v4074_v7, %v5268_v16 }
  0xec   : > { %v676_v19 = vadd.f32 %v4075_v9, %v663_v15  ;;  %v683_v21 = vmax.f32 %v675_v14, 0.0 }
  0xed   : > { %v674_v20 = vadd.f32 %v4075_v9, %v661_v18  ;;  %v681_v24 = vmax.f32 %v673_v17, 0.0 }
  0xee   : > { %v684_v22 = vmax.f32 %v676_v19, 0.0 }
  0xef   : > { %v5271_v23 = vpop.f32.mrb[4].mxu0  ;;  %v682_v25 = vmax.f32 %v674_v20, 0.0 }
  0xf0   : > { %v690_v26 = vpack.c.bf16 %v684_v22, %v683_v21  ;;  %v666_v27 = vmul.f32 %v5271_v23, %v4074_v7  ;;  %v5274_v28 = vpop.f32.mrb[5].mxu0 }
  0xf1   : > { %v664_v29 = vmul.f32 %v4074_v7, %v5274_v28  ;;  %v5277_v30 = vpop.f32.mrb[6].mxu0  ;;  %v689_v31 = vpack.c.bf16 %v682_v25, %v681_v24  ;;  %v5303_v25 = vld [vmem:[%s5860_s8 + $0x8] sm:$0xff]  }
  0xf2   : > { %v679_v32 = vadd.f32 %v4075_v9, %v666_v27  ;;  %v667_v33 = vmul.f32 %v5277_v30, %v4074_v7  ;;  %v5280_v34 = vpop.f32.mrb[7].mxu0  ;;  %v5317_v27 = vld [vmem:[%s5860_s8 + $0x18] sm:$0xff]  }
  0xf3   : > { %v677_v35 = vadd.f32 %v4075_v9, %v664_v29  ;;  %v665_v36 = vmul.f32 %v4074_v7, %v5280_v34  ;;  %4535 = vmatprep.mubr.msk.bf16.mxu1 %vm709_vm1, %v689_v31  ;;  %v5322_v29 = vld [vmem:[%s5860_s8 + $0x20] sm:$0xff]   ;;  %v5331_v31 = vld [vmem:[%s5860_s8 + $0x28] sm:$0xff]  }
  0xf4   : > { %v680_v37 = vadd.f32 %v4075_v9, %v667_v33  ;;  %4536 = vmatmul.mubr.msk.bf16.vlgmr.msra.gmra.mrb[0].mxu1 %vm709_vm1, %v690_v26  ;;  %v687_v39 = vmax.f32 %v679_v32, 0.0  ;;  %v5308_v26 = vld [vmem:[%s5860_s8 + $0x10] sm:$0xff]   ;;  %v5345_v33 = vld [vmem:[%s5860_s8 + $0x38] sm:$0xff]  }
  0xf5   : > { %v678_v38 = vadd.f32 %v4075_v9, %v665_v36  ;;  %v685_v41 = vmax.f32 %v677_v35, 0.0  ;;  %v5336_v32 = vld [vmem:[%s5860_s8 + $0x30] sm:$0xff]   ;;  %v5350_v35 = vld [vmem:[%s5860_s8 + $0x40] sm:$0xff]   ;;  %v5359_v36 = vld [vmem:[%s5860_s8 + $0x48] sm:$0xff]  }
  0xf6   : > { %v688_v40 = vmax.f32 %v680_v37, 0.0  ;;  %v5364_v37 = vld [vmem:[%s5860_s8 + $0x50] sm:$0xff]  }
  0xf7   : > { %v686_v42 = vmax.f32 %v678_v38, 0.0  ;;  %v5373_v38 = vld [vmem:[%s5860_s8 + $0x58] sm:$0xff]  }
  0xf8   : > { %v692_v43 = vpack.c.bf16 %v688_v40, %v687_v39  ;;  %v5378_v39 = vld [vmem:[%s5860_s8 + $0x60] sm:$0xff]   ;;  %v5387_v40 = vld [vmem:[%s5860_s8 + $0x68] sm:$0xff]  }
  0xf9   : > { %v691_v44 = vpack.c.bf16 %v686_v42, %v685_v41  ;;  %v5392_v41 = vld [vmem:[%s5860_s8 + $0x70] sm:$0xff]   ;;  %v5401_v42 = vld [vmem:[%s5860_s8 + $0x78] sm:$0xff]  }
  0xfb   : > { %4539 = vmatprep.mubr.msk.bf16.mxu1 %vm709_vm1, %v691_v44  ;;  %v5415_v44 = vld [vmem:[%s5860_s8 + $0x88] sm:$0xff]  }
  0xfc   : > { %4540 = vmatmul.mubr.msk.bf16.gmra.mrb[4].mxu1 %vm709_vm1, %v692_v43  ;;  %v5406_v43 = vld [vmem:[%s5860_s8 + $0x80] sm:$0xff]  }
 0x1c7   : > { %v4537_v47 = vpop.f32.mrb[0].mxu1 }
 0x1c8   : > { %v794_v49 = vmul.f32 %v4537_v47, %v4082_v46  ;;  %v756_v50 = vpop.f32.mrb[1].mxu1  ;;  %v5429_v47 = vld [vmem:[%s5860_s8 + $0x98] sm:$0xff]  }
 0x1c9   : > { %v792_v51 = vmul.f32 %v4082_v46, %v756_v50  ;;  %v4538_v52 = vpop.f32.mrb[2].mxu1  ;;  %v5448_v50 = vld [vmem:[%s5860_s8 + $0xb0] sm:$0xff]  }
 0x1ca   : > { %v807_v53 = vadd.f32 %v4083_v48, %v794_v49  ;;  %v795_v54 = vmul.f32 %v4538_v52, %v4082_v46  ;;  %v759_v55 = vpop.f32.mrb[3].mxu1  ;;  %v5443_v49 = vld [vmem:[%s5860_s8 + $0xa8] sm:$0xff]   ;;  %v5462_v52 = vld [vmem:[%s5860_s8 + $0xc0] sm:$0xff]  }
 0x1cb   : > { %v805_v56 = vadd.f32 %v4083_v48, %v792_v51  ;;  %v793_v57 = vmul.f32 %v4082_v46, %v759_v55  ;;  %v5457_v51 = vld [vmem:[%s5860_s8 + $0xb8] sm:$0xff]   ;;  %v5479_v55 = vld [vmem:[%s5860_s8 + $0xd0] sm:$0xff]  }
 0x1cc   : > { %v808_v58 = vadd.f32 %v4083_v48, %v795_v54  ;;  %v815_v60 = vmax.f32 %v807_v53, 0.0  ;;  %v5118_v53 = vld [vmem:[%s5859_s7 + $0x8] sm:$0xff]  }
 0x1cd   : > { %v806_v59 = vadd.f32 %v4083_v48, %v793_v57  ;;  %v813_v62 = vmax.f32 %v805_v56, 0.0  ;;  %4623 = vmatprep.subr.bf16.mxu1 %v5118_v53  ;;  %v5474_v54 = vld [vmem:[%s5860_s8 + $0xc8] sm:$0xff]   ;;  %v5488_v56 = vld [vmem:[%s5860_s8 + $0xd8] sm:$0xff]   ;;  %v5493_v57 = vld [vmem:[%s5860_s8 + $0xe0] sm:$0xff]  }
 0x1ce   : > { %v816_v61 = vmax.f32 %v808_v58, 0.0  ;;  %4624 = vmatpush3.bf16.msra.mxu1 %v5118_v53  ;;  %v5119_v58 = vld [vmem:[%s5859_s7] sm:$0xff]   ;;  %v5120_v53 = vld [vmem:[%s5859_s7 + $0x10] sm:$0xff]  }
 0x1cf   : > { %v814_v63 = vmax.f32 %v806_v59, 0.0  ;;  %v4541_v0 = vpop.f32.mrb[4].mxu1  ;;  %v5505_v59 = vld [vmem:[%s5860_s8 + $0xe8] sm:$0xff]   ;;  %4633 = vmatprep.subr.bf16.mxu1 %v5119_v58 }
 0x1d0   : > { %v798_v1 = vmul.f32 %v4541_v0, %v4082_v46  ;;  %v772_v2 = vpop.f32.mrb[5].mxu1  ;;  %v822_v3 = vpack.c.bf16 %v816_v61, %v815_v60  ;;  %v5510_v60 = vld [vmem:[%s5860_s8 + $0xf0] sm:$0xff]   ;;  %v5519_v61 = vld [vmem:[%s5860_s8 + $0xf8] sm:$0xff]  }
 0x1d1   : > { %v796_v4 = vmul.f32 %v4082_v46, %v772_v2  ;;  %v4542_v5 = vpop.f32.mrb[6].mxu1  ;;  %v821_v6 = vpack.c.bf16 %v814_v63, %v813_v62  ;;  %v5524_v62 = vld [vmem:[%s5860_s8 + $0x100] sm:$0xff]   ;;  %v5533_v63 = vld [vmem:[%s5860_s8 + $0x108] sm:$0xff]   ;;  %v5538_v0 = vld [vmem:[%s5860_s8 + $0x110] sm:$0xff]  }
 0x1d2   : > { %v811_v7 = vadd.f32 %v4083_v48, %v798_v1  ;;  %v799_v9 = vmul.f32 %v4542_v5, %v4082_v46  ;;  %v775_v10 = vpop.f32.mrb[7].mxu1  ;;  %v5547_v1 = vld [vmem:[%s5860_s8 + $0x118] sm:$0xff]  }
 0x1d3   : > { %v809_v12 = vadd.f32 %v4083_v48, %v796_v4  ;;  %v797_v14 = vmul.f32 %v4082_v46, %v775_v10  ;;  %4543 = vmatprep.subr.bf16.mxu0 %v821_v6  ;;  %v5420_v46 = vld [vmem:[%s5860_s8 + $0x90] sm:$0xff]  }
 0x1d4   : > { %v812_v15 = vadd.f32 %v4083_v48, %v799_v9  ;;  %4544 = vmatpush3.bf16.msra.mxu0 %v821_v6  ;;  %v819_v18 = vmax.f32 %v811_v7, 0.0 }
 0x1d5   : > { %v810_v17 = vadd.f32 %v4083_v48, %v797_v14  ;;  %4545 = vmatprep.subr.bf16.mxu0 %v822_v3  ;;  %v817_v20 = vmax.f32 %v809_v12, 0.0  ;;  %v5434_v48 = vld [vmem:[%s5860_s8 + $0xa0] sm:$0xff]  }
 0x1d6   : > { %v820_v19 = vmax.f32 %v812_v15, 0.0 }
 0x1d7   : > { %v818_v21 = vmax.f32 %v810_v17, 0.0 }
 0x1d8   : > { %4546 = vmatpush3.bf16.msra.mxu0 %v822_v3  ;;  %v824_v22 = vpack.c.bf16 %v820_v19, %v819_v18 }
 0x1d9   : > { %v823_v24 = vpack.c.bf16 %v818_v21, %v817_v20 }
 0x1db   : > { %4547 = vmatprep.subr.bf16.mxu0 %v823_v24 }
 0x1dc   : > { %4548 = vmatpush3.bf16.msra.mxu0 %v823_v24 }
 0x1dd   : > { %4549 = vmatprep.subr.bf16.mxu0 %v824_v22 }
 0x1e0   : > { %4550 = vmatpush3.bf16.msra.mxu0 %v824_v22 }
 0x1e3   : > { %4552 = vmatmul.mubr.msk.bf16.vlgmr.msra.gmra.mrb[8].mxu0 %vm1005_vm2, %v5303_v25 }
 0x1e4   : > { %4555 = vmatprep.mubr.msk.bf16.mxu0 %vm1005_vm2, %v5308_v26 }
 0x1eb   : > { %4556 = vmatmul.mubr.msk.bf16.gmra.mrb[12].mxu0 %vm1005_vm2, %v5317_v27 }
 0x1ec   : > { %4559 = vmatprep.mubr.msk.bf16.mxu0 %vm1005_vm2, %v5322_v29 }
 0x1f3   : > { %4560 = vmatmul.mubr.msk.bf16.gmra.mrb[16].mxu0 %vm1005_vm2, %v5331_v31 }
 0x1f4   : > { %4563 = vmatprep.mubr.msk.bf16.mxu0 %vm1005_vm2, %v5336_v32 }
 0x1fb   : > { %4564 = vmatmul.mubr.msk.bf16.gmra.mrb[20].mxu0 %vm1005_vm2, %v5345_v33 }
 0x1fc   : > { %4567 = vmatprep.mubr.msk.bf16.mxu0 %vm1005_vm2, %v5350_v35 }
 0x203   : > { %4568 = vmatmul.mubr.msk.bf16.gmra.mrb[24].mxu0 %vm1005_vm2, %v5359_v36 }
 0x204   : > { %4571 = vmatprep.mubr.msk.bf16.mxu0 %vm1005_vm2, %v5364_v37 }
 0x20b   : > { %4572 = vmatmul.mubr.msk.bf16.gmra.mrb[28].mxu0 %vm1005_vm2, %v5373_v38 }
 0x20c   : > { %4575 = vmatprep.mubr.msk.bf16.mxu0 %vm1005_vm2, %v5378_v39 }
 0x213   : > { %4576 = vmatmul.mubr.msk.bf16.gmra.mrb[32].mxu0 %vm1005_vm2, %v5387_v40 }
 0x214   : > { %4579 = vmatprep.mubr.msk.bf16.mxu0 %vm1005_vm2, %v5392_v41 }
 0x21b   : > { %4580 = vmatmul.mubr.msk.bf16.gmra.mrb[36].mxu0 %vm1005_vm2, %v5401_v42 }
 0x21c   : > { %4583 = vmatprep.mubr.msk.bf16.mxu0 %vm1005_vm2, %v5406_v43 }
 0x223   : > { %4584 = vmatmul.mubr.msk.bf16.gmra.mrb[40].mxu0 %vm1005_vm2, %v5415_v44 }
 0x224   : > { %4587 = vmatprep.mubr.msk.bf16.mxu0 %vm1005_vm2, %v5420_v46 }
 0x22b   : > { %4588 = vmatmul.mubr.msk.bf16.gmra.mrb[44].mxu0 %vm1005_vm2, %v5429_v47 }
 0x22c   : > { %4591 = vmatprep.mubr.msk.bf16.mxu0 %vm1005_vm2, %v5434_v48 }
 0x233   : > { %4592 = vmatmul.mubr.msk.bf16.gmra.mrb[48].mxu0 %vm1005_vm2, %v5443_v49 }
 0x234   : > { %4595 = vmatprep.mubr.msk.bf16.mxu0 %vm1005_vm2, %v5448_v50 }
 0x23b   : > { %4596 = vmatmul.mubr.msk.bf16.gmra.mrb[52].mxu0 %vm1005_vm2, %v5457_v51 }
 0x23c   : > { %4599 = vmatprep.mubr.msk.bf16.mxu0 %vm1005_vm2, %v5462_v52 }
 0x243   : > { %4600 = vmatmul.mubr.msk.bf16.gmra.mrb[56].mxu0 %vm1005_vm2, %v5474_v54 }
 0x244   : > { %4603 = vmatprep.mubr.msk.bf16.mxu0 %vm1005_vm2, %v5479_v55 }
 0x24b   : > { %4604 = vmatmul.mubr.msk.bf16.gmra.mrb[60].mxu0 %vm1005_vm2, %v5488_v56 }
 0x24c   : > { %4607 = vmatprep.mubr.msk.bf16.mxu0 %vm1005_vm2, %v5493_v57 }
 0x253   : > { %4608 = vmatmul.mubr.msk.bf16.gmra.mrb[64].mxu0 %vm1005_vm2, %v5505_v59 }
 0x254   : > { %4611 = vmatprep.mubr.msk.bf16.mxu0 %vm1005_vm2, %v5510_v60 }
 0x25b   : > { %4612 = vmatmul.mubr.msk.bf16.gmra.mrb[68].mxu0 %vm1005_vm2, %v5519_v61 }
 0x25c   : > { %4615 = vmatprep.mubr.msk.bf16.mxu0 %vm1005_vm2, %v5524_v62 }
 0x263   : > { %4616 = vmatmul.mubr.msk.bf16.gmra.mrb[72].mxu0 %vm1005_vm2, %v5533_v63 }
 0x264   : > { %4619 = vmatprep.mubr.msk.bf16.mxu0 %vm1005_vm2, %v5538_v0 }
 0x26b   : > { %4620 = vmatmul.mubr.msk.bf16.gmra.mrb[76].mxu0 %vm1005_vm2, %v5547_v1 }
 0x2b6   : > { %v4553_v2 = vpop.f32.mrb[8].mxu0 }
 0x2b7   : > { %v1148_v3 = vpop.f32.mrb[9].mxu0 }
 0x2b8   : > { %v4554_v4 = vpop.f32.mrb[10].mxu0 }
 0x2b9   : > { %v1436_v5 = vpack.c.bf16 %v4554_v4, %v4553_v2  ;;  %v1151_v6 = vpop.f32.mrb[11].mxu0 }
 0x2ba   : > { %v1435_v7 = vpack.c.bf16 %v1151_v6, %v1148_v3 }
 0x2be   : > { %v4557_v9 = vpop.f32.mrb[12].mxu0 }
 0x2bf   : > { %v1164_v10 = vpop.f32.mrb[13].mxu0 }
 0x2c0   : > { %v4558_v12 = vpop.f32.mrb[14].mxu0 }
 0x2c1   : > { %v1438_v14 = vpack.c.bf16 %v4558_v12, %v4557_v9  ;;  %v1167_v15 = vpop.f32.mrb[15].mxu0  ;;  %v2296_v12 = vld [vmem:[%s5853_s1 + $0x8] sm:$0xf] }
 0x2c2   : > { %v1437_v17 = vpack.c.bf16 %v1167_v15, %v1164_v10  ;;  %5063 = vmatprep.subr.msk.bf16.mxu0 %vm2310_vm3, %v2296_v12 }
 0x2c6   : > { %v4561_v18 = vpop.f32.mrb[16].mxu0 }
 0x2c7   : > { %v1180_v19 = vpop.f32.mrb[17].mxu0 }
 0x2c8   : > { %v4562_v20 = vpop.f32.mrb[18].mxu0 }
 0x2c9   : > { %v1440_v21 = vpack.c.bf16 %v4562_v20, %v4561_v18  ;;  %v1183_v22 = vpop.f32.mrb[19].mxu0 }
 0x2ca   : > { %v1439_v24 = vpack.c.bf16 %v1183_v22, %v1180_v19 }
 0x2cc   : > { %4625 = vmatprep.mubr.msk.bf16.mxu1 %vm505_vm0, %v1439_v24  ;;  %v5121_v24 = vld [vmem:[%s5859_s7 + $0x18] sm:$0xff]  }
 0x2cd   : > { %4626 = vmatmul.mubr.msk.bf16.vlgmr.msra.gmra.mrb[8].mxu1 %vm505_vm0, %v1440_v21 }
 0x2ce   : > { %v4565_v2 = vpop.f32.mrb[20].mxu0  ;;  %4634 = vmatpush3.bf16.msra.mxu1 %v5119_v58  ;;  %v2312_v58 = vsel %vm2310_vm3, %v2296_v12, 0 }
 0x2cf   : > { %v1196_v3 = vpop.f32.mrb[21].mxu0  ;;  %4643 = vmatprep.subr.bf16.mxu1 %v5120_v53  ;;  %4714 = vmatpush3.bf16.msra.mxu0 %v2312_v58 }
 0x2d0   : > { %v4566_v4 = vpop.f32.mrb[22].mxu0 }
 0x2d1   : > { %v1442_v6 = vpack.c.bf16 %v4566_v4, %v4565_v2  ;;  %v1199_v9 = vpop.f32.mrb[23].mxu0 }
 0x2d2   : > { %v1441_v10 = vpack.c.bf16 %v1199_v9, %v1196_v3 }
 0x2d4   : > { %4629 = vmatprep.mubr.msk.bf16.mxu1 %vm505_vm0, %v1441_v10 }
 0x2d5   : > { %4630 = vmatmul.mubr.msk.bf16.gmra.mrb[12].mxu1 %vm505_vm0, %v1442_v6 }
 0x2d6   : > { %4635 = vmatprep.mubr.msk.bf16.mxu1 %vm505_vm0, %v1435_v7  ;;  %v4569_v15 = vpop.f32.mrb[24].mxu0 }
 0x2d7   : > { %v1212_v18 = vpop.f32.mrb[25].mxu0 }
 0x2d8   : > { %v4570_v19 = vpop.f32.mrb[26].mxu0 }
 0x2d9   : > { %v1444_v20 = vpack.c.bf16 %v4570_v19, %v4569_v15  ;;  %v1215_v21 = vpop.f32.mrb[27].mxu0 }
 0x2da   : > { %v1443_v22 = vpack.c.bf16 %v1215_v21, %v1212_v18 }
 0x2dd   : > { %4636 = vmatmul.mubr.msk.bf16.vlgmr.msra.gmra.mrb[8].mxu1 %vm505_vm0, %v1436_v5 }
 0x2de   : > { %4639 = vmatprep.mubr.msk.bf16.mxu1 %vm505_vm0, %v1437_v17  ;;  %4644 = vmatpush3.bf16.msra.mxu1 %v5120_v53  ;;  %v4573_v7 = vpop.f32.mrb[28].mxu0  ;;  %v5122_v17 = vld [vmem:[%s5859_s7 + $0x20] sm:$0xff]  }
 0x2df   : > { %v1228_v2 = vpop.f32.mrb[29].mxu0  ;;  %4653 = vmatprep.subr.bf16.mxu1 %v5121_v24 }
 0x2e0   : > { %v4574_v3 = vpop.f32.mrb[30].mxu0 }
 0x2e1   : > { %v1446_v4 = vpack.c.bf16 %v4574_v3, %v4573_v7  ;;  %v1231_v6 = vpop.f32.mrb[31].mxu0 }
 0x2e2   : > { %v1445_v9 = vpack.c.bf16 %v1231_v6, %v1228_v2 }
 0x2e5   : > { %4640 = vmatmul.mubr.msk.bf16.gmra.mrb[12].mxu1 %vm505_vm0, %v1438_v14 }
 0x2e6   : > { %4645 = vmatprep.mubr.msk.bf16.mxu1 %vm505_vm0, %v1443_v22  ;;  %v4577_v10 = vpop.f32.mrb[32].mxu0 }
 0x2e7   : > { %v1244_v12 = vpop.f32.mrb[33].mxu0 }
 0x2e8   : > { %v4578_v15 = vpop.f32.mrb[34].mxu0 }
 0x2e9   : > { %v1448_v58 = vpack.c.bf16 %v4578_v15, %v4577_v10  ;;  %v1247_v18 = vpop.f32.mrb[35].mxu0 }
 0x2ea   : > { %v1447_v5 = vpack.c.bf16 %v1247_v18, %v1244_v12 }
 0x2ed   : > { %4646 = vmatmul.mubr.msk.bf16.vlgmr.msra.gmra.mrb[8].mxu1 %vm505_vm0, %v1444_v20 }
 0x2ee   : > { %4654 = vmatpush3.bf16.msra.mxu1 %v5121_v24  ;;  %4649 = vmatprep.mubr.msk.bf16.mxu1 %vm505_vm0, %v1445_v9  ;;  %v4581_v53 = vpop.f32.mrb[36].mxu0  ;;  %v5123_v24 = vld [vmem:[%s5859_s7 + $0x28] sm:$0xff]  }
 0x2ef   : > { %v1260_v19 = vpop.f32.mrb[37].mxu0  ;;  %4663 = vmatprep.subr.bf16.mxu1 %v5122_v17 }
 0x2f0   : > { %v4582_v14 = vpop.f32.mrb[38].mxu0 }
 0x2f1   : > { %v1450_v21 = vpack.c.bf16 %v4582_v14, %v4581_v53  ;;  %v1263_v22 = vpop.f32.mrb[39].mxu0 }
 0x2f2   : > { %v1449_v7 = vpack.c.bf16 %v1263_v22, %v1260_v19 }
 0x2f5   : > { %4650 = vmatmul.mubr.msk.bf16.gmra.mrb[12].mxu1 %vm505_vm0, %v1446_v4 }
 0x2f6   : > { %4655 = vmatprep.mubr.msk.bf16.mxu1 %vm505_vm0, %v1447_v5  ;;  %v4585_v2 = vpop.f32.mrb[40].mxu0 }
 0x2f7   : > { %v1276_v3 = vpop.f32.mrb[41].mxu0 }
 0x2f8   : > { %v4586_v6 = vpop.f32.mrb[42].mxu0 }
 0x2f9   : > { %v1452_v10 = vpack.c.bf16 %v4586_v6, %v4585_v2  ;;  %v1279_v12 = vpop.f32.mrb[43].mxu0 }
 0x2fa   : > { %v1451_v20 = vpack.c.bf16 %v1279_v12, %v1276_v3 }
 0x2fd   : > { %4656 = vmatmul.mubr.msk.bf16.vlgmr.msra.gmra.mrb[8].mxu1 %vm505_vm0, %v1448_v58 }
 0x2fe   : > { %4664 = vmatpush3.bf16.msra.mxu1 %v5122_v17  ;;  %4659 = vmatprep.mubr.msk.bf16.mxu1 %vm505_vm0, %v1449_v7  ;;  %v4589_v9 = vpop.f32.mrb[44].mxu0  ;;  %v5124_v17 = vld [vmem:[%s5859_s7 + $0x30] sm:$0xff]  }
 0x2ff   : > { %v1292_v15 = vpop.f32.mrb[45].mxu0  ;;  %4673 = vmatprep.subr.bf16.mxu1 %v5123_v24 }
 0x300   : > { %v4590_v4 = vpop.f32.mrb[46].mxu0 }
 0x301   : > { %v1454_v18 = vpack.c.bf16 %v4590_v4, %v4589_v9  ;;  %v1295_v5 = vpop.f32.mrb[47].mxu0 }
 0x302   : > { %v1453_v53 = vpack.c.bf16 %v1295_v5, %v1292_v15 }
 0x305   : > { %4660 = vmatmul.mubr.msk.bf16.gmra.mrb[12].mxu1 %vm505_vm0, %v1450_v21 }
 0x306   : > { %4665 = vmatprep.mubr.msk.bf16.mxu1 %vm505_vm0, %v1451_v20  ;;  %v4593_v19 = vpop.f32.mrb[48].mxu0 }
 0x307   : > { %v1308_v14 = vpop.f32.mrb[49].mxu0 }
 0x308   : > { %v4594_v22 = vpop.f32.mrb[50].mxu0 }
 0x309   : > { %v1456_v2 = vpack.c.bf16 %v4594_v22, %v4593_v19  ;;  %v1311_v3 = vpop.f32.mrb[51].mxu0 }
 0x30a   : > { %v1455_v58 = vpack.c.bf16 %v1311_v3, %v1308_v14 }
 0x30d   : > { %4666 = vmatmul.mubr.msk.bf16.vlgmr.msra.gmra.mrb[8].mxu1 %vm505_vm0, %v1452_v10 }
 0x30e   : > { %4674 = vmatpush3.bf16.msra.mxu1 %v5123_v24  ;;  %4669 = vmatprep.mubr.msk.bf16.mxu1 %vm505_vm0, %v1453_v53  ;;  %v4597_v7 = vpop.f32.mrb[52].mxu0  ;;  %v5125_v24 = vld [vmem:[%s5859_s7 + $0x38] sm:$0xff]  }
 0x30f   : > { %v1324_v6 = vpop.f32.mrb[53].mxu0  ;;  %4683 = vmatprep.subr.bf16.mxu1 %v5124_v17 }
 0x310   : > { %v4598_v21 = vpop.f32.mrb[54].mxu0 }
 0x311   : > { %v1458_v12 = vpack.c.bf16 %v4598_v21, %v4597_v7  ;;  %v1327_v20 = vpop.f32.mrb[55].mxu0 }
 0x312   : > { %v1457_v9 = vpack.c.bf16 %v1327_v20, %v1324_v6 }
 0x315   : > { %4670 = vmatmul.mubr.msk.bf16.gmra.mrb[12].mxu1 %vm505_vm0, %v1454_v18 }
 0x316   : > { %4675 = vmatprep.mubr.msk.bf16.mxu1 %vm505_vm0, %v1455_v58  ;;  %v4601_v15 = vpop.f32.mrb[56].mxu0 }
 0x317   : > { %v1340_v4 = vpop.f32.mrb[57].mxu0 }
 0x318   : > { %v4602_v5 = vpop.f32.mrb[58].mxu0 }
 0x319   : > { %v1460_v19 = vpack.c.bf16 %v4602_v5, %v4601_v15  ;;  %v1343_v14 = vpop.f32.mrb[59].mxu0 }
 0x31a   : > { %v1459_v10 = vpack.c.bf16 %v1343_v14, %v1340_v4 }
 0x31d   : > { %4676 = vmatmul.mubr.msk.bf16.vlgmr.msra.gmra.mrb[8].mxu1 %vm505_vm0, %v1456_v2 }
 0x31e   : > { %4684 = vmatpush3.bf16.msra.mxu1 %v5124_v17  ;;  %4679 = vmatprep.mubr.msk.bf16.mxu1 %vm505_vm0, %v1457_v9  ;;  %v4605_v53 = vpop.f32.mrb[60].mxu0  ;;  %v5126_v17 = vld [vmem:[%s5859_s7 + $0x40] sm:$0xff]  }
 0x31f   : > { %v1356_v22 = vpop.f32.mrb[61].mxu0  ;;  %4693 = vmatprep.subr.bf16.mxu1 %v5125_v24 }
 0x320   : > { %v4606_v18 = vpop.f32.mrb[62].mxu0 }
 0x321   : > { %v1462_v3 = vpack.c.bf16 %v4606_v18, %v4605_v53  ;;  %v1359_v58 = vpop.f32.mrb[63].mxu0 }
 0x322   : > { %v1461_v7 = vpack.c.bf16 %v1359_v58, %v1356_v22 }
 0x325   : > { %4680 = vmatmul.mubr.msk.bf16.gmra.mrb[12].mxu1 %vm505_vm0, %v1458_v12 }
 0x326   : > { %4685 = vmatprep.mubr.msk.bf16.mxu1 %vm505_vm0, %v1459_v10  ;;  %v4609_v6 = vpop.f32.mrb[64].mxu0 }
 0x327   : > { %v1372_v21 = vpop.f32.mrb[65].mxu0 }
 0x328   : > { %v4610_v20 = vpop.f32.mrb[66].mxu0 }
 0x329   : > { %v1464_v15 = vpack.c.bf16 %v4610_v20, %v4609_v6  ;;  %v1375_v4 = vpop.f32.mrb[67].mxu0 }
 0x32a   : > { %v1463_v2 = vpack.c.bf16 %v1375_v4, %v1372_v21 }
 0x32d   : > { %4686 = vmatmul.mubr.msk.bf16.vlgmr.msra.gmra.mrb[8].mxu1 %vm505_vm0, %v1460_v19 }
 0x32e   : > { %4694 = vmatpush3.bf16.msra.mxu1 %v5125_v24  ;;  %4689 = vmatprep.mubr.msk.bf16.mxu1 %vm505_vm0, %v1461_v7  ;;  %v4613_v9 = vpop.f32.mrb[68].mxu0 }
 0x32f   : > { %v1388_v5 = vpop.f32.mrb[69].mxu0  ;;  %4703 = vmatprep.subr.bf16.mxu1 %v5126_v17 }
 0x330   : > { %v4614_v12 = vpop.f32.mrb[70].mxu0 }
 0x331   : > { %v1466_v14 = vpack.c.bf16 %v4614_v12, %v4613_v9  ;;  %v1391_v10 = vpop.f32.mrb[71].mxu0 }
 0x332   : > { %v1465_v53 = vpack.c.bf16 %v1391_v10, %v1388_v5 }
 0x335   : > { %4690 = vmatmul.mubr.msk.bf16.gmra.mrb[12].mxu1 %vm505_vm0, %v1462_v3  ;;  %v5127_v3 = vld [vmem:[%s5854_s2 + $0x10] sm:$0xff]  }
 0x336   : > { %4695 = vmatprep.mubr.msk.bf16.mxu1 %vm505_vm0, %v1463_v2  ;;  %v4617_v22 = vpop.f32.mrb[72].mxu0 }
 0x337   : > { %v1404_v18 = vpop.f32.mrb[73].mxu0 }
 0x338   : > { %v4618_v58 = vpop.f32.mrb[74].mxu0 }
 0x339   : > { %v1468_v6 = vpack.c.bf16 %v4618_v58, %v4617_v22  ;;  %v1407_v21 = vpop.f32.mrb[75].mxu0 }
 0x33a   : > { %v1467_v19 = vpack.c.bf16 %v1407_v21, %v1404_v18 }
 0x33d   : > { %4696 = vmatmul.mubr.msk.bf16.vlgmr.msra.gmra.mrb[8].mxu1 %vm505_vm0, %v1464_v15 }
 0x33e   : > { %4704 = vmatpush3.bf16.msra.mxu1 %v5126_v17  ;;  %4699 = vmatprep.mubr.msk.bf16.mxu1 %vm505_vm0, %v1465_v53  ;;  %v4621_v24 = vpop.f32.mrb[76].mxu0 }
 0x33f   : > { %v1420_v7 = vpop.f32.mrb[77].mxu0  ;;  %4723 = vmatprep.subr.bf16.mxu1 %v5127_v3 }
 0x340   : > { %v4622_v20 = vpop.f32.mrb[78].mxu0 }
 0x341   : > { %v1470_v4 = vpack.c.bf16 %v4622_v20, %v4621_v24  ;;  %v1423_v9 = vpop.f32.mrb[79].mxu0 }
 0x342   : > { %v1469_v5 = vpack.c.bf16 %v1423_v9, %v1420_v7  ;;  %v4205_v7 = vld [vmem:[%s5855_s3 + $0x1] ss:$0 sm:$0xff] }
 0x345   : > { %4700 = vmatmul.mubr.msk.bf16.gmra.mrb[12].mxu1 %vm505_vm0, %v1466_v14 }
 0x346   : > { %4705 = vmatprep.mubr.msk.bf16.mxu1 %vm505_vm0, %v1467_v19  ;;  %v5128_v19 = vld [vmem:[%s5854_s2 + $0x18] sm:$0xff]  }
 0x34d   : > { %4706 = vmatmul.mubr.msk.bf16.vlgmr.msra.gmra.mrb[8].mxu1 %vm505_vm0, %v1468_v6 }
 0x34e   : > { %4709 = vmatprep.mubr.msk.bf16.mxu1 %vm505_vm0, %v1469_v5  ;;  %4724 = vmatpush3.bf16.msra.mxu1 %v5127_v3  ;;  %v4206_v3 = vld [vmem:[%s5856_s4 + $0x1] ss:$0 sm:$0xff] }
 0x34f   : > { %4725 = vmatprep.subr.bf16.mxu1 %v5128_v19 }
 0x352   : > { %4726 = vmatpush3.bf16.msra.mxu1 %v5128_v19 }
 0x355   : > { %4710 = vmatmul.mubr.msk.bf16.gmra.mrb[12].mxu1 %vm505_vm0, %v1470_v4 }
 0x420   : > { %v4707_v15 = vpop.f32.mrb[8].mxu1 }
 0x421   : > { %v2253_v2 = vpop.f32.mrb[9].mxu1 }
 0x422   : > { %v4708_v17 = vpop.f32.mrb[10].mxu1 }
 0x423   : > { %v2293_v12 = vpack.c.bf16 %v4708_v17, %v4707_v15  ;;  %v2256_v10 = vpop.f32.mrb[11].mxu1 }
 0x424   : > { %v2292_v14 = vpack.c.bf16 %v2256_v10, %v2253_v2 }
 0x426   : > { %4715 = vmatprep.mubr.msk.bf16.mxu0 %vm2297_vm4, %v2292_v14 }
 0x427   : > { %4716 = vmatmul.mubr.msk.bf16.vlgmr.msra.gmra.mrb[80].mxu0 %vm2297_vm4, %v2293_v12 }
 0x428   : > { %v4711_v53 = vpop.f32.mrb[12].mxu1 }
 0x429   : > { %v2269_v22 = vpop.f32.mrb[13].mxu1 }
 0x42a   : > { %v4712_v18 = vpop.f32.mrb[14].mxu1 }
 0x42b   : > { %v2295_v58 = vpack.c.bf16 %v4712_v18, %v4711_v53  ;;  %v2272_v6 = vpop.f32.mrb[15].mxu1 }
 0x42c   : > { %v2294_v21 = vpack.c.bf16 %v2272_v6, %v2269_v22 }
 0x42e   : > { %4719 = vmatprep.mubr.msk.bf16.mxu0 %vm2297_vm4, %v2294_v21 }
 0x42f   : > { %4720 = vmatmul.mubr.msk.bf16.gmra.mrb[84].mxu0 %vm2297_vm4, %v2295_v58 }
 0x430   : > { %4743 = vmatprep.mubr.msk.bf16.mxu0 %vm1005_vm2, %v5290_v45 }
 0x4fa   : > { %v4717_v24 = vpop.f32.mrb[80].mxu0 }
 0x4fb   : > { %v5629_v20 = vadd.f32 %v4717_v24, %v5256_v8  ;;  %v2348_v4 = vpop.f32.mrb[81].mxu0 }
 0x4fc   : > { %v5632_v9 = vadd.f32 %v2348_v4, %v5262_v11  ;;  %v4718_v5 = vpop.f32.mrb[82].mxu0 }
 0x4fd   : > { %v2394_v45 = vmul.f32 %v4205_v7, %v5629_v20  ;;  %v5639_v15 = vadd.f32 %v4718_v5, %v5265_v13  ;;  %v2351_v2 = vpop.f32.mrb[83].mxu0 }
 0x4fe   : > { %v2392_v17 = vmul.f32 %v4205_v7, %v5632_v9  ;;  %v5643_v8 = vadd.f32 %v2351_v2, %v5268_v16 }
 0x4ff   : > { %v2395_v12 = vmul.f32 %v4205_v7, %v5639_v15  ;;  %v2407_v14 = vadd.f32 %v4206_v3, %v2394_v45 }
 0x500   : > { %5872 = vst [vmem:[#allocation2_spill] sm:$0xff] %v5643_v8  ;;  %v2405_v11 = vadd.f32 %v4206_v3, %v2392_v17  ;;  %v2393_v10 = vmul.f32 %v4205_v7, %v5643_v8 }
 0x501   : > { %v2408_v53 = vadd.f32 %v4206_v3, %v2395_v12  ;;  %v2415_v4 = vmax.f32 %v2407_v14, 0.0 }
 0x502   : > { %v2406_v22 = vadd.f32 %v4206_v3, %v2393_v10  ;;  %v4721_v18 = vpop.f32.mrb[84].mxu0  ;;  %v2413_v21 = vmax.f32 %v2405_v11, 0.0 }
 0x503   : > { %v2416_v58 = vmax.f32 %v2408_v53, 0.0  ;;  %v5648_v6 = vadd.f32 %v4721_v18, %v5271_v23  ;;  %v2364_v13 = vpop.f32.mrb[85].mxu0 }
 0x504   : > { %v2414_v19 = vmax.f32 %v2406_v22, 0.0  ;;  %v5651_v24 = vadd.f32 %v2364_v13, %v5274_v28  ;;  %v4722_v16 = vpop.f32.mrb[86].mxu0 }
 0x505   : > { %5873 = vst [vmem:[#allocation3_spill] sm:$0xff] %v5648_v6  ;;  %v2398_v5 = vmul.f32 %v4205_v7, %v5648_v6  ;;  %v5655_v2 = vadd.f32 %v4722_v16, %v5277_v30  ;;  %v2367_v45 = vpop.f32.mrb[87].mxu0  ;;  %v2422_v10 = vpack.c.bf16 %v2416_v58, %v2415_v4  ;;  %v4214_v4 = vld [vmem:[%s5858_s6 + $0x1] ss:$0 sm:$0xff] }
 0x506   : > { %5874 = vst [vmem:[#allocation4_spill] sm:$0xff] %v5651_v24  ;;  %v2421_v17 = vpack.c.bf16 %v2414_v19, %v2413_v21  ;;  %v2396_v12 = vmul.f32 %v4205_v7, %v5651_v24  ;;  %v5659_v23 = vadd.f32 %v2367_v45, %v5280_v34 }
 0x507   : > { %5875 = vst [vmem:[#allocation5_spill] sm:$0xff] %v5655_v2  ;;  %v2399_v11 = vmul.f32 %v4205_v7, %v5655_v2  ;;  %v2411_v14 = vadd.f32 %v4206_v3, %v2398_v5 }
 0x508   : > { %5876 = vst [vmem:[#allocation6_spill] sm:$0xff] %v5659_v23  ;;  %v2409_v53 = vadd.f32 %v4206_v3, %v2396_v12  ;;  %v2397_v28 = vmul.f32 %v4205_v7, %v5659_v23  ;;  %4727 = vmatprep.mubr.msk.bf16.mxu1 %vm709_vm1, %v2421_v17  ;;  %v4213_v7 = vld [vmem:[%s5857_s5 + $0x1] ss:$0 sm:$0xff] }
 0x509   : > { %v2412_v22 = vadd.f32 %v4206_v3, %v2399_v11  ;;  %4728 = vmatmul.mubr.msk.bf16.vlgmr.msra.gmra.mrb[16].mxu1 %vm709_vm1, %v2422_v10  ;;  %v2419_v19 = vmax.f32 %v2411_v14, 0.0 }
 0x50a   : > { %v2410_v30 = vadd.f32 %v4206_v3, %v2397_v28  ;;  %v2417_v13 = vmax.f32 %v2409_v53, 0.0 }
 0x50b   : > { %v2420_v18 = vmax.f32 %v2412_v22, 0.0 }
 0x50c   : > { %v2418_v21 = vmax.f32 %v2410_v30, 0.0 }
 0x50d   : > { %v2424_v34 = vpack.c.bf16 %v2420_v18, %v2419_v19 }
 0x50e   : > { %v2423_v16 = vpack.c.bf16 %v2418_v21, %v2417_v13 }
 0x510   : > { %4731 = vmatprep.mubr.msk.bf16.mxu1 %vm709_vm1, %v2423_v16 }
 0x511   : > { %4732 = vmatmul.mubr.msk.bf16.gmra.mrb[20].mxu1 %vm709_vm1, %v2424_v34 }
 0x5dc   : > { %v4729_v58 = vpop.f32.mrb[16].mxu1 }
 0x5dd   : > { %v2525_v3 = vmul.f32 %v4729_v58, %v4213_v7  ;;  %v2487_v5 = vpop.f32.mrb[17].mxu1 }
 0x5de   : > { %v2523_v45 = vmul.f32 %v4213_v7, %v2487_v5  ;;  %v4730_v17 = vpop.f32.mrb[18].mxu1 }
 0x5df   : > { %v2538_v12 = vadd.f32 %v4214_v4, %v2525_v3  ;;  %v2526_v10 = vmul.f32 %v4730_v17, %v4213_v7  ;;  %v2490_v11 = vpop.f32.mrb[19].mxu1 }
 0x5e0   : > { %v2536_v53 = vadd.f32 %v4214_v4, %v2523_v45  ;;  %v2524_v28 = vmul.f32 %v4213_v7, %v2490_v11 }
 0x5e1   : > { %v2539_v14 = vadd.f32 %v4214_v4, %v2526_v10  ;;  %v2546_v30 = vmax.f32 %v2538_v12, 0.0 }
 0x5e2   : > { %v2537_v22 = vadd.f32 %v4214_v4, %v2524_v28  ;;  %v2544_v13 = vmax.f32 %v2536_v53, 0.0 }
 0x5e3   : > { %v2547_v18 = vmax.f32 %v2539_v14, 0.0 }
 0x5e4   : > { %v2545_v21 = vmax.f32 %v2537_v22, 0.0  ;;  %v4733_v19 = vpop.f32.mrb[20].mxu1 }
 0x5e5   : > { %v2529_v16 = vmul.f32 %v4733_v19, %v4213_v7  ;;  %v2503_v34 = vpop.f32.mrb[21].mxu1  ;;  %v2553_v23 = vpack.c.bf16 %v2547_v18, %v2546_v30 }
 0x5e6   : > { %v2527_v2 = vmul.f32 %v4213_v7, %v2503_v34  ;;  %v4734_v58 = vpop.f32.mrb[22].mxu1  ;;  %v2552_v24 = vpack.c.bf16 %v2545_v21, %v2544_v13  ;;  %v5133_v34 = vld [vmem:[%s5859_s7 + $0x68] sm:$0xff]  }
 0x5e7   : > { %v2542_v5 = vadd.f32 %v4214_v4, %v2529_v16  ;;  %v2530_v6 = vmul.f32 %v4734_v58, %v4213_v7  ;;  %v2506_v3 = vpop.f32.mrb[23].mxu1 }
 0x5e8   : > { %v2540_v17 = vadd.f32 %v4214_v4, %v2527_v2  ;;  %v2528_v8 = vmul.f32 %v4213_v7, %v2506_v3  ;;  %4735 = vmatprep.subr.bf16.mxu0 %v2552_v24 }
 0x5e9   : > { %v2543_v45 = vadd.f32 %v4214_v4, %v2530_v6  ;;  %4736 = vmatpush3.bf16.msra.mxu0 %v2552_v24  ;;  %v2550_v12 = vmax.f32 %v2542_v5, 0.0 }
 0x5ea   : > { %v2541_v10 = vadd.f32 %v4214_v4, %v2528_v8  ;;  %4737 = vmatprep.subr.bf16.mxu0 %v2553_v23  ;;  %v2548_v53 = vmax.f32 %v2540_v17, 0.0  ;;  %v5132_v8 = vld [vmem:[%s5859_s7 + $0x60] sm:$0xff]  }
 0x5eb   : > { %v2551_v11 = vmax.f32 %v2543_v45, 0.0 }
 0x5ec   : > { %v2549_v28 = vmax.f32 %v2541_v10, 0.0 }
 0x5ed   : > { %4738 = vmatpush3.bf16.msra.mxu0 %v2553_v23  ;;  %v2555_v14 = vpack.c.bf16 %v2551_v11, %v2550_v12 }
 0x5ee   : > { %v2554_v22 = vpack.c.bf16 %v2549_v28, %v2548_v53 }
 0x5f0   : > { %4739 = vmatprep.subr.bf16.mxu0 %v2554_v22 }
 0x5f1   : > { %4740 = vmatpush3.bf16.msra.mxu0 %v2554_v22 }
 0x5f2   : > { %4741 = vmatprep.subr.bf16.mxu0 %v2555_v14 }
 0x5f5   : > { %4742 = vmatpush3.bf16.msra.mxu0 %v2555_v14 }
 0x5f8   : > { %4744 = vmatmul.mubr.msk.bf16.vlgmr.msra.gmra.mrb[88].mxu0 %vm1005_vm2, %v5303_v25  ;;  %v5129_v25 = vld [vmem:[%s5859_s7 + $0x50] sm:$0xff]  }
 0x5f9   : > { %4747 = vmatprep.mubr.msk.bf16.mxu0 %vm1005_vm2, %v5308_v26  ;;  %4815 = vmatprep.subr.bf16.mxu1 %v5129_v25  ;;  %v5130_v26 = vld [vmem:[%s5859_s7 + $0x48] sm:$0xff]  }
 0x5fa   : > { %4816 = vmatpush3.bf16.msra.mxu1 %v5129_v25  ;;  %v5134_v25 = vld [vmem:[%s5859_s7 + $0x70] sm:$0xff]  }
 0x5fb   : > { %4825 = vmatprep.subr.bf16.mxu1 %v5130_v26 }
 0x600   : > { %4748 = vmatmul.mubr.msk.bf16.gmra.mrb[92].mxu0 %vm1005_vm2, %v5317_v27 }
 0x601   : > { %4751 = vmatprep.mubr.msk.bf16.mxu0 %vm1005_vm2, %v5322_v29 }
 0x608   : > { %4752 = vmatmul.mubr.msk.bf16.gmra.mrb[96].mxu0 %vm1005_vm2, %v5331_v31 }
 0x609   : > { %4755 = vmatprep.mubr.msk.bf16.mxu0 %vm1005_vm2, %v5336_v32 }
 0x610   : > { %4756 = vmatmul.mubr.msk.bf16.gmra.mrb[100].mxu0 %vm1005_vm2, %v5345_v33 }
 0x611   : > { %4759 = vmatprep.mubr.msk.bf16.mxu0 %vm1005_vm2, %v5350_v35 }
 0x618   : > { %4760 = vmatmul.mubr.msk.bf16.gmra.mrb[104].mxu0 %vm1005_vm2, %v5359_v36 }
 0x619   : > { %4763 = vmatprep.mubr.msk.bf16.mxu0 %vm1005_vm2, %v5364_v37 }
 0x620   : > { %4764 = vmatmul.mubr.msk.bf16.gmra.mrb[108].mxu0 %vm1005_vm2, %v5373_v38 }
 0x621   : > { %4767 = vmatprep.mubr.msk.bf16.mxu0 %vm1005_vm2, %v5378_v39 }
 0x628   : > { %4768 = vmatmul.mubr.msk.bf16.gmra.mrb[112].mxu0 %vm1005_vm2, %v5387_v40 }
 0x629   : > { %4771 = vmatprep.mubr.msk.bf16.mxu0 %vm1005_vm2, %v5392_v41 }
 0x630   : > { %4772 = vmatmul.mubr.msk.bf16.gmra.mrb[116].mxu0 %vm1005_vm2, %v5401_v42 }
 0x631   : > { %4775 = vmatprep.mubr.msk.bf16.mxu0 %vm1005_vm2, %v5406_v43 }
 0x638   : > { %4776 = vmatmul.mubr.msk.bf16.gmra.mrb[120].mxu0 %vm1005_vm2, %v5415_v44 }
 0x639   : > { %4779 = vmatprep.mubr.msk.bf16.mxu0 %vm1005_vm2, %v5420_v46 }
 0x640   : > { %4780 = vmatmul.mubr.msk.bf16.gmra.mrb[124].mxu0 %vm1005_vm2, %v5429_v47 }
 0x641   : > { %4783 = vmatprep.mubr.msk.bf16.mxu0 %vm1005_vm2, %v5434_v48 }
 0x648   : > { %4784 = vmatmul.mubr.msk.bf16.gmra.mrb[128].mxu0 %vm1005_vm2, %v5443_v49  ;;  %v5131_v49 = vld [vmem:[%s5859_s7 + $0x58] sm:$0xff]  }
 0x649   : > { %4787 = vmatprep.mubr.msk.bf16.mxu0 %vm1005_vm2, %v5448_v50 }
 0x650   : > { %4788 = vmatmul.mubr.msk.bf16.gmra.mrb[132].mxu0 %vm1005_vm2, %v5457_v51 }
 0x651   : > { %4791 = vmatprep.mubr.msk.bf16.mxu0 %vm1005_vm2, %v5462_v52 }
 0x658   : > { %4792 = vmatmul.mubr.msk.bf16.gmra.mrb[136].mxu0 %vm1005_vm2, %v5474_v54 }
 0x659   : > { %4795 = vmatprep.mubr.msk.bf16.mxu0 %vm1005_vm2, %v5479_v55 }
 0x660   : > { %4796 = vmatmul.mubr.msk.bf16.gmra.mrb[140].mxu0 %vm1005_vm2, %v5488_v56 }
 0x661   : > { %4799 = vmatprep.mubr.msk.bf16.mxu0 %vm1005_vm2, %v5493_v57  ;;  %v3738_v57 = vld [vmem:[%s5853_s1 + $0xc] sm:$0xf] }
 0x662   : > { %5064 = vmatprep.subr.msk.bf16.mxu0 %vm2310_vm3, %v3738_v57 }
 0x668   : > { %4800 = vmatmul.mubr.msk.bf16.gmra.mrb[144].mxu0 %vm1005_vm2, %v5505_v59 }
 0x669   : > { %4803 = vmatprep.mubr.msk.bf16.mxu0 %vm1005_vm2, %v5510_v60  ;;  %v3752_v60 = vsel %vm2310_vm3, %v3738_v57, 0 }
 0x66a   : > { %4906 = vmatpush3.bf16.msra.mxu0 %v3752_v60 }
 0x670   : > { %4804 = vmatmul.mubr.msk.bf16.gmra.mrb[148].mxu0 %vm1005_vm2, %v5519_v61 }
 0x671   : > { %4807 = vmatprep.mubr.msk.bf16.mxu0 %vm1005_vm2, %v5524_v62 }
 0x678   : > { %4808 = vmatmul.mubr.msk.bf16.gmra.mrb[152].mxu0 %vm1005_vm2, %v5533_v63 }
 0x679   : > { %4811 = vmatprep.mubr.msk.bf16.mxu0 %vm1005_vm2, %v5538_v0 }
 0x680   : > { %4812 = vmatmul.mubr.msk.bf16.gmra.mrb[156].mxu0 %vm1005_vm2, %v5547_v1 }
 0x6cb   : > { %v4745_v27 = vpop.f32.mrb[88].mxu0 }
 0x6cc   : > { %v2590_v29 = vpop.f32.mrb[89].mxu0 }
 0x6cd   : > { %v4746_v31 = vpop.f32.mrb[90].mxu0 }
 0x6ce   : > { %v2878_v32 = vpack.c.bf16 %v4746_v31, %v4745_v27  ;;  %v2593_v33 = vpop.f32.mrb[91].mxu0 }
 0x6cf   : > { %v2877_v35 = vpack.c.bf16 %v2593_v33, %v2590_v29 }
 0x6d3   : > { %v4749_v36 = vpop.f32.mrb[92].mxu0 }
 0x6d4   : > { %v2606_v37 = vpop.f32.mrb[93].mxu0 }
 0x6d5   : > { %v4750_v38 = vpop.f32.mrb[94].mxu0 }
 0x6d6   : > { %v2880_v39 = vpack.c.bf16 %v4750_v38, %v4749_v36  ;;  %v2609_v40 = vpop.f32.mrb[95].mxu0 }
 0x6d7   : > { %v2879_v41 = vpack.c.bf16 %v2609_v40, %v2606_v37 }
 0x6db   : > { %v4753_v42 = vpop.f32.mrb[96].mxu0 }
 0x6dc   : > { %v2622_v43 = vpop.f32.mrb[97].mxu0 }
 0x6dd   : > { %v4754_v44 = vpop.f32.mrb[98].mxu0 }
 0x6de   : > { %v2882_v46 = vpack.c.bf16 %v4754_v44, %v4753_v42  ;;  %v2625_v47 = vpop.f32.mrb[99].mxu0 }
 0x6df   : > { %v2881_v48 = vpack.c.bf16 %v2625_v47, %v2622_v43 }
 0x6e1   : > { %4817 = vmatprep.mubr.msk.bf16.mxu1 %vm505_vm0, %v2881_v48 }
 0x6e2   : > { %4818 = vmatmul.mubr.msk.bf16.vlgmr.msra.gmra.mrb[24].mxu1 %vm505_vm0, %v2882_v46 }
 0x6e3   : > { %v4757_v50 = vpop.f32.mrb[100].mxu0  ;;  %4826 = vmatpush3.bf16.msra.mxu1 %v5130_v26 }
 0x6e4   : > { %v2638_v51 = vpop.f32.mrb[101].mxu0  ;;  %4835 = vmatprep.subr.bf16.mxu1 %v5131_v49 }
 0x6e5   : > { %v4758_v52 = vpop.f32.mrb[102].mxu0 }
 0x6e6   : > { %v2884_v54 = vpack.c.bf16 %v4758_v52, %v4757_v50  ;;  %v2641_v55 = vpop.f32.mrb[103].mxu0 }
 0x6e7   : > { %v2883_v56 = vpack.c.bf16 %v2641_v55, %v2638_v51 }
 0x6e9   : > { %4821 = vmatprep.mubr.msk.bf16.mxu1 %vm505_vm0, %v2883_v56  ;;  %v5136_v56 = vld [vmem:[%s5859_s7 + $0x80] sm:$0xff]  }
 0x6ea   : > { %4822 = vmatmul.mubr.msk.bf16.gmra.mrb[28].mxu1 %vm505_vm0, %v2884_v54 }
 0x6eb   : > { %4827 = vmatprep.mubr.msk.bf16.mxu1 %vm505_vm0, %v2877_v35  ;;  %v4761_v59 = vpop.f32.mrb[104].mxu0 }
 0x6ec   : > { %v2654_v61 = vpop.f32.mrb[105].mxu0 }
 0x6ed   : > { %v4762_v62 = vpop.f32.mrb[106].mxu0 }
 0x6ee   : > { %v2886_v63 = vpack.c.bf16 %v4762_v62, %v4761_v59  ;;  %v2657_v0 = vpop.f32.mrb[107].mxu0 }
 0x6ef   : > { %v2885_v1 = vpack.c.bf16 %v2657_v0, %v2654_v61 }
 0x6f2   : > { %4828 = vmatmul.mubr.msk.bf16.vlgmr.msra.gmra.mrb[24].mxu1 %vm505_vm0, %v2878_v32 }
 0x6f3   : > { %4831 = vmatprep.mubr.msk.bf16.mxu1 %vm505_vm0, %v2879_v41  ;;  %4836 = vmatpush3.bf16.msra.mxu1 %v5131_v49  ;;  %v4765_v6 = vpop.f32.mrb[108].mxu0  ;;  %v5135_v41 = vld [vmem:[%s5859_s7 + $0x78] sm:$0xff]  }
 0x6f4   : > { %v2670_v24 = vpop.f32.mrb[109].mxu0  ;;  %4845 = vmatprep.subr.bf16.mxu1 %v5132_v8 }
 0x6f5   : > { %v4766_v2 = vpop.f32.mrb[110].mxu0 }
 0x6f6   : > { %v2888_v23 = vpack.c.bf16 %v4766_v2, %v4765_v6  ;;  %v2673_v7 = vpop.f32.mrb[111].mxu0 }
 0x6f7   : > { %v2887_v4 = vpack.c.bf16 %v2673_v7, %v2670_v24 }
 0x6fa   : > { %4832 = vmatmul.mubr.msk.bf16.gmra.mrb[28].mxu1 %vm505_vm0, %v2880_v39 }
 0x6fb   : > { %4837 = vmatprep.mubr.msk.bf16.mxu1 %vm505_vm0, %v2885_v1  ;;  %v4769_v30 = vpop.f32.mrb[112].mxu0 }
 0x6fc   : > { %v2686_v18 = vpop.f32.mrb[113].mxu0 }
 0x6fd   : > { %v4770_v13 = vpop.f32.mrb[114].mxu0 }
 0x6fe   : > { %v2890_v21 = vpack.c.bf16 %v4770_v13, %v4769_v30  ;;  %v2689_v19 = vpop.f32.mrb[115].mxu0 }
 0x6ff   : > { %v2889_v16 = vpack.c.bf16 %v2689_v19, %v2686_v18 }
 0x702   : > { %4838 = vmatmul.mubr.msk.bf16.vlgmr.msra.gmra.mrb[24].mxu1 %vm505_vm0, %v2886_v63 }
 0x703   : > { %4846 = vmatpush3.bf16.msra.mxu1 %v5132_v8  ;;  %4841 = vmatprep.mubr.msk.bf16.mxu1 %vm505_vm0, %v2887_v4  ;;  %v4773_v58 = vpop.f32.mrb[116].mxu0 }
 0x704   : > { %v2702_v5 = vpop.f32.mrb[117].mxu0  ;;  %4855 = vmatprep.subr.bf16.mxu1 %v5133_v34 }
 0x705   : > { %v4774_v3 = vpop.f32.mrb[118].mxu0 }
 0x706   : > { %v2892_v17 = vpack.c.bf16 %v4774_v3, %v4773_v58  ;;  %v2705_v45 = vpop.f32.mrb[119].mxu0 }
 0x707   : > { %v2891_v10 = vpack.c.bf16 %v2705_v45, %v2702_v5 }
 0x70a   : > { %4842 = vmatmul.mubr.msk.bf16.gmra.mrb[28].mxu1 %vm505_vm0, %v2888_v23  ;;  %v5137_v23 = vld [vmem:[%s5859_s7 + $0x88] sm:$0xff]  }
 0x70b   : > { %4847 = vmatprep.mubr.msk.bf16.mxu1 %vm505_vm0, %v2889_v16  ;;  %v4777_v12 = vpop.f32.mrb[120].mxu0 }
 0x70c   : > { %v2718_v11 = vpop.f32.mrb[121].mxu0 }
 0x70d   : > { %v4778_v53 = vpop.f32.mrb[122].mxu0 }
 0x70e   : > { %v2894_v28 = vpack.c.bf16 %v4778_v53, %v4777_v12  ;;  %v2721_v14 = vpop.f32.mrb[123].mxu0 }
 0x70f   : > { %v2893_v22 = vpack.c.bf16 %v2721_v14, %v2718_v11 }
 0x712   : > { %4848 = vmatmul.mubr.msk.bf16.vlgmr.msra.gmra.mrb[24].mxu1 %vm505_vm0, %v2890_v21 }
 0x713   : > { %4856 = vmatpush3.bf16.msra.mxu1 %v5133_v34  ;;  %4851 = vmatprep.mubr.msk.bf16.mxu1 %vm505_vm0, %v2891_v10  ;;  %v4781_v26 = vpop.f32.mrb[124].mxu0 }
 0x714   : > { %v2734_v27 = vpop.f32.mrb[125].mxu0  ;;  %4865 = vmatprep.subr.bf16.mxu1 %v5134_v25 }
 0x715   : > { %v4782_v29 = vpop.f32.mrb[126].mxu0 }
 0x716   : > { %v2896_v31 = vpack.c.bf16 %v4782_v29, %v4781_v26  ;;  %v2737_v32 = vpop.f32.mrb[127].mxu0 }
 0x717   : > { %v2895_v33 = vpack.c.bf16 %v2737_v32, %v2734_v27 }
 0x71a   : > { %4852 = vmatmul.mubr.msk.bf16.gmra.mrb[28].mxu1 %vm505_vm0, %v2892_v17 }
 0x71b   : > { %4857 = vmatprep.mubr.msk.bf16.mxu1 %vm505_vm0, %v2893_v22  ;;  %v4785_v35 = vpop.f32.mrb[128].mxu0 }
 0x71c   : > { %v2750_v36 = vpop.f32.mrb[129].mxu0 }
 0x71d   : > { %v4786_v37 = vpop.f32.mrb[130].mxu0 }
 0x71e   : > { %v2898_v38 = vpack.c.bf16 %v4786_v37, %v4785_v35  ;;  %v2753_v39 = vpop.f32.mrb[131].mxu0  ;;  %v5149_v37 = vmov 0.0  }
 0x71f   : > { %v2897_v40 = vpack.c.bf16 %v2753_v39, %v2750_v36  ;;  %v4300_v39 = vld [vmem:[%s5861_s9] ss:$0 sm:$0xff] }
 0x722   : > { %4858 = vmatmul.mubr.msk.bf16.vlgmr.msra.gmra.mrb[24].mxu1 %vm505_vm0, %v2894_v28 }
 0x723   : > { %4866 = vmatpush3.bf16.msra.mxu1 %v5134_v25  ;;  %4861 = vmatprep.mubr.msk.bf16.mxu1 %vm505_vm0, %v2895_v33  ;;  %v4789_v42 = vpop.f32.mrb[132].mxu0 }
 0x724   : > { %v2766_v43 = vpop.f32.mrb[133].mxu0  ;;  %4875 = vmatprep.subr.bf16.mxu1 %v5135_v41 }
 0x725   : > { %v4790_v44 = vpop.f32.mrb[134].mxu0 }
 0x726   : > { %v2900_v46 = vpack.c.bf16 %v4790_v44, %v4789_v42  ;;  %v2769_v47 = vpop.f32.mrb[135].mxu0  ;;  %v4301_v42 = vld [vmem:[%s5862_s10] ss:$0 sm:$0xff] }
 0x727   : > { %v2899_v48 = vpack.c.bf16 %v2769_v47, %v2766_v43 }
 0x72a   : > { %4862 = vmatmul.mubr.msk.bf16.gmra.mrb[28].mxu1 %vm505_vm0, %v2896_v31 }
 0x72b   : > { %4867 = vmatprep.mubr.msk.bf16.mxu1 %vm505_vm0, %v2897_v40  ;;  %v4793_v49 = vpop.f32.mrb[136].mxu0 }
 0x72c   : > { %v2782_v50 = vpop.f32.mrb[137].mxu0 }
 0x72d   : > { %v4794_v51 = vpop.f32.mrb[138].mxu0 }
 0x72e   : > { %v2902_v52 = vpack.c.bf16 %v4794_v51, %v4793_v49  ;;  %v2785_v54 = vpop.f32.mrb[139].mxu0 }
 0x72f   : > { %v2901_v55 = vpack.c.bf16 %v2785_v54, %v2782_v50  ;;  %v5877_v50 = vld [vmem:[#allocation2_spill] sm:$0xff] }
 0x732   : > { %4868 = vmatmul.mubr.msk.bf16.vlgmr.msra.gmra.mrb[24].mxu1 %vm505_vm0, %v2898_v38 }
 0x733   : > { %4876 = vmatpush3.bf16.msra.mxu1 %v5135_v41  ;;  %4871 = vmatprep.mubr.msk.bf16.mxu1 %vm505_vm0, %v2899_v48  ;;  %v4797_v57 = vpop.f32.mrb[140].mxu0 }
 0x734   : > { %v2798_v59 = vpop.f32.mrb[141].mxu0  ;;  %4885 = vmatprep.subr.bf16.mxu1 %v5136_v56 }
 0x735   : > { %v4798_v60 = vpop.f32.mrb[142].mxu0 }
 0x736   : > { %v2904_v61 = vpack.c.bf16 %v4798_v60, %v4797_v57  ;;  %v2801_v62 = vpop.f32.mrb[143].mxu0 }
 0x737   : > { %v2903_v63 = vpack.c.bf16 %v2801_v62, %v2798_v59  ;;  %v5878_v62 = vld [vmem:[#allocation3_spill] sm:$0xff] }
 0x73a   : > { %4872 = vmatmul.mubr.msk.bf16.gmra.mrb[28].mxu1 %vm505_vm0, %v2900_v46 }
 0x73b   : > { %4877 = vmatprep.mubr.msk.bf16.mxu1 %vm505_vm0, %v2901_v55  ;;  %v4801_v0 = vpop.f32.mrb[144].mxu0 }
 0x73c   : > { %v2814_v1 = vpop.f32.mrb[145].mxu0 }
 0x73d   : > { %v4802_v8 = vpop.f32.mrb[146].mxu0 }
 0x73e   : > { %v2906_v6 = vpack.c.bf16 %v4802_v8, %v4801_v0  ;;  %v2817_v24 = vpop.f32.mrb[147].mxu0  ;;  %v5879_v8 = vld [vmem:[#allocation4_spill] sm:$0xff] }
 0x73f   : > { %v2905_v2 = vpack.c.bf16 %v2817_v24, %v2814_v1 }
 0x742   : > { %4878 = vmatmul.mubr.msk.bf16.vlgmr.msra.gmra.mrb[24].mxu1 %vm505_vm0, %v2902_v52 }
 0x743   : > { %4886 = vmatpush3.bf16.msra.mxu1 %v5136_v56  ;;  %4881 = vmatprep.mubr.msk.bf16.mxu1 %vm505_vm0, %v2903_v63  ;;  %v4805_v7 = vpop.f32.mrb[148].mxu0 }
 0x744   : > { %v2830_v4 = vpop.f32.mrb[149].mxu0  ;;  %4895 = vmatprep.subr.bf16.mxu1 %v5137_v23 }
 0x745   : > { %v4806_v30 = vpop.f32.mrb[150].mxu0 }
 0x746   : > { %v2908_v18 = vpack.c.bf16 %v4806_v30, %v4805_v7  ;;  %v2833_v13 = vpop.f32.mrb[151].mxu0 }
 0x747   : > { %v2907_v21 = vpack.c.bf16 %v2833_v13, %v2830_v4  ;;  %v5881_v13 = vld [vmem:[#allocation6_spill] sm:$0xff] }
 0x74a   : > { %4882 = vmatmul.mubr.msk.bf16.gmra.mrb[28].mxu1 %vm505_vm0, %v2904_v61 }
 0x74b   : > { %4887 = vmatprep.mubr.msk.bf16.mxu1 %vm505_vm0, %v2905_v2  ;;  %v4809_v19 = vpop.f32.mrb[152].mxu0 }
 0x74c   : > { %v2846_v16 = vpop.f32.mrb[153].mxu0 }
 0x74d   : > { %v4810_v34 = vpop.f32.mrb[154].mxu0 }
 0x74e   : > { %v2910_v58 = vpack.c.bf16 %v4810_v34, %v4809_v19  ;;  %v2849_v5 = vpop.f32.mrb[155].mxu0 }
 0x74f   : > { %v2909_v3 = vpack.c.bf16 %v2849_v5, %v2846_v16 }
 0x752   : > { %4888 = vmatmul.mubr.msk.bf16.vlgmr.msra.gmra.mrb[24].mxu1 %vm505_vm0, %v2906_v6 }
 0x753   : > { %4896 = vmatpush3.bf16.msra.mxu1 %v5137_v23  ;;  %4891 = vmatprep.mubr.msk.bf16.mxu1 %vm505_vm0, %v2907_v21  ;;  %v4813_v17 = vpop.f32.mrb[156].mxu0  ;;  %v5880_v23 = vld [vmem:[#allocation5_spill] sm:$0xff] }
 0x754   : > { %v2862_v45 = vpop.f32.mrb[157].mxu0  ;;  %4915 = vmatprep.subr.bf16.mxu1 %v5149_v37 }
 0x755   : > { %v4814_v10 = vpop.f32.mrb[158].mxu0 }
 0x756   : > { %v2912_v12 = vpack.c.bf16 %v4814_v10, %v4813_v17  ;;  %v2865_v11 = vpop.f32.mrb[159].mxu0 }
 0x757   : > { %v2911_v53 = vpack.c.bf16 %v2865_v11, %v2862_v45 }
 0x75a   : > { %4892 = vmatmul.mubr.msk.bf16.gmra.mrb[28].mxu1 %vm505_vm0, %v2908_v18 }
 0x75b   : > { %4897 = vmatprep.mubr.msk.bf16.mxu1 %vm505_vm0, %v2909_v3 }
 0x762   : > { %4898 = vmatmul.mubr.msk.bf16.vlgmr.msra.gmra.mrb[24].mxu1 %vm505_vm0, %v2910_v58 }
 0x763   : > { %4901 = vmatprep.mubr.msk.bf16.mxu1 %vm505_vm0, %v2911_v53 }
 0x76a   : > { %4902 = vmatmul.mubr.msk.bf16.gmra.mrb[28].mxu1 %vm505_vm0, %v2912_v12 }
 0x76b   : > { %4923 = vmatprep.mubr.msk.bf16.mxu1 %vm5150_vm5, %v5149_v37 }
 0x835   : > { %v4899_v28 = vpop.f32.mrb[24].mxu1 }
 0x836   : > { %v3695_v14 = vpop.f32.mrb[25].mxu1 }
 0x837   : > { %v4900_v22 = vpop.f32.mrb[26].mxu1 }
 0x838   : > { %v3735_v25 = vpack.c.bf16 %v4900_v22, %v4899_v28  ;;  %v3698_v26 = vpop.f32.mrb[27].mxu1  ;;  %v5138_v28 = vld [vmem:[%s5863_s11] sm:$0xff]   ;;  %v5140_v22 = vld [vmem:[%s5864_s12 + $0x8] sm:$0xff]  }
 0x839   : > { %v3734_v27 = vpack.c.bf16 %v3698_v26, %v3695_v14  ;;  %v5139_v14 = vld [vmem:[%s5864_s12] sm:$0xff]  }
 0x83b   : > { %4907 = vmatprep.mubr.msk.bf16.mxu0 %vm2297_vm4, %v3734_v27 }
 0x83c   : > { %4908 = vmatmul.mubr.msk.bf16.vlgmr.msra.gmra.mrb[160].mxu0 %vm2297_vm4, %v3735_v25 }
 0x83d   : > { %v4903_v29 = vpop.f32.mrb[28].mxu1 }
 0x83e   : > { %v3711_v31 = vpop.f32.mrb[29].mxu1 }
 0x83f   : > { %v4904_v32 = vpop.f32.mrb[30].mxu1 }
 0x840   : > { %v3737_v33 = vpack.c.bf16 %v4904_v32, %v4903_v29  ;;  %v3714_v35 = vpop.f32.mrb[31].mxu1 }
 0x841   : > { %v3736_v36 = vpack.c.bf16 %v3714_v35, %v3711_v31  ;;  %v4304_v35 = vld [vmem:[%s5865_s13] ss:$0 sm:$0xff] }
 0x843   : > { %4911 = vmatprep.mubr.msk.bf16.mxu0 %vm2297_vm4, %v3736_v36 }
 0x844   : > { %4912 = vmatmul.mubr.msk.bf16.gmra.mrb[164].mxu0 %vm2297_vm4, %v3737_v33 }
 0x90f   : > { %v4909_v38 = vpop.f32.mrb[160].mxu0 }
 0x910   : > { %v3821_v40 = vadd.f32 %v4909_v38, %v5629_v20  ;;  %v3788_v41 = vpop.f32.mrb[161].mxu0 }
 0x911   : > { %v3819_v43 = vadd.f32 %v3788_v41, %v5632_v9  ;;  %v4910_v44 = vpop.f32.mrb[162].mxu0 }
 0x912   : > { %v3836_v46 = vmul.f32 %v4300_v39, %v3821_v40  ;;  %v3822_v47 = vadd.f32 %v4910_v44, %v5639_v15  ;;  %v3791_v48 = vpop.f32.mrb[163].mxu0 }
 0x913   : > { %v3834_v49 = vmul.f32 %v4300_v39, %v3819_v43  ;;  %v3820_v51 = vadd.f32 %v3791_v48, %v5877_v50 }
 0x914   : > { %v3851_v52 = vadd.f32 %v4301_v42, %v3836_v46  ;;  %v3837_v54 = vmul.f32 %v4300_v39, %v3822_v47 }
 0x915   : > { %v3849_v55 = vadd.f32 %v4301_v42, %v3834_v49  ;;  %v3835_v56 = vmul.f32 %v4300_v39, %v3820_v51 }
 0x916   : > { %v3852_v20 = vadd.f32 %v4301_v42, %v3837_v54  ;;  %v3859_v60 = vmax.f32 %v3851_v52, 0.0 }
 0x917   : > { %v3850_v57 = vadd.f32 %v4301_v42, %v3835_v56  ;;  %v4913_v59 = vpop.f32.mrb[164].mxu0  ;;  %v3857_v0 = vmax.f32 %v3849_v55, 0.0 }
 0x918   : > { %v3860_v61 = vmax.f32 %v3852_v20, 0.0  ;;  %v3825_v63 = vadd.f32 %v4913_v59, %v5878_v62  ;;  %v3804_v9 = vpop.f32.mrb[165].mxu0 }
 0x919   : > { %v3858_v1 = vmax.f32 %v3850_v57, 0.0  ;;  %v3823_v15 = vadd.f32 %v3804_v9, %v5879_v8  ;;  %v4914_v6 = vpop.f32.mrb[166].mxu0 }
 0x91a   : > { %v3868_v24 = vpack.c.bf16 %v3860_v61, %v3859_v60  ;;  %v3840_v2 = vmul.f32 %v4300_v39, %v3825_v63  ;;  %v3826_v7 = vadd.f32 %v4914_v6, %v5880_v23  ;;  %v3807_v4 = vpop.f32.mrb[167].mxu0 }
 0x91b   : > { %v3867_v30 = vpack.c.bf16 %v3858_v1, %v3857_v0  ;;  %v3838_v18 = vmul.f32 %v4300_v39, %v3823_v15  ;;  %v3824_v21 = vadd.f32 %v3807_v4, %v5881_v13 }
 0x91c   : > { %v3855_v19 = vadd.f32 %v4301_v42, %v3840_v2  ;;  %v3841_v16 = vmul.f32 %v4300_v39, %v3826_v7 }
 0x91d   : > { %v3853_v34 = vadd.f32 %v4301_v42, %v3838_v18  ;;  %v3839_v58 = vmul.f32 %v4300_v39, %v3824_v21  ;;  %4916 = vmatpush3.bf16.msra.mxu1 %v3867_v30 }
 0x91e   : > { %v3856_v5 = vadd.f32 %v4301_v42, %v3841_v16  ;;  %4917 = vmatprep.subr.bf16.mxu1 %v5149_v37  ;;  %v3863_v17 = vmax.f32 %v3855_v19, 0.0 }
 0x91f   : > { %v3854_v3 = vadd.f32 %v4301_v42, %v3839_v58  ;;  %v3861_v10 = vmax.f32 %v3853_v34, 0.0 }
 0x920   : > { %v3864_v45 = vmax.f32 %v3856_v5, 0.0 }
 0x921   : > { %v3862_v12 = vmax.f32 %v3854_v3, 0.0  ;;  %4918 = vmatpush3.bf16.msra.mxu1 %v3868_v24 }
 0x922   : > { %v3870_v11 = vpack.c.bf16 %v3864_v45, %v3863_v17  ;;  %4919 = vmatprep.subr.bf16.mxu1 %v5149_v37 }
 0x923   : > { %v3869_v53 = vpack.c.bf16 %v3862_v12, %v3861_v10 }
 0x925   : > { %4920 = vmatpush3.bf16.msra.mxu1 %v3869_v53 }
 0x926   : > { %4921 = vmatprep.subr.bf16.mxu1 %v5149_v37 }
 0x929   : > { %4922 = vmatpush3.bf16.msra.mxu1 %v3870_v11 }
 0x92a   : > { %4927 = vmatprep.subr.bf16.mxu1 %v5149_v37 }
 0x92c   : > { %4924 = vmatmul.mubr.msk.bf16.vlgmr.msra.gmra.mrb[32].mxu1 %vm1005_vm2, %v5138_v28 }
 0x92d   : > { %4931 = vmatprep.mubr.msk.bf16.mxu1 %vm5150_vm5, %v5149_v37  ;;  %4928 = vmatpush3.bf16.msra.mxu1 %v5139_v14 }
 0x92e   : > { %4929 = vmatprep.subr.bf16.mxu1 %v5149_v37 }
 0x931   : > { %4930 = vmatpush3.bf16.msra.mxu1 %v5140_v22 }
 0x9ff   : > { %v3913_v25 = vpop.f32.mrb[32].mxu1 }
 0xa00   : > { %v4925_v26 = vpop.f32.mrb[33].mxu1  ;;  %v3920_v29 = vmul.f32 0.25, %v3913_v25 }
 0xa01   : > { %v3916_v27 = vpop.f32.mrb[34].mxu1 }
 0xa02   : > { %v3921_v31 = vmul.f32 0.25, %v3916_v27  ;;  %v4926_v32 = vpop.f32.mrb[35].mxu1 }
 0xa04   : > { %v3922_v33 = vpack.c.bf16 %v3921_v31, %v3920_v29 }
 0xa06   : > { %4932 = vmatmul.mubr.msk.bf16.vlgmr.msra.gmra.mrb[36].mxu1 %vm709_vm1, %v3922_v33 }
 0xad9   : > { %v3983_v36 = vpop.f32.mrb[36].mxu1 }
 0xada   : > { %v3984_v37 = vadd.f32 %v4304_v35, %v3983_v36  ;;  %v4933_v38 = vpop.f32.mrb[37].mxu1 }
 0xadb   : > { %v3986_v39 = vpop.f32.mrb[38].mxu1 }
 0xadc   : > { %v4314_v40 = vpack.c.bf16 %v3984_v37, %v3984_v37  ;;  %v3987_v41 = vadd.f32 %v4304_v35, %v3986_v39  ;;  %v4934_v42 = vpop.f32.mrb[39].mxu1 }
 0xade   : > { %3999 = vst.msk [vmem:[%s467_s18] sm:$0xf] %vm3998_vm6, %v4314_v40  ;;  %v4315_v43 = vpack.c.bf16 %v3987_v41, %v3987_v41 }
 0xae0   : > { %4000 = vst.msk [vmem:[%s467_s18 + $0x4] sm:$0xf] %vm3998_vm6, %v4315_v43 }
 0xae1 PF: > { %s24_s29 = sadd.s32 1, %s5147_s29  }
 0xae2   : > { %p21_p4 = scmp.ge.s32.totalorder %s24_s29, 4  }
 0xae4   :  { %23 = sbr.rel (!%p21_p4) target bundleno = 1 (0x1), region = 106 }

</bundles_post_ra>
